<compile_context>
chip_gen: v7x
topology: tpu7x:2x2x1
jax: 0.10.0
libtpu: 0.0.40
codegen_flags: <defaults>
</compile_context>

<pallas_src>
import functools
import math

import jax
import jax.numpy as jnp
from jax import lax
from jax.experimental import pallas as pl
from jax.experimental.pallas import tpu as pltpu

_EPS = 1e-5                     # nn.InstanceNorm2d default eps
_PAD = 128                      # lane-aligned halo width of the im2col staging buffer
_VMEM_LIMIT = 32 * 1024 * 1024  # explicit scoped-VMEM limit (safe on v5e/v6e/v7x)


def _round_up(x, m):
    return (x + m - 1) // m * m


# ----------------------------------------------------------------------------------
# in-kernel helpers
# ----------------------------------------------------------------------------------
def _zero_halos(hpad_ref, HW):
    """Zero only the two lane-aligned 128-wide halos of the im2col staging buffer."""
    rows = hpad_ref.shape[0]
    hpad_ref[:, 0:_PAD] = jnp.zeros((rows, _PAD), jnp.float32)
    hpad_ref[:, _PAD + HW:] = jnp.zeros((rows, _PAD), jnp.float32)


def _im2col_3x3(h, masks_ref, hpad_ref, col_ref, H, W, c_pad):
    """h: (C, H*W).  Stages h (zero-padded to c_pad rows, c_pad % 8 == 0) into the halo
    buffer and writes 9 shifted copies into col_ref so a 3x3 / pad-1 conv becomes a single
    (Cout, 9*c_pad) @ (9*c_pad, H*W) matmul.  Tap slabs start at multiples of c_pad, i.e.
    on 8-sublane boundaries -> unmasked full-tile stores.  Only the 6 dx != 0 taps need a
    mask; dy-only out-of-bounds reads land in the already-zeroed 128-lane halos."""
    C, HW = h.shape
    hpad_ref[0:C, _PAD:_PAD + HW] = h
    if c_pad > C:
        hpad_ref[C:c_pad, _PAD:_PAD + HW] = jnp.zeros((c_pad - C, HW), jnp.float32)
    t = 0
    m = 0
    for dy in (-1, 0, 1):
        for dx in (-1, 0, 1):
            s = dy * W + dx                                       # flat spatial offset
            shifted = hpad_ref[0:c_pad, _PAD + s:_PAD + s + HW]   # (c_pad, H*W)
            if dx == 0:
                col_ref[t * c_pad:(t + 1) * c_pad, :] = shifted
            else:
                col_ref[t * c_pad:(t + 1) * c_pad, :] = shifted * masks_ref[m:m + 1, :]
                m += 1
            t += 1


def _fused_double_instance_norm(h):
    """norm2(norm1(h)) for InstanceNorm2d(affine=False) with one stats pass, using the
    two-pass (mean-subtracted) variance.  After norm1 the per-channel mean is 0 and the
    variance is var/(var+eps), so the second norm is just an extra per-channel scale."""
    mu = jnp.mean(h, axis=1, keepdims=True)                       # (C, 1)
    d = h - mu
    var = jnp.mean(d * d, axis=1, keepdims=True)
    inv1 = lax.rsqrt(var + _EPS)
    var2 = var * inv1 * inv1                                      # variance after norm1
    return d * (inv1 * lax.rsqrt(var2 + _EPS))


# ----------------------------------------------------------------------------------
# host-side weight packing
# ----------------------------------------------------------------------------------
def _pack_conv3x3_weights(w, cin_pad):
    """(Cout, Cin, 3, 3) OIHW -> (Cout, 9*cin_pad) matching the im2col tap/channel order.
    The Cin -> cin_pad zero-padding matches the sublane-aligned column slabs."""
    cout, cin = w.shape[0], w.shape[1]
    wt = jnp.transpose(w, (0, 2, 3, 1))                           # (Cout, 3, 3, Cin)
    wt = jnp.pad(wt, ((0, 0), (0, 0), (0, 0), (0, cin_pad - cin)))
    return wt.reshape(cout, 9 * cin_pad).astype(jnp.float32)


def _make_shift_masks(H, W):
    """Validity masks for the 6 dx != 0 taps only (row wrap-around positions); dx == 0 taps
    read nothing but the zeroed halos when dy is out of range, so they need no mask."""
    ys = jnp.repeat(jnp.arange(H), W).reshape(1, H * W)
    xs = jnp.tile(jnp.arange(W), H).reshape(1, H * W)
    rows = []
    for dy in (-1, 0, 1):
        for dx in (-1, 0, 1):
            if dx == 0:
                continue
            valid = ((ys + dy >= 0) & (ys + dy < H) &
                     (xs + dx >= 0) & (xs + dx < W))
            rows.append(valid.astype(jnp.float32))
    return jnp.concatenate(rows, axis=0)                          # (6, H*W)


# ----------------------------------------------------------------------------------
# generic chain of 3x3 convs (+ optional fused ReLU): conv0/relu0, final1+final2
# ----------------------------------------------------------------------------------
def _conv_chain_kernel(x_ref, masks_ref, *rest, H, W, stages):
    HW = H * W
    n_stages = len(stages)
    wrefs = rest[:2 * n_stages]
    out_ref = rest[2 * n_stages]
    hpad_ref = rest[2 * n_stages + 1]
    col_ref = rest[2 * n_stages + 2]

    _zero_halos(hpad_ref, HW)
    h = x_ref[0]                                                  # (Cin0, H*W)
    for i, (cin_pad, apply_relu) in enumerate(stages):
        w_ref, b_ref = wrefs[2 * i], wrefs[2 * i + 1]
        _im2col_3x3(h, masks_ref, hpad_ref, col_ref, H, W, cin_pad)
        y = jnp.dot(w_ref[...], col_ref[0:9 * cin_pad, :],
                    preferred_element_type=jnp.float32) + b_ref[...]
        if apply_relu:
            y = jnp.maximum(y, 0.0)
        h = y
    out_ref[0] = h.astype(out_ref.dtype)


def conv3x3_chain_pallas(x, masks, layers, H, W):
    """x: (N, Cin0, H*W); layers: list of (w OIHW, b, apply_relu).  One pallas_call."""
    N, cin0, HW = x.shape
    assert HW == H * W and W + 1 <= _PAD
    weight_args, stages = [], []
    c = cin0
    max_cin_pad = 8
    for (w, b, relu) in layers:
        cout = w.shape[0]
        assert w.shape[1] == c
        cin_pad = _round_up(c, 8)
        max_cin_pad = max(max_cin_pad, cin_pad)
        weight_args += [_pack_conv3x3_weights(w, cin_pad),
                        b.reshape(cout, 1).astype(jnp.float32)]
        stages.append((cin_pad, relu))
        c = cout
    cout_final = c

    kernel = functools.partial(_conv_chain_kernel, H=H, W=W, stages=tuple(stages))
    in_specs = [pl.BlockSpec((1, cin0, HW), lambda n: (n, 0, 0)),
                pl.BlockSpec(masks.shape, lambda n: (0, 0))]
    in_specs += [pl.BlockSpec(a.shape, lambda n: (0, 0)) for a in weight_args]

    return pl.pallas_call(
        kernel,
        out_shape=jax.ShapeDtypeStruct((N, cout_final, HW), jnp.float32),
        grid_spec=pltpu.PrefetchScalarGridSpec(
            num_scalar_prefetch=0,
            grid=(N,),
            in_specs=in_specs,
            out_specs=pl.BlockSpec((1, cout_final, HW), lambda n: (n, 0, 0)),
            scratch_shapes=[
                pltpu.VMEM((max_cin_pad, HW + 2 * _PAD), jnp.float32),
                pltpu.VMEM((9 * max_cin_pad, HW), jnp.float32),
            ],
        ),
        compiler_params=pltpu.CompilerParams(
            dimension_semantics=("parallel",),
            vmem_limit_bytes=_VMEM_LIMIT,
        ),
    )(x, masks, *weight_args)


# ----------------------------------------------------------------------------------
# fused _DenseBlock: all layers of a block in one pallas_call, feature map in VMEM
# ----------------------------------------------------------------------------------
def _dense_block_kernel(x_ref, masks_ref, *rest, H, W, c0, growth, cmid_pad, n_layers):
    HW = H * W
    wrefs = rest[:4 * n_layers]
    out_ref = rest[4 * n_layers]
    feat_ref, hpad_ref, col_ref = rest[4 * n_layers + 1:4 * n_layers + 4]

    _zero_halos(hpad_ref, HW)
    # block input channels live at the front of the resident feature scratch
    feat_ref[0:c0, :] = x_ref[0]

    for l in range(n_layers):                                     # static unroll
        w1_ref, b1_ref, w2_ref, b2_ref = wrefs[4 * l:4 * (l + 1)]
        c_in = c0 + l * growth
        # relu1 -> conv1 (1x1): (Cmid, c_in) @ (c_in, H*W)
        h = jnp.maximum(feat_ref[0:c_in, :], 0.0)
        h = jnp.dot(w1_ref[...], h, preferred_element_type=jnp.float32) + b1_ref[...]
        # norm1 -> norm2 (InstanceNorm2d, affine=False), fused single-pass stats
        h = _fused_double_instance_norm(h)
        # relu2 -> conv2 (3x3, pad 1) as one im2col matmul: (Cg, 9*cmid_pad) @ (9*cmid_pad, H*W)
        h = jnp.maximum(h, 0.0)
        _im2col_3x3(h, masks_ref, hpad_ref, col_ref, H, W, cmid_pad)
        y = jnp.dot(w2_ref[...], col_ref[...],
                    preferred_element_type=jnp.float32) + b2_ref[...]
        # append the new growth_rate channels (torch.cat semantics)
        feat_ref[c_in:c_in + growth, :] = y

    out_ref[0] = feat_ref[...]


def dense_block_pallas(x, masks, block_params, H, W):
    """x: (N, c0, H*W).  Runs every _DenseLayer of the block inside one kernel; the growing
    feature map stays resident in a VMEM scratch and is written back once per sample."""
    N, c0, HW = x.shape
    assert HW == H * W and W + 1 <= _PAD
    L = len(block_params)
    growth = block_params[0]["w2"].shape[0]
    cmid = block_params[0]["w1"].shape[0]
    cmid_pad = _round_up(cmid, 8)
    c_total = c0 + L * growth

    weight_args = []
    for l, lp in enumerate(block_params):
        c_in = c0 + l * growth
        assert lp["w1"].shape[0] == cmid and lp["w1"].shape[1] == c_in
        weight_args += [
            lp["w1"].reshape(cmid, c_in).astype(jnp.float32),
            lp["b1"].reshape(cmid, 1).astype(jnp.float32),
            _pack_conv3x3_weights(lp["w2"], cmid_pad),
            lp["b2"].reshape(growth, 1).astype(jnp.float32),
        ]

    kernel = functools.partial(_dense_block_kernel, H=H, W=W, c0=c0, growth=growth,
                               cmid_pad=cmid_pad, n_layers=L)
    in_specs = [pl.BlockSpec((1, c0, HW), lambda n: (n, 0, 0)),
                pl.BlockSpec(masks.shape, lambda n: (0, 0))]
    in_specs += [pl.BlockSpec(a.shape, lambda n: (0, 0)) for a in weight_args]

    return pl.pallas_call(
        kernel,
        out_shape=jax.ShapeDtypeStruct((N, c_total, HW), jnp.float32),
        grid_spec=pltpu.PrefetchScalarGridSpec(
            num_scalar_prefetch=0,
            grid=(N,),
            in_specs=in_specs,
            out_specs=pl.BlockSpec((1, c_total, HW), lambda n: (n, 0, 0)),
            scratch_shapes=[
                pltpu.VMEM((c_total, HW), jnp.float32),             # resident feature map
                pltpu.VMEM((cmid_pad, HW + 2 * _PAD), jnp.float32), # im2col halo buffer
                pltpu.VMEM((9 * cmid_pad, HW), jnp.float32),        # im2col column
            ],
        ),
        compiler_params=pltpu.CompilerParams(
            dimension_semantics=("parallel",),
            vmem_limit_bytes=_VMEM_LIMIT,
        ),
    )(x, masks, *weight_args)


# ----------------------------------------------------------------------------------
# full DenseNet forward (NCHW in / NCHW out) -- 4 pallas_calls total
# ----------------------------------------------------------------------------------
def densenet_forward(x_nchw, params):
    N, cin, H, W = x_nchw.shape
    HW = H * W
    masks = _make_shift_masks(H, W)
    h = x_nchw.reshape(N, cin, HW)

    # conv0 + relu0 (single kernel)
    h = conv3x3_chain_pallas(
        h, masks, [(params["conv0_w"], params["conv0_b"], True)], H, W)

    # each dense block fully fused into one kernel
    # TODO(synk): F.dropout for drop_rate > 0 not implemented (demo uses drop_rate=0).
    for block in params["blocks"]:
        h = dense_block_pallas(h, masks, block, H, W)

    # conv_final_1 + conv_final_2 fused into one kernel
    h = conv3x3_chain_pallas(
        h, masks,
        [(params["final1_w"], params["final1_b"], False),
         (params["final2_w"], params["final2_b"], False)], H, W)
    return h.reshape(N, h.shape[1], H, W)


# ----------------------------------------------------------------------------------
# synthetic parameter init (mirrors DenseNet's sqrt(2/n) conv init; shapes from spec)
# ----------------------------------------------------------------------------------
def init_params(key, *, in_dims, num_init_features, block_config, bn_size,
                growth_rate, out_dims):
    def conv_init(k, cout, cin, ksz):
        kw, kb = jax.random.split(k)
        n = cout * ksz * ksz
        w = jax.random.normal(kw, (cout, cin, ksz, ksz), jnp.float32) * math.sqrt(2.0 / n)
        b = 0.05 * jax.random.normal(kb, (cout,), jnp.float32)
        return w, b

    params = {"blocks": []}
    key, k0 = jax.random.split(key)
    params["conv0_w"], params["conv0_b"] = conv_init(k0, num_init_features, in_dims, 3)
    c = num_init_features
    for num_layers in block_config:
        block = []
        for i in range(num_layers):
            cin = c + i * growth_rate
            cmid = bn_size * growth_rate
            key, k1, k2 = jax.random.split(key, 3)
            w1, b1 = conv_init(k1, cmid, cin, 1)
            w2, b2 = conv_init(k2, growth_rate, cmid, 3)
            block.append({"w1": w1, "b1": b1, "w2": w2, "b2": b2})
        params["blocks"].append(block)
        c += num_layers * growth_rate
    key, kf1, kf2 = jax.random.split(key, 3)
    params["final1_w"], params["final1_b"] = conv_init(kf1, c // 2, c, 3)
    params["final2_w"], params["final2_b"] = conv_init(kf2, out_dims, c // 2, 3)
    return params


# ---------------- pure-JAX reference (correctness check only) ----------------
def _instance_norm_ref(x):
    mu = jnp.mean(x, axis=(2, 3), keepdims=True)
    var = jnp.mean((x - mu) ** 2, axis=(2, 3), keepdims=True)
    return (x - mu) / jnp.sqrt(var + _EPS)


def _conv_ref(x, w, b, padding):
    y = lax.conv_general_dilated(x, w, (1, 1), padding,
                                 dimension_numbers=("NCHW", "OIHW", "NCHW"))
    return y + b.reshape(1, -1, 1, 1)


def _dense_layer_ref(x, lp):
    h = jnp.maximum(x, 0.0)                                       # relu1
    h = _conv_ref(h, lp["w1"], lp["b1"], "VALID")                 # conv1 (1x1)
    h = _instance_norm_ref(h)                                     # norm1
    h = _instance_norm_ref(h)                                     # norm2
    h = jnp.maximum(h, 0.0)                                       # relu2
    return _conv_ref(h, lp["w2"], lp["b2"], "SAME")               # conv2 (3x3)


def densenet_ref(x, params):
    h = jnp.maximum(_conv_ref(x, params["conv0_w"], params["conv0_b"], "SAME"), 0.0)
    for block in params["blocks"]:
        feats = [h]
        for lp in block:
            feats.append(_dense_layer_ref(jnp.concatenate(feats, axis=1), lp))
        h = jnp.concatenate(feats, axis=1)
    h = _conv_ref(h, params["final1_w"], params["final1_b"], "SAME")
    h = _conv_ref(h, params["final2_w"], params["final2_b"], "SAME")
    return h


if __name__ == "__main__":
    # Small DenseNet: growth_rate=4, block_config=(2, 2), num_init_features=8,
    # bn_size=2, in_dims=4, out_dims=2, drop_rate=0, bias=True.
    in_dims, out_dims = 4, 2
    growth_rate, block_config, num_init_features, bn_size = 4, (2, 2), 8, 2
    N, H, W = 2, 16, 16

    key = jax.random.PRNGKey(0)
    kx, kp = jax.random.split(key)
    x = jax.random.normal(kx, (N, in_dims, H, W), jnp.float32)
    params = init_params(kp, in_dims=in_dims, num_init_features=num_init_features,
                         block_config=block_config, bn_size=bn_size,
                         growth_rate=growth_rate, out_dims=out_dims)

    fwd = jax.jit(densenet_forward)
    out = jax.block_until_ready(fwd(x, params))
    assert out.shape == (N, out_dims, H, W), out.shape

    # Tolerance covers MXU default-precision f32 matmuls vs XLA's conv on both sides;
    # the instance-norm statistics themselves use two-pass (mean-subtracted) variance.
    ref = densenet_ref(x, params)
    err = float(jnp.max(jnp.abs(out - ref)))
    assert err < 2e-2, f"mismatch vs reference: {err}"
    print("KERNEL_OK")
</pallas_src>

<mosaic_0001>
module attributes {stable_mosaic.version = 11 : i64} {
  func.func @_conv_chain_kernel(%arg0: i32, %arg1: memref<1x4x256xf32, #tpu.memory_space<vmem>>, %arg2: memref<6x256xf32, #tpu.memory_space<vmem>>, %arg3: memref<8x72xf32, #tpu.memory_space<vmem>>, %arg4: memref<8x1xf32, #tpu.memory_space<vmem>>, %arg5: memref<1x8x256xf32, #tpu.memory_space<vmem>>, %arg6: memref<8x512xf32, #tpu.memory_space<vmem>>, %arg7: memref<72x256xf32, #tpu.memory_space<vmem>>) attributes {dimension_semantics = [#tpu.dimension_semantics<parallel>], iteration_bounds = array<i64: 2>, scalar_prefetch = 0 : i64, scratch_operands = 2 : i64, tpu.core_type = #tpu.core_type<tc>, window_params = [{transform_indices = @transform_0, window_bounds = array<i64: 1, 4, 256>}, {pipeline_mode = #tpu.pipeline_mode<synchronous>, transform_indices = @transform_1, window_bounds = array<i64: 6, 256>}, {pipeline_mode = #tpu.pipeline_mode<synchronous>, transform_indices = @transform_2, window_bounds = array<i64: 8, 72>}, {pipeline_mode = #tpu.pipeline_mode<synchronous>, transform_indices = @transform_3, window_bounds = array<i64: 8, 1>}, {transform_indices = @transform_4, window_bounds = array<i64: 1, 8, 256>}]} {
    %cst = arith.constant 0.000000e+00 : f32
    %0 = vector.broadcast %cst : f32 to vector<8x128xf32>
    %c0 = arith.constant 0 : index
    %c0_0 = arith.constant 0 : index
    %1 = vector.load %arg6[%c0, %c0_0] : memref<8x512xf32, #tpu.memory_space<vmem>>, vector<8x128xf32>
    tpu.vector_store %arg6[%c0, %c0_0], %0 {strides = array<i32>} : memref<8x512xf32, #tpu.memory_space<vmem>>, vector<8x128xf32>,
    %cst_1 = arith.constant 0.000000e+00 : f32
    %2 = vector.broadcast %cst_1 : f32 to vector<8x128xf32>
    %c0_2 = arith.constant 0 : index
    %c384 = arith.constant 384 : index
    %3 = vector.load %arg6[%c0_2, %c384] : memref<8x512xf32, #tpu.memory_space<vmem>>, vector<8x128xf32>
    tpu.vector_store %arg6[%c0_2, %c384], %2 {strides = array<i32>} : memref<8x512xf32, #tpu.memory_space<vmem>>, vector<8x128xf32>,
    %c0_3 = arith.constant 0 : index
    %c0_4 = arith.constant 0 : index
    %c0_5 = arith.constant 0 : index
    %4 = vector.load %arg1[%c0_3, %c0_4, %c0_5] : memref<1x4x256xf32, #tpu.memory_space<vmem>>, vector<1x4x256xf32>
    %5 = vector.shape_cast %4 : vector<1x4x256xf32> to vector<4x256xf32>
    %c0_6 = arith.constant 0 : index
    %c128 = arith.constant 128 : index
    %6 = vector.load %arg6[%c0_6, %c128] : memref<8x512xf32, #tpu.memory_space<vmem>>, vector<4x256xf32>
    tpu.vector_store %arg6[%c0_6, %c128], %5 {strides = array<i32>} : memref<8x512xf32, #tpu.memory_space<vmem>>, vector<4x256xf32>,
    %cst_7 = arith.constant 0.000000e+00 : f32
    %7 = vector.broadcast %cst_7 : f32 to vector<4x256xf32>
    %c4 = arith.constant 4 : index
    %c128_8 = arith.constant 128 : index
    %8 = vector.load %arg6[%c4, %c128_8] : memref<8x512xf32, #tpu.memory_space<vmem>>, vector<4x256xf32>
    tpu.vector_store %arg6[%c4, %c128_8], %7 {strides = array<i32>} : memref<8x512xf32, #tpu.memory_space<vmem>>, vector<4x256xf32>,
    %c0_9 = arith.constant 0 : index
    %c111 = arith.constant 111 : index
    %9 = vector.load %arg6[%c0_9, %c111] : memref<8x512xf32, #tpu.memory_space<vmem>>, vector<8x256xf32>
    %c0_10 = arith.constant 0 : index
    %c0_11 = arith.constant 0 : index
    %10 = vector.load %arg2[%c0_10, %c0_11] : memref<6x256xf32, #tpu.memory_space<vmem>>, vector<1x256xf32>
    %11 = vector.broadcast %10 : vector<1x256xf32> to vector<8x256xf32>
    %12 = arith.mulf %9, %11 : vector<8x256xf32>
    %c0_12 = arith.constant 0 : index
    %c0_13 = arith.constant 0 : index
    %13 = vector.load %arg7[%c0_12, %c0_13] : memref<72x256xf32, #tpu.memory_space<vmem>>, vector<8x256xf32>
    tpu.vector_store %arg7[%c0_12, %c0_13], %12 {strides = array<i32>} : memref<72x256xf32, #tpu.memory_space<vmem>>, vector<8x256xf32>,
    %c0_14 = arith.constant 0 : index
    %c112 = arith.constant 112 : index
    %14 = vector.load %arg6[%c0_14, %c112] : memref<8x512xf32, #tpu.memory_space<vmem>>, vector<8x256xf32>
    %c8 = arith.constant 8 : index
    %c0_15 = arith.constant 0 : index
    %15 = vector.load %arg7[%c8, %c0_15] : memref<72x256xf32, #tpu.memory_space<vmem>>, vector<8x256xf32>
    tpu.vector_store %arg7[%c8, %c0_15], %14 {strides = array<i32>} : memref<72x256xf32, #tpu.memory_space<vmem>>, vector<8x256xf32>,
    %c0_16 = arith.constant 0 : index
    %c113 = arith.constant 113 : index
    %16 = vector.load %arg6[%c0_16, %c113] : memref<8x512xf32, #tpu.memory_space<vmem>>, vector<8x256xf32>
    %c1 = arith.constant 1 : index
    %c0_17 = arith.constant 0 : index
    %17 = vector.load %arg2[%c1, %c0_17] : memref<6x256xf32, #tpu.memory_space<vmem>>, vector<1x256xf32>
    %18 = vector.broadcast %17 : vector<1x256xf32> to vector<8x256xf32>
    %19 = arith.mulf %16, %18 : vector<8x256xf32>
    %c16 = arith.constant 16 : index
    %c0_18 = arith.constant 0 : index
    %20 = vector.load %arg7[%c16, %c0_18] : memref<72x256xf32, #tpu.memory_space<vmem>>, vector<8x256xf32>
    tpu.vector_store %arg7[%c16, %c0_18], %19 {strides = array<i32>} : memref<72x256xf32, #tpu.memory_space<vmem>>, vector<8x256xf32>,
    %c0_19 = arith.constant 0 : index
    %c127 = arith.constant 127 : index
    %21 = vector.load %arg6[%c0_19, %c127] : memref<8x512xf32, #tpu.memory_space<vmem>>, vector<8x256xf32>
    %c2 = arith.constant 2 : index
    %c0_20 = arith.constant 0 : index
    %22 = vector.load %arg2[%c2, %c0_20] : memref<6x256xf32, #tpu.memory_space<vmem>>, vector<1x256xf32>
    %23 = vector.broadcast %22 : vector<1x256xf32> to vector<8x256xf32>
    %24 = arith.mulf %21, %23 : vector<8x256xf32>
    %c24 = arith.constant 24 : index
    %c0_21 = arith.constant 0 : index
    %25 = vector.load %arg7[%c24, %c0_21] : memref<72x256xf32, #tpu.memory_space<vmem>>, vector<8x256xf32>
    tpu.vector_store %arg7[%c24, %c0_21], %24 {strides = array<i32>} : memref<72x256xf32, #tpu.memory_space<vmem>>, vector<8x256xf32>,
    %c0_22 = arith.constant 0 : index
    %c128_23 = arith.constant 128 : index
    %26 = vector.load %arg6[%c0_22, %c128_23] : memref<8x512xf32, #tpu.memory_space<vmem>>, vector<8x256xf32>
    %c32 = arith.constant 32 : index
    %c0_24 = arith.constant 0 : index
    %27 = vector.load %arg7[%c32, %c0_24] : memref<72x256xf32, #tpu.memory_space<vmem>>, vector<8x256xf32>
    tpu.vector_store %arg7[%c32, %c0_24], %26 {strides = array<i32>} : memref<72x256xf32, #tpu.memory_space<vmem>>, vector<8x256xf32>,
    %c0_25 = arith.constant 0 : index
    %c129 = arith.constant 129 : index
    %28 = vector.load %arg6[%c0_25, %c129] : memref<8x512xf32, #tpu.memory_space<vmem>>, vector<8x256xf32>
    %c3 = arith.constant 3 : index
    %c0_26 = arith.constant 0 : index
    %29 = vector.load %arg2[%c3, %c0_26] : memref<6x256xf32, #tpu.memory_space<vmem>>, vector<1x256xf32>
    %30 = vector.broadcast %29 : vector<1x256xf32> to vector<8x256xf32>
    %31 = arith.mulf %28, %30 : vector<8x256xf32>
    %c40 = arith.constant 40 : index
    %c0_27 = arith.constant 0 : index
    %32 = vector.load %arg7[%c40, %c0_27] : memref<72x256xf32, #tpu.memory_space<vmem>>, vector<8x256xf32>
    tpu.vector_store %arg7[%c40, %c0_27], %31 {strides = array<i32>} : memref<72x256xf32, #tpu.memory_space<vmem>>, vector<8x256xf32>,
    %c0_28 = arith.constant 0 : index
    %c143 = arith.constant 143 : index
    %33 = vector.load %arg6[%c0_28, %c143] : memref<8x512xf32, #tpu.memory_space<vmem>>, vector<8x256xf32>
    %c4_29 = arith.constant 4 : index
    %c0_30 = arith.constant 0 : index
    %34 = vector.load %arg2[%c4_29, %c0_30] : memref<6x256xf32, #tpu.memory_space<vmem>>, vector<1x256xf32>
    %35 = vector.broadcast %34 : vector<1x256xf32> to vector<8x256xf32>
    %36 = arith.mulf %33, %35 : vector<8x256xf32>
    %c48 = arith.constant 48 : index
    %c0_31 = arith.constant 0 : index
    %37 = vector.load %arg7[%c48, %c0_31] : memref<72x256xf32, #tpu.memory_space<vmem>>, vector<8x256xf32>
    tpu.vector_store %arg7[%c48, %c0_31], %36 {strides = array<i32>} : memref<72x256xf32, #tpu.memory_space<vmem>>, vector<8x256xf32>,
    %c0_32 = arith.constant 0 : index
    %c144 = arith.constant 144 : index
    %38 = vector.load %arg6[%c0_32, %c144] : memref<8x512xf32, #tpu.memory_space<vmem>>, vector<8x256xf32>
    %c56 = arith.constant 56 : index
    %c0_33 = arith.constant 0 : index
    %39 = vector.load %arg7[%c56, %c0_33] : memref<72x256xf32, #tpu.memory_space<vmem>>, vector<8x256xf32>
    tpu.vector_store %arg7[%c56, %c0_33], %38 {strides = array<i32>} : memref<72x256xf32, #tpu.memory_space<vmem>>, vector<8x256xf32>,
    %c0_34 = arith.constant 0 : index
    %c145 = arith.constant 145 : index
    %40 = vector.load %arg6[%c0_34, %c145] : memref<8x512xf32, #tpu.memory_space<vmem>>, vector<8x256xf32>
    %c5 = arith.constant 5 : index
    %c0_35 = arith.constant 0 : index
    %41 = vector.load %arg2[%c5, %c0_35] : memref<6x256xf32, #tpu.memory_space<vmem>>, vector<1x256xf32>
    %42 = vector.broadcast %41 : vector<1x256xf32> to vector<8x256xf32>
    %43 = arith.mulf %40, %42 : vector<8x256xf32>
    %c64 = arith.constant 64 : index
    %c0_36 = arith.constant 0 : index
    %44 = vector.load %arg7[%c64, %c0_36] : memref<72x256xf32, #tpu.memory_space<vmem>>, vector<8x256xf32>
    tpu.vector_store %arg7[%c64, %c0_36], %43 {strides = array<i32>} : memref<72x256xf32, #tpu.memory_space<vmem>>, vector<8x256xf32>,
    %c0_37 = arith.constant 0 : index
    %c0_38 = arith.constant 0 : index
    %45 = vector.load %arg3[%c0_37, %c0_38] : memref<8x72xf32, #tpu.memory_space<vmem>>, vector<8x72xf32>
    %c0_39 = arith.constant 0 : index
    %c0_40 = arith.constant 0 : index
    %46 = vector.load %arg7[%c0_39, %c0_40] : memref<72x256xf32, #tpu.memory_space<vmem>>, vector<72x256xf32>
    %cst_41 = arith.constant dense<0.000000e+00> : vector<8x256xf32>
    %47 = tpu.matmul %45, %46, %cst_41 {dimension_numbers = #tpu.dot_dimension_numbers<[1], [0], [0], [1], [0, 0, 1, 1], [], []>} : vector<8x72xf32>, vector<72x256xf32>, vector<8x256xf32> -> vector<8x256xf32>
    %c0_42 = arith.constant 0 : index
    %c0_43 = arith.constant 0 : index
    %48 = vector.load %arg4[%c0_42, %c0_43] : memref<8x1xf32, #tpu.memory_space<vmem>>, vector<8x1xf32>
    %49 = vector.broadcast %48 : vector<8x1xf32> to vector<8x256xf32>
    %50 = arith.addf %47, %49 : vector<8x256xf32>
    %cst_44 = arith.constant 0.000000e+00 : f32
    %51 = vector.broadcast %cst_44 : f32 to vector<8x256xf32>
    %52 = arith.maximumf %50, %51 : vector<8x256xf32>
    %c0_45 = arith.constant 0 : index
    %c0_46 = arith.constant 0 : index
    %c0_47 = arith.constant 0 : index
    %53 = vector.load %arg5[%c0_45, %c0_46, %c0_47] : memref<1x8x256xf32, #tpu.memory_space<vmem>>, vector<1x8x256xf32>
    %54 = vector.shape_cast %53 : vector<1x8x256xf32> to vector<8x256xf32>
    %55 = vector.shape_cast %52 : vector<8x256xf32> to vector<1x8x256xf32>
    tpu.vector_store %arg5[%c0_45, %c0_46, %c0_47], %55 {strides = array<i32>} : memref<1x8x256xf32, #tpu.memory_space<vmem>>, vector<1x8x256xf32>,
    return
  }
  func.func @transform_0(%arg0: i32) -> (i32, i32, i32) {
    %c0_i32 = arith.constant 0 : i32
    %c0_i32_0 = arith.constant 0 : i32
    %c0_i32_1 = arith.constant 0 : i32
    return %arg0, %c0_i32, %c0_i32_0 : i32, i32, i32
  }
  func.func @transform_1(%arg0: i32) -> (i32, i32) {
    %c0_i32 = arith.constant 0 : i32
    %c0_i32_0 = arith.constant 0 : i32
    %c0_i32_1 = arith.constant 0 : i32
    return %c0_i32, %c0_i32_0 : i32, i32
  }
  func.func @transform_2(%arg0: i32) -> (i32, i32) {
    %c0_i32 = arith.constant 0 : i32
    %c0_i32_0 = arith.constant 0 : i32
    %c0_i32_1 = arith.constant 0 : i32
    return %c0_i32, %c0_i32_0 : i32, i32
  }
  func.func @transform_3(%arg0: i32) -> (i32, i32) {
    %c0_i32 = arith.constant 0 : i32
    %c0_i32_0 = arith.constant 0 : i32
    %c0_i32_1 = arith.constant 0 : i32
    return %c0_i32, %c0_i32_0 : i32, i32
  }
  func.func @transform_4(%arg0: i32) -> (i32, i32, i32) {
    %c0_i32 = arith.constant 0 : i32
    %c0_i32_0 = arith.constant 0 : i32
    %c0_i32_1 = arith.constant 0 : i32
    return %arg0, %c0_i32, %c0_i32_0 : i32, i32, i32
  }
}

module attributes {stable_mosaic.version = 11 : i64} {
  func.func @_dense_block_kernel(%arg0: i32, %arg1: memref<1x16x256xf32, #tpu.memory_space<vmem>>, %arg2: memref<6x256xf32, #tpu.memory_space<vmem>>, %arg3: memref<8x16xf32, #tpu.memory_space<vmem>>, %arg4: memref<8x1xf32, #tpu.memory_space<vmem>>, %arg5: memref<4x72xf32, #tpu.memory_space<vmem>>, %arg6: memref<4x1xf32, #tpu.memory_space<vmem>>, %arg7: memref<8x20xf32, #tpu.memory_space<vmem>>, %arg8: memref<8x1xf32, #tpu.memory_space<vmem>>, %arg9: memref<4x72xf32, #tpu.memory_space<vmem>>, %arg10: memref<4x1xf32, #tpu.memory_space<vmem>>, %arg11: memref<1x24x256xf32, #tpu.memory_space<vmem>>, %arg12: memref<24x256xf32, #tpu.memory_space<vmem>>, %arg13: memref<8x512xf32, #tpu.memory_space<vmem>>, %arg14: memref<72x256xf32, #tpu.memory_space<vmem>>) attributes {dimension_semantics = [#tpu.dimension_semantics<parallel>], iteration_bounds = array<i64: 2>, scalar_prefetch = 0 : i64, scratch_operands = 3 : i64, tpu.core_type = #tpu.core_type<tc>, window_params = [{transform_indices = @transform_0, window_bounds = array<i64: 1, 16, 256>}, {pipeline_mode = #tpu.pipeline_mode<synchronous>, transform_indices = @transform_1, window_bounds = array<i64: 6, 256>}, {pipeline_mode = #tpu.pipeline_mode<synchronous>, transform_indices = @transform_2, window_bounds = array<i64: 8, 16>}, {pipeline_mode = #tpu.pipeline_mode<synchronous>, transform_indices = @transform_3, window_bounds = array<i64: 8, 1>}, {pipeline_mode = #tpu.pipeline_mode<synchronous>, transform_indices = @transform_4, window_bounds = array<i64: 4, 72>}, {pipeline_mode = #tpu.pipeline_mode<synchronous>, transform_indices = @transform_5, window_bounds = array<i64: 4, 1>}, {pipeline_mode = #tpu.pipeline_mode<synchronous>, transform_indices = @transform_6, window_bounds = array<i64: 8, 20>}, {pipeline_mode = #tpu.pipeline_mode<synchronous>, transform_indices = @transform_7, window_bounds = array<i64: 8, 1>}, {pipeline_mode = #tpu.pipeline_mode<synchronous>, transform_indices = @transform_8, window_bounds = array<i64: 4, 72>}, {pipeline_mode = #tpu.pipeline_mode<synchronous>, transform_indices = @transform_9, window_bounds = array<i64: 4, 1>}, {transform_indices = @transform_10, window_bounds = array<i64: 1, 24, 256>}]} {
    %cst = arith.constant 0.000000e+00 : f32
    %0 = vector.broadcast %cst : f32 to vector<8x128xf32>
    %c0 = arith.constant 0 : index
    %c0_0 = arith.constant 0 : index
    %1 = vector.load %arg13[%c0, %c0_0] : memref<8x512xf32, #tpu.memory_space<vmem>>, vector<8x128xf32>
    tpu.vector_store %arg13[%c0, %c0_0], %0 {strides = array<i32>} : memref<8x512xf32, #tpu.memory_space<vmem>>, vector<8x128xf32>,
    %cst_1 = arith.constant 0.000000e+00 : f32
    %2 = vector.broadcast %cst_1 : f32 to vector<8x128xf32>
    %c0_2 = arith.constant 0 : index
    %c384 = arith.constant 384 : index
    %3 = vector.load %arg13[%c0_2, %c384] : memref<8x512xf32, #tpu.memory_space<vmem>>, vector<8x128xf32>
    tpu.vector_store %arg13[%c0_2, %c384], %2 {strides = array<i32>} : memref<8x512xf32, #tpu.memory_space<vmem>>, vector<8x128xf32>,
    %c0_3 = arith.constant 0 : index
    %c0_4 = arith.constant 0 : index
    %c0_5 = arith.constant 0 : index
    %4 = vector.load %arg1[%c0_3, %c0_4, %c0_5] : memref<1x16x256xf32, #tpu.memory_space<vmem>>, vector<1x16x256xf32>
    %5 = vector.shape_cast %4 : vector<1x16x256xf32> to vector<16x256xf32>
    %c0_6 = arith.constant 0 : index
    %c0_7 = arith.constant 0 : index
    %6 = vector.load %arg12[%c0_6, %c0_7] : memref<24x256xf32, #tpu.memory_space<vmem>>, vector<16x256xf32>
    tpu.vector_store %arg12[%c0_6, %c0_7], %5 {strides = array<i32>} : memref<24x256xf32, #tpu.memory_space<vmem>>, vector<16x256xf32>,
    %c0_8 = arith.constant 0 : index
    %c0_9 = arith.constant 0 : index
    %7 = vector.load %arg12[%c0_8, %c0_9] : memref<24x256xf32, #tpu.memory_space<vmem>>, vector<16x256xf32>
    %cst_10 = arith.constant 0.000000e+00 : f32
    %8 = vector.broadcast %cst_10 : f32 to vector<16x256xf32>
    %9 = arith.maximumf %7, %8 : vector<16x256xf32>
    %c0_11 = arith.constant 0 : index
    %c0_12 = arith.constant 0 : index
    %10 = vector.load %arg3[%c0_11, %c0_12] : memref<8x16xf32, #tpu.memory_space<vmem>>, vector<8x16xf32>
    %cst_13 = arith.constant dense<0.000000e+00> : vector<8x256xf32>
    %11 = tpu.matmul %10, %9, %cst_13 {dimension_numbers = #tpu.dot_dimension_numbers<[1], [0], [0], [1], [0, 0, 1, 1], [], []>} : vector<8x16xf32>, vector<16x256xf32>, vector<8x256xf32> -> vector<8x256xf32>
    %c0_14 = arith.constant 0 : index
    %c0_15 = arith.constant 0 : index
    %12 = vector.load %arg4[%c0_14, %c0_15] : memref<8x1xf32, #tpu.memory_space<vmem>>, vector<8x1xf32>
    %13 = vector.broadcast %12 : vector<8x1xf32> to vector<8x256xf32>
    %14 = arith.addf %11, %13 : vector<8x256xf32>
    %cst_16 = arith.constant dense<0.000000e+00> : vector<8xf32>
    %15 = vector.multi_reduction <add>, %14, %cst_16 [1] : vector<8x256xf32> to vector<8xf32>
    %16 = vector.shape_cast %15 : vector<8xf32> to vector<8x1xf32>
    %cst_17 = arith.constant 2.560000e+02 : f32
    %17 = vector.broadcast %cst_17 : f32 to vector<8x1xf32>
    %18 = arith.divf %16, %17 : vector<8x1xf32>
    %19 = vector.broadcast %18 : vector<8x1xf32> to vector<8x256xf32>
    %20 = arith.subf %14, %19 : vector<8x256xf32>
    %21 = arith.mulf %20, %20 : vector<8x256xf32>
    %cst_18 = arith.constant dense<0.000000e+00> : vector<8xf32>
    %22 = vector.multi_reduction <add>, %21, %cst_18 [1] : vector<8x256xf32> to vector<8xf32>
    %23 = vector.shape_cast %22 : vector<8xf32> to vector<8x1xf32>
    %cst_19 = arith.constant 2.560000e+02 : f32
    %24 = vector.broadcast %cst_19 : f32 to vector<8x1xf32>
    %25 = arith.divf %23, %24 : vector<8x1xf32>
    %cst_20 = arith.constant 9.99999974E-6 : f32
    %26 = vector.broadcast %cst_20 : f32 to vector<8x1xf32>
    %27 = arith.addf %25, %26 : vector<8x1xf32>
    %28 = math.rsqrt %27 : vector<8x1xf32>
    %29 = arith.mulf %25, %28 : vector<8x1xf32>
    %30 = arith.mulf %29, %28 : vector<8x1xf32>
    %cst_21 = arith.constant 9.99999974E-6 : f32
    %31 = vector.broadcast %cst_21 : f32 to vector<8x1xf32>
    %32 = arith.addf %30, %31 : vector<8x1xf32>
    %33 = math.rsqrt %32 : vector<8x1xf32>
    %34 = arith.mulf %28, %33 : vector<8x1xf32>
    %35 = vector.broadcast %34 : vector<8x1xf32> to vector<8x256xf32>
    %36 = arith.mulf %20, %35 : vector<8x256xf32>
    %cst_22 = arith.constant 0.000000e+00 : f32
    %37 = vector.broadcast %cst_22 : f32 to vector<8x256xf32>
    %38 = arith.maximumf %36, %37 : vector<8x256xf32>
    %c0_23 = arith.constant 0 : index
    %c128 = arith.constant 128 : index
    %39 = vector.load %arg13[%c0_23, %c128] : memref<8x512xf32, #tpu.memory_space<vmem>>, vector<8x256xf32>
    tpu.vector_store %arg13[%c0_23, %c128], %38 {strides = array<i32>} : memref<8x512xf32, #tpu.memory_space<vmem>>, vector<8x256xf32>,
    %c0_24 = arith.constant 0 : index
    %c111 = arith.constant 111 : index
    %40 = vector.load %arg13[%c0_24, %c111] : memref<8x512xf32, #tpu.memory_space<vmem>>, vector<8x256xf32>
    %c0_25 = arith.constant 0 : index
    %c0_26 = arith.constant 0 : index
    %41 = vector.load %arg2[%c0_25, %c0_26] : memref<6x256xf32, #tpu.memory_space<vmem>>, vector<1x256xf32>
    %42 = vector.broadcast %41 : vector<1x256xf32> to vector<8x256xf32>
    %43 = arith.mulf %40, %42 : vector<8x256xf32>
    %c0_27 = arith.constant 0 : index
    %c0_28 = arith.constant 0 : index
    %44 = vector.load %arg14[%c0_27, %c0_28] : memref<72x256xf32, #tpu.memory_space<vmem>>, vector<8x256xf32>
    tpu.vector_store %arg14[%c0_27, %c0_28], %43 {strides = array<i32>} : memref<72x256xf32, #tpu.memory_space<vmem>>, vector<8x256xf32>,
    %c0_29 = arith.constant 0 : index
    %c112 = arith.constant 112 : index
    %45 = vector.load %arg13[%c0_29, %c112] : memref<8x512xf32, #tpu.memory_space<vmem>>, vector<8x256xf32>
    %c8 = arith.constant 8 : index
    %c0_30 = arith.constant 0 : index
    %46 = vector.load %arg14[%c8, %c0_30] : memref<72x256xf32, #tpu.memory_space<vmem>>, vector<8x256xf32>
    tpu.vector_store %arg14[%c8, %c0_30], %45 {strides = array<i32>} : memref<72x256xf32, #tpu.memory_space<vmem>>, vector<8x256xf32>,
    %c0_31 = arith.constant 0 : index
    %c113 = arith.constant 113 : index
    %47 = vector.load %arg13[%c0_31, %c113] : memref<8x512xf32, #tpu.memory_space<vmem>>, vector<8x256xf32>
    %c1 = arith.constant 1 : index
    %c0_32 = arith.constant 0 : index
    %48 = vector.load %arg2[%c1, %c0_32] : memref<6x256xf32, #tpu.memory_space<vmem>>, vector<1x256xf32>
    %49 = vector.broadcast %48 : vector<1x256xf32> to vector<8x256xf32>
    %50 = arith.mulf %47, %49 : vector<8x256xf32>
    %c16 = arith.constant 16 : index
    %c0_33 = arith.constant 0 : index
    %51 = vector.load %arg14[%c16, %c0_33] : memref<72x256xf32, #tpu.memory_space<vmem>>, vector<8x256xf32>
    tpu.vector_store %arg14[%c16, %c0_33], %50 {strides = array<i32>} : memref<72x256xf32, #tpu.memory_space<vmem>>, vector<8x256xf32>,
    %c0_34 = arith.constant 0 : index
    %c127 = arith.constant 127 : index
    %52 = vector.load %arg13[%c0_34, %c127] : memref<8x512xf32, #tpu.memory_space<vmem>>, vector<8x256xf32>
    %c2 = arith.constant 2 : index
    %c0_35 = arith.constant 0 : index
    %53 = vector.load %arg2[%c2, %c0_35] : memref<6x256xf32, #tpu.memory_space<vmem>>, vector<1x256xf32>
    %54 = vector.broadcast %53 : vector<1x256xf32> to vector<8x256xf32>
    %55 = arith.mulf %52, %54 : vector<8x256xf32>
    %c24 = arith.constant 24 : index
    %c0_36 = arith.constant 0 : index
    %56 = vector.load %arg14[%c24, %c0_36] : memref<72x256xf32, #tpu.memory_space<vmem>>, vector<8x256xf32>
    tpu.vector_store %arg14[%c24, %c0_36], %55 {strides = array<i32>} : memref<72x256xf32, #tpu.memory_space<vmem>>, vector<8x256xf32>,
    %c0_37 = arith.constant 0 : index
    %c128_38 = arith.constant 128 : index
    %57 = vector.load %arg13[%c0_37, %c128_38] : memref<8x512xf32, #tpu.memory_space<vmem>>, vector<8x256xf32>
    %c32 = arith.constant 32 : index
    %c0_39 = arith.constant 0 : index
    %58 = vector.load %arg14[%c32, %c0_39] : memref<72x256xf32, #tpu.memory_space<vmem>>, vector<8x256xf32>
    tpu.vector_store %arg14[%c32, %c0_39], %57 {strides = array<i32>} : memref<72x256xf32, #tpu.memory_space<vmem>>, vector<8x256xf32>,
    %c0_40 = arith.constant 0 : index
    %c129 = arith.constant 129 : index
    %59 = vector.load %arg13[%c0_40, %c129] : memref<8x512xf32, #tpu.memory_space<vmem>>, vector<8x256xf32>
    %c3 = arith.constant 3 : index
    %c0_41 = arith.constant 0 : index
    %60 = vector.load %arg2[%c3, %c0_41] : memref<6x256xf32, #tpu.memory_space<vmem>>, vector<1x256xf32>
    %61 = vector.broadcast %60 : vector<1x256xf32> to vector<8x256xf32>
    %62 = arith.mulf %59, %61 : vector<8x256xf32>
    %c40 = arith.constant 40 : index
    %c0_42 = arith.constant 0 : index
    %63 = vector.load %arg14[%c40, %c0_42] : memref<72x256xf32, #tpu.memory_space<vmem>>, vector<8x256xf32>
    tpu.vector_store %arg14[%c40, %c0_42], %62 {strides = array<i32>} : memref<72x256xf32, #tpu.memory_space<vmem>>, vector<8x256xf32>,
    %c0_43 = arith.constant 0 : index
    %c143 = arith.constant 143 : index
    %64 = vector.load %arg13[%c0_43, %c143] : memref<8x512xf32, #tpu.memory_space<vmem>>, vector<8x256xf32>
    %c4 = arith.constant 4 : index
    %c0_44 = arith.constant 0 : index
    %65 = vector.load %arg2[%c4, %c0_44] : memref<6x256xf32, #tpu.memory_space<vmem>>, vector<1x256xf32>
    %66 = vector.broadcast %65 : vector<1x256xf32> to vector<8x256xf32>
    %67 = arith.mulf %64, %66 : vector<8x256xf32>
    %c48 = arith.constant 48 : index
    %c0_45 = arith.constant 0 : index
    %68 = vector.load %arg14[%c48, %c0_45] : memref<72x256xf32, #tpu.memory_space<vmem>>, vector<8x256xf32>
    tpu.vector_store %arg14[%c48, %c0_45], %67 {strides = array<i32>} : memref<72x256xf32, #tpu.memory_space<vmem>>, vector<8x256xf32>,
    %c0_46 = arith.constant 0 : index
    %c144 = arith.constant 144 : index
    %69 = vector.load %arg13[%c0_46, %c144] : memref<8x512xf32, #tpu.memory_space<vmem>>, vector<8x256xf32>
    %c56 = arith.constant 56 : index
    %c0_47 = arith.constant 0 : index
    %70 = vector.load %arg14[%c56, %c0_47] : memref<72x256xf32, #tpu.memory_space<vmem>>, vector<8x256xf32>
    tpu.vector_store %arg14[%c56, %c0_47], %69 {strides = array<i32>} : memref<72x256xf32, #tpu.memory_space<vmem>>, vector<8x256xf32>,
    %c0_48 = arith.constant 0 : index
    %c145 = arith.constant 145 : index
    %71 = vector.load %arg13[%c0_48, %c145] : memref<8x512xf32, #tpu.memory_space<vmem>>, vector<8x256xf32>
    %c5 = arith.constant 5 : index
    %c0_49 = arith.constant 0 : index
    %72 = vector.load %arg2[%c5, %c0_49] : memref<6x256xf32, #tpu.memory_space<vmem>>, vector<1x256xf32>
    %73 = vector.broadcast %72 : vector<1x256xf32> to vector<8x256xf32>
    %74 = arith.mulf %71, %73 : vector<8x256xf32>
    %c64 = arith.constant 64 : index
    %c0_50 = arith.constant 0 : index
    %75 = vector.load %arg14[%c64, %c0_50] : memref<72x256xf32, #tpu.memory_space<vmem>>, vector<8x256xf32>
    tpu.vector_store %arg14[%c64, %c0_50], %74 {strides = array<i32>} : memref<72x256xf32, #tpu.memory_space<vmem>>, vector<8x256xf32>,
    %c0_51 = arith.constant 0 : index
    %c0_52 = arith.constant 0 : index
    %76 = vector.load %arg5[%c0_51, %c0_52] : memref<4x72xf32, #tpu.memory_space<vmem>>, vector<4x72xf32>
    %c0_53 = arith.constant 0 : index
    %c0_54 = arith.constant 0 : index
    %77 = vector.load %arg14[%c0_53, %c0_54] : memref<72x256xf32, #tpu.memory_space<vmem>>, vector<72x256xf32>
    %cst_55 = arith.constant dense<0.000000e+00> : vector<4x256xf32>
    %78 = tpu.matmul %76, %77, %cst_55 {dimension_numbers = #tpu.dot_dimension_numbers<[1], [0], [0], [1], [0, 0, 1, 1], [], []>} : vector<4x72xf32>, vector<72x256xf32>, vector<4x256xf32> -> vector<4x256xf32>
    %c0_56 = arith.constant 0 : index
    %c0_57 = arith.constant 0 : index
    %79 = vector.load %arg6[%c0_56, %c0_57] : memref<4x1xf32, #tpu.memory_space<vmem>>, vector<4x1xf32>
    %80 = vector.broadcast %79 : vector<4x1xf32> to vector<4x256xf32>
    %81 = arith.addf %78, %80 : vector<4x256xf32>
    %c16_58 = arith.constant 16 : index
    %c0_59 = arith.constant 0 : index
    %82 = vector.load %arg12[%c16_58, %c0_59] : memref<24x256xf32, #tpu.memory_space<vmem>>, vector<4x256xf32>
    tpu.vector_store %arg12[%c16_58, %c0_59], %81 {strides = array<i32>} : memref<24x256xf32, #tpu.memory_space<vmem>>, vector<4x256xf32>,
    %c0_60 = arith.constant 0 : index
    %c0_61 = arith.constant 0 : index
    %83 = vector.load %arg12[%c0_60, %c0_61] : memref<24x256xf32, #tpu.memory_space<vmem>>, vector<20x256xf32>
    %cst_62 = arith.constant 0.000000e+00 : f32
    %84 = vector.broadcast %cst_62 : f32 to vector<20x256xf32>
    %85 = arith.maximumf %83, %84 : vector<20x256xf32>
    %c0_63 = arith.constant 0 : index
    %c0_64 = arith.constant 0 : index
    %86 = vector.load %arg7[%c0_63, %c0_64] : memref<8x20xf32, #tpu.memory_space<vmem>>, vector<8x20xf32>
    %cst_65 = arith.constant dense<0.000000e+00> : vector<8x256xf32>
    %87 = tpu.matmul %86, %85, %cst_65 {dimension_numbers = #tpu.dot_dimension_numbers<[1], [0], [0], [1], [0, 0, 1, 1], [], []>} : vector<8x20xf32>, vector<20x256xf32>, vector<8x256xf32> -> vector<8x256xf32>
    %c0_66 = arith.constant 0 : index
    %c0_67 = arith.constant 0 : index
    %88 = vector.load %arg8[%c0_66, %c0_67] : memref<8x1xf32, #tpu.memory_space<vmem>>, vector<8x1xf32>
    %89 = vector.broadcast %88 : vector<8x1xf32> to vector<8x256xf32>
    %90 = arith.addf %87, %89 : vector<8x256xf32>
    %cst_68 = arith.constant dense<0.000000e+00> : vector<8xf32>
    %91 = vector.multi_reduction <add>, %90, %cst_68 [1] : vector<8x256xf32> to vector<8xf32>
    %92 = vector.shape_cast %91 : vector<8xf32> to vector<8x1xf32>
    %cst_69 = arith.constant 2.560000e+02 : f32
    %93 = vector.broadcast %cst_69 : f32 to vector<8x1xf32>
    %94 = arith.divf %92, %93 : vector<8x1xf32>
    %95 = vector.broadcast %94 : vector<8x1xf32> to vector<8x256xf32>
    %96 = arith.subf %90, %95 : vector<8x256xf32>
    %97 = arith.mulf %96, %96 : vector<8x256xf32>
    %cst_70 = arith.constant dense<0.000000e+00> : vector<8xf32>
    %98 = vector.multi_reduction <add>, %97, %cst_70 [1] : vector<8x256xf32> to vector<8xf32>
    %99 = vector.shape_cast %98 : vector<8xf32> to vector<8x1xf32>
    %cst_71 = arith.constant 2.560000e+02 : f32
    %100 = vector.broadcast %cst_71 : f32 to vector<8x1xf32>
    %101 = arith.divf %99, %100 : vector<8x1xf32>
    %cst_72 = arith.constant 9.99999974E-6 : f32
    %102 = vector.broadcast %cst_72 : f32 to vector<8x1xf32>
    %103 = arith.addf %101, %102 : vector<8x1xf32>
    %104 = math.rsqrt %103 : vector<8x1xf32>
    %105 = arith.mulf %101, %104 : vector<8x1xf32>
    %106 = arith.mulf %105, %104 : vector<8x1xf32>
    %cst_73 = arith.constant 9.99999974E-6 : f32
    %107 = vector.broadcast %cst_73 : f32 to vector<8x1xf32>
    %108 = arith.addf %106, %107 : vector<8x1xf32>
    %109 = math.rsqrt %108 : vector<8x1xf32>
    %110 = arith.mulf %104, %109 : vector<8x1xf32>
    %111 = vector.broadcast %110 : vector<8x1xf32> to vector<8x256xf32>
    %112 = arith.mulf %96, %111 : vector<8x256xf32>
    %cst_74 = arith.constant 0.000000e+00 : f32
    %113 = vector.broadcast %cst_74 : f32 to vector<8x256xf32>
    %114 = arith.maximumf %112, %113 : vector<8x256xf32>
    %c0_75 = arith.constant 0 : index
    %c128_76 = arith.constant 128 : index
    %115 = vector.load %arg13[%c0_75, %c128_76] : memref<8x512xf32, #tpu.memory_space<vmem>>, vector<8x256xf32>
    tpu.vector_store %arg13[%c0_75, %c128_76], %114 {strides = array<i32>} : memref<8x512xf32, #tpu.memory_space<vmem>>, vector<8x256xf32>,
    %c0_77 = arith.constant 0 : index
    %c111_78 = arith.constant 111 : index
    %116 = vector.load %arg13[%c0_77, %c111_78] : memref<8x512xf32, #tpu.memory_space<vmem>>, vector<8x256xf32>
    %c0_79 = arith.constant 0 : index
    %c0_80 = arith.constant 0 : index
    %117 = vector.load %arg2[%c0_79, %c0_80] : memref<6x256xf32, #tpu.memory_space<vmem>>, vector<1x256xf32>
    %118 = vector.broadcast %117 : vector<1x256xf32> to vector<8x256xf32>
    %119 = arith.mulf %116, %118 : vector<8x256xf32>
    %c0_81 = arith.constant 0 : index
    %c0_82 = arith.constant 0 : index
    %120 = vector.load %arg14[%c0_81, %c0_82] : memref<72x256xf32, #tpu.memory_space<vmem>>, vector<8x256xf32>
    tpu.vector_store %arg14[%c0_81, %c0_82], %119 {strides = array<i32>} : memref<72x256xf32, #tpu.memory_space<vmem>>, vector<8x256xf32>,
    %c0_83 = arith.constant 0 : index
    %c112_84 = arith.constant 112 : index
    %121 = vector.load %arg13[%c0_83, %c112_84] : memref<8x512xf32, #tpu.memory_space<vmem>>, vector<8x256xf32>
    %c8_85 = arith.constant 8 : index
    %c0_86 = arith.constant 0 : index
    %122 = vector.load %arg14[%c8_85, %c0_86] : memref<72x256xf32, #tpu.memory_space<vmem>>, vector<8x256xf32>
    tpu.vector_store %arg14[%c8_85, %c0_86], %121 {strides = array<i32>} : memref<72x256xf32, #tpu.memory_space<vmem>>, vector<8x256xf32>,
    %c0_87 = arith.constant 0 : index
    %c113_88 = arith.constant 113 : index
    %123 = vector.load %arg13[%c0_87, %c113_88] : memref<8x512xf32, #tpu.memory_space<vmem>>, vector<8x256xf32>
    %c1_89 = arith.constant 1 : index
    %c0_90 = arith.constant 0 : index
    %124 = vector.load %arg2[%c1_89, %c0_90] : memref<6x256xf32, #tpu.memory_space<vmem>>, vector<1x256xf32>
    %125 = vector.broadcast %124 : vector<1x256xf32> to vector<8x256xf32>
    %126 = arith.mulf %123, %125 : vector<8x256xf32>
    %c16_91 = arith.constant 16 : index
    %c0_92 = arith.constant 0 : index
    %127 = vector.load %arg14[%c16_91, %c0_92] : memref<72x256xf32, #tpu.memory_space<vmem>>, vector<8x256xf32>
    tpu.vector_store %arg14[%c16_91, %c0_92], %126 {strides = array<i32>} : memref<72x256xf32, #tpu.memory_space<vmem>>, vector<8x256xf32>,
    %c0_93 = arith.constant 0 : index
    %c127_94 = arith.constant 127 : index
    %128 = vector.load %arg13[%c0_93, %c127_94] : memref<8x512xf32, #tpu.memory_space<vmem>>, vector<8x256xf32>
    %c2_95 = arith.constant 2 : index
    %c0_96 = arith.constant 0 : index
    %129 = vector.load %arg2[%c2_95, %c0_96] : memref<6x256xf32, #tpu.memory_space<vmem>>, vector<1x256xf32>
    %130 = vector.broadcast %129 : vector<1x256xf32> to vector<8x256xf32>
    %131 = arith.mulf %128, %130 : vector<8x256xf32>
    %c24_97 = arith.constant 24 : index
    %c0_98 = arith.constant 0 : index
    %132 = vector.load %arg14[%c24_97, %c0_98] : memref<72x256xf32, #tpu.memory_space<vmem>>, vector<8x256xf32>
    tpu.vector_store %arg14[%c24_97, %c0_98], %131 {strides = array<i32>} : memref<72x256xf32, #tpu.memory_space<vmem>>, vector<8x256xf32>,
    %c0_99 = arith.constant 0 : index
    %c128_100 = arith.constant 128 : index
    %133 = vector.load %arg13[%c0_99, %c128_100] : memref<8x512xf32, #tpu.memory_space<vmem>>, vector<8x256xf32>
    %c32_101 = arith.constant 32 : index
    %c0_102 = arith.constant 0 : index
    %134 = vector.load %arg14[%c32_101, %c0_102] : memref<72x256xf32, #tpu.memory_space<vmem>>, vector<8x256xf32>
    tpu.vector_store %arg14[%c32_101, %c0_102], %133 {strides = array<i32>} : memref<72x256xf32, #tpu.memory_space<vmem>>, vector<8x256xf32>,
    %c0_103 = arith.constant 0 : index
    %c129_104 = arith.constant 129 : index
    %135 = vector.load %arg13[%c0_103, %c129_104] : memref<8x512xf32, #tpu.memory_space<vmem>>, vector<8x256xf32>
    %c3_105 = arith.constant 3 : index
    %c0_106 = arith.constant 0 : index
    %136 = vector.load %arg2[%c3_105, %c0_106] : memref<6x256xf32, #tpu.memory_space<vmem>>, vector<1x256xf32>
    %137 = vector.broadcast %136 : vector<1x256xf32> to vector<8x256xf32>
    %138 = arith.mulf %135, %137 : vector<8x256xf32>
    %c40_107 = arith.constant 40 : index
    %c0_108 = arith.constant 0 : index
    %139 = vector.load %arg14[%c40_107, %c0_108] : memref<72x256xf32, #tpu.memory_space<vmem>>, vector<8x256xf32>
    tpu.vector_store %arg14[%c40_107, %c0_108], %138 {strides = array<i32>} : memref<72x256xf32, #tpu.memory_space<vmem>>, vector<8x256xf32>,
    %c0_109 = arith.constant 0 : index
    %c143_110 = arith.constant 143 : index
    %140 = vector.load %arg13[%c0_109, %c143_110] : memref<8x512xf32, #tpu.memory_space<vmem>>, vector<8x256xf32>
    %c4_111 = arith.constant 4 : index
    %c0_112 = arith.constant 0 : index
    %141 = vector.load %arg2[%c4_111, %c0_112] : memref<6x256xf32, #tpu.memory_space<vmem>>, vector<1x256xf32>
    %142 = vector.broadcast %141 : vector<1x256xf32> to vector<8x256xf32>
    %143 = arith.mulf %140, %142 : vector<8x256xf32>
    %c48_113 = arith.constant 48 : index
    %c0_114 = arith.constant 0 : index
    %144 = vector.load %arg14[%c48_113, %c0_114] : memref<72x256xf32, #tpu.memory_space<vmem>>, vector<8x256xf32>
    tpu.vector_store %arg14[%c48_113, %c0_114], %143 {strides = array<i32>} : memref<72x256xf32, #tpu.memory_space<vmem>>, vector<8x256xf32>,
    %c0_115 = arith.constant 0 : index
    %c144_116 = arith.constant 144 : index
    %145 = vector.load %arg13[%c0_115, %c144_116] : memref<8x512xf32, #tpu.memory_space<vmem>>, vector<8x256xf32>
    %c56_117 = arith.constant 56 : index
    %c0_118 = arith.constant 0 : index
    %146 = vector.load %arg14[%c56_117, %c0_118] : memref<72x256xf32, #tpu.memory_space<vmem>>, vector<8x256xf32>
    tpu.vector_store %arg14[%c56_117, %c0_118], %145 {strides = array<i32>} : memref<72x256xf32, #tpu.memory_space<vmem>>, vector<8x256xf32>,
    %c0_119 = arith.constant 0 : index
    %c145_120 = arith.constant 145 : index
    %147 = vector.load %arg13[%c0_119, %c145_120] : memref<8x512xf32, #tpu.memory_space<vmem>>, vector<8x256xf32>
    %c5_121 = arith.constant 5 : index
    %c0_122 = arith.constant 0 : index
    %148 = vector.load %arg2[%c5_121, %c0_122] : memref<6x256xf32, #tpu.memory_space<vmem>>, vector<1x256xf32>
    %149 = vector.broadcast %148 : vector<1x256xf32> to vector<8x256xf32>
    %150 = arith.mulf %147, %149 : vector<8x256xf32>
    %c64_123 = arith.constant 64 : index
    %c0_124 = arith.constant 0 : index
    %151 = vector.load %arg14[%c64_123, %c0_124] : memref<72x256xf32, #tpu.memory_space<vmem>>, vector<8x256xf32>
    tpu.vector_store %arg14[%c64_123, %c0_124], %150 {strides = array<i32>} : memref<72x256xf32, #tpu.memory_space<vmem>>, vector<8x256xf32>,
    %c0_125 = arith.constant 0 : index
    %c0_126 = arith.constant 0 : index
    %152 = vector.load %arg9[%c0_125, %c0_126] : memref<4x72xf32, #tpu.memory_space<vmem>>, vector<4x72xf32>
    %c0_127 = arith.constant 0 : index
    %c0_128 = arith.constant 0 : index
    %153 = vector.load %arg14[%c0_127, %c0_128] : memref<72x256xf32, #tpu.memory_space<vmem>>, vector<72x256xf32>
    %cst_129 = arith.constant dense<0.000000e+00> : vector<4x256xf32>
    %154 = tpu.matmul %152, %153, %cst_129 {dimension_numbers = #tpu.dot_dimension_numbers<[1], [0], [0], [1], [0, 0, 1, 1], [], []>} : vector<4x72xf32>, vector<72x256xf32>, vector<4x256xf32> -> vector<4x256xf32>
    %c0_130 = arith.constant 0 : index
    %c0_131 = arith.constant 0 : index
    %155 = vector.load %arg10[%c0_130, %c0_131] : memref<4x1xf32, #tpu.memory_space<vmem>>, vector<4x1xf32>
    %156 = vector.broadcast %155 : vector<4x1xf32> to vector<4x256xf32>
    %157 = arith.addf %154, %156 : vector<4x256xf32>
    %c20 = arith.constant 20 : index
    %c0_132 = arith.constant 0 : index
    %158 = vector.load %arg12[%c20, %c0_132] : memref<24x256xf32, #tpu.memory_space<vmem>>, vector<4x256xf32>
    tpu.vector_store %arg12[%c20, %c0_132], %157 {strides = array<i32>} : memref<24x256xf32, #tpu.memory_space<vmem>>, vector<4x256xf32>,
    %c0_133 = arith.constant 0 : index
    %c0_134 = arith.constant 0 : index
    %159 = vector.load %arg12[%c0_133, %c0_134] : memref<24x256xf32, #tpu.memory_space<vmem>>, vector<24x256xf32>
    %c0_135 = arith.constant 0 : index
    %c0_136 = arith.constant 0 : index
    %c0_137 = arith.constant 0 : index
    %160 = vector.load %arg11[%c0_135, %c0_136, %c0_137] : memref<1x24x256xf32, #tpu.memory_space<vmem>>, vector<1x24x256xf32>
    %161 = vector.shape_cast %160 : vector<1x24x256xf32> to vector<24x256xf32>
    %162 = vector.shape_cast %159 : vector<24x256xf32> to vector<1x24x256xf32>
    tpu.vector_store %arg11[%c0_135, %c0_136, %c0_137], %162 {strides = array<i32>} : memref<1x24x256xf32, #tpu.memory_space<vmem>>, vector<1x24x256xf32>,
    return
  }
  func.func @transform_0(%arg0: i32) -> (i32, i32, i32) {
    %c0_i32 = arith.constant 0 : i32
    %c0_i32_0 = arith.constant 0 : i32
    %c0_i32_1 = arith.constant 0 : i32
    return %arg0, %c0_i32, %c0_i32_0 : i32, i32, i32
  }
  func.func @transform_1(%arg0: i32) -> (i32, i32) {
    %c0_i32 = arith.constant 0 : i32
    %c0_i32_0 = arith.constant 0 : i32
    %c0_i32_1 = arith.constant 0 : i32
    return %c0_i32, %c0_i32_0 : i32, i32
  }
  func.func @transform_2(%arg0: i32) -> (i32, i32) {
    %c0_i32 = arith.constant 0 : i32
    %c0_i32_0 = arith.constant 0 : i32
    %c0_i32_1 = arith.constant 0 : i32
    return %c0_i32, %c0_i32_0 : i32, i32
  }
  func.func @transform_3(%arg0: i32) -> (i32, i32) {
    %c0_i32 = arith.constant 0 : i32
    %c0_i32_0 = arith.constant 0 : i32
    %c0_i32_1 = arith.constant 0 : i32
    return %c0_i32, %c0_i32_0 : i32, i32
  }
  func.func @transform_4(%arg0: i32) -> (i32, i32) {
    %c0_i32 = arith.constant 0 : i32
    %c0_i32_0 = arith.constant 0 : i32
    %c0_i32_1 = arith.constant 0 : i32
    return %c0_i32, %c0_i32_0 : i32, i32
  }
  func.func @transform_5(%arg0: i32) -> (i32, i32) {
    %c0_i32 = arith.constant 0 : i32
    %c0_i32_0 = arith.constant 0 : i32
    %c0_i32_1 = arith.constant 0 : i32
    return %c0_i32, %c0_i32_0 : i32, i32
  }
  func.func @transform_6(%arg0: i32) -> (i32, i32) {
    %c0_i32 = arith.constant 0 : i32
    %c0_i32_0 = arith.constant 0 : i32
    %c0_i32_1 = arith.constant 0 : i32
    return %c0_i32, %c0_i32_0 : i32, i32
  }
  func.func @transform_7(%arg0: i32) -> (i32, i32) {
    %c0_i32 = arith.constant 0 : i32
    %c0_i32_0 = arith.constant 0 : i32
    %c0_i32_1 = arith.constant 0 : i32
    return %c0_i32, %c0_i32_0 : i32, i32
  }
  func.func @transform_8(%arg0: i32) -> (i32, i32) {
    %c0_i32 = arith.constant 0 : i32
    %c0_i32_0 = arith.constant 0 : i32
    %c0_i32_1 = arith.constant 0 : i32
    return %c0_i32, %c0_i32_0 : i32, i32
  }
  func.func @transform_9(%arg0: i32) -> (i32, i32) {
    %c0_i32 = arith.constant 0 : i32
    %c0_i32_0 = arith.constant 0 : i32
    %c0_i32_1 = arith.constant 0 : i32
    return %c0_i32, %c0_i32_0 : i32, i32
  }
  func.func @transform_10(%arg0: i32) -> (i32, i32, i32) {
    %c0_i32 = arith.constant 0 : i32
    %c0_i32_0 = arith.constant 0 : i32
    %c0_i32_1 = arith.constant 0 : i32
    return %arg0, %c0_i32, %c0_i32_0 : i32, i32, i32
  }
}

module attributes {stable_mosaic.version = 11 : i64} {
  func.func @_dense_block_kernel(%arg0: i32, %arg1: memref<1x8x256xf32, #tpu.memory_space<vmem>>, %arg2: memref<6x256xf32, #tpu.memory_space<vmem>>, %arg3: memref<8x8xf32, #tpu.memory_space<vmem>>, %arg4: memref<8x1xf32, #tpu.memory_space<vmem>>, %arg5: memref<4x72xf32, #tpu.memory_space<vmem>>, %arg6: memref<4x1xf32, #tpu.memory_space<vmem>>, %arg7: memref<8x12xf32, #tpu.memory_space<vmem>>, %arg8: memref<8x1xf32, #tpu.memory_space<vmem>>, %arg9: memref<4x72xf32, #tpu.memory_space<vmem>>, %arg10: memref<4x1xf32, #tpu.memory_space<vmem>>, %arg11: memref<1x16x256xf32, #tpu.memory_space<vmem>>, %arg12: memref<16x256xf32, #tpu.memory_space<vmem>>, %arg13: memref<8x512xf32, #tpu.memory_space<vmem>>, %arg14: memref<72x256xf32, #tpu.memory_space<vmem>>) attributes {dimension_semantics = [#tpu.dimension_semantics<parallel>], iteration_bounds = array<i64: 2>, scalar_prefetch = 0 : i64, scratch_operands = 3 : i64, tpu.core_type = #tpu.core_type<tc>, window_params = [{transform_indices = @transform_0, window_bounds = array<i64: 1, 8, 256>}, {pipeline_mode = #tpu.pipeline_mode<synchronous>, transform_indices = @transform_1, window_bounds = array<i64: 6, 256>}, {pipeline_mode = #tpu.pipeline_mode<synchronous>, transform_indices = @transform_2, window_bounds = array<i64: 8, 8>}, {pipeline_mode = #tpu.pipeline_mode<synchronous>, transform_indices = @transform_3, window_bounds = array<i64: 8, 1>}, {pipeline_mode = #tpu.pipeline_mode<synchronous>, transform_indices = @transform_4, window_bounds = array<i64: 4, 72>}, {pipeline_mode = #tpu.pipeline_mode<synchronous>, transform_indices = @transform_5, window_bounds = array<i64: 4, 1>}, {pipeline_mode = #tpu.pipeline_mode<synchronous>, transform_indices = @transform_6, window_bounds = array<i64: 8, 12>}, {pipeline_mode = #tpu.pipeline_mode<synchronous>, transform_indices = @transform_7, window_bounds = array<i64: 8, 1>}, {pipeline_mode = #tpu.pipeline_mode<synchronous>, transform_indices = @transform_8, window_bounds = array<i64: 4, 72>}, {pipeline_mode = #tpu.pipeline_mode<synchronous>, transform_indices = @transform_9, window_bounds = array<i64: 4, 1>}, {transform_indices = @transform_10, window_bounds = array<i64: 1, 16, 256>}]} {
    %cst = arith.constant 0.000000e+00 : f32
    %0 = vector.broadcast %cst : f32 to vector<8x128xf32>
    %c0 = arith.constant 0 : index
    %c0_0 = arith.constant 0 : index
    %1 = vector.load %arg13[%c0, %c0_0] : memref<8x512xf32, #tpu.memory_space<vmem>>, vector<8x128xf32>
    tpu.vector_store %arg13[%c0, %c0_0], %0 {strides = array<i32>} : memref<8x512xf32, #tpu.memory_space<vmem>>, vector<8x128xf32>,
    %cst_1 = arith.constant 0.000000e+00 : f32
    %2 = vector.broadcast %cst_1 : f32 to vector<8x128xf32>
    %c0_2 = arith.constant 0 : index
    %c384 = arith.constant 384 : index
    %3 = vector.load %arg13[%c0_2, %c384] : memref<8x512xf32, #tpu.memory_space<vmem>>, vector<8x128xf32>
    tpu.vector_store %arg13[%c0_2, %c384], %2 {strides = array<i32>} : memref<8x512xf32, #tpu.memory_space<vmem>>, vector<8x128xf32>,
    %c0_3 = arith.constant 0 : index
    %c0_4 = arith.constant 0 : index
    %c0_5 = arith.constant 0 : index
    %4 = vector.load %arg1[%c0_3, %c0_4, %c0_5] : memref<1x8x256xf32, #tpu.memory_space<vmem>>, vector<1x8x256xf32>
    %5 = vector.shape_cast %4 : vector<1x8x256xf32> to vector<8x256xf32>
    %c0_6 = arith.constant 0 : index
    %c0_7 = arith.constant 0 : index
    %6 = vector.load %arg12[%c0_6, %c0_7] : memref<16x256xf32, #tpu.memory_space<vmem>>, vector<8x256xf32>
    tpu.vector_store %arg12[%c0_6, %c0_7], %5 {strides = array<i32>} : memref<16x256xf32, #tpu.memory_space<vmem>>, vector<8x256xf32>,
    %c0_8 = arith.constant 0 : index
    %c0_9 = arith.constant 0 : index
    %7 = vector.load %arg12[%c0_8, %c0_9] : memref<16x256xf32, #tpu.memory_space<vmem>>, vector<8x256xf32>
    %cst_10 = arith.constant 0.000000e+00 : f32
    %8 = vector.broadcast %cst_10 : f32 to vector<8x256xf32>
    %9 = arith.maximumf %7, %8 : vector<8x256xf32>
    %c0_11 = arith.constant 0 : index
    %c0_12 = arith.constant 0 : index
    %10 = vector.load %arg3[%c0_11, %c0_12] : memref<8x8xf32, #tpu.memory_space<vmem>>, vector<8x8xf32>
    %cst_13 = arith.constant dense<0.000000e+00> : vector<8x256xf32>
    %11 = tpu.matmul %10, %9, %cst_13 {dimension_numbers = #tpu.dot_dimension_numbers<[1], [0], [0], [1], [0, 0, 1, 1], [], []>} : vector<8x8xf32>, vector<8x256xf32>, vector<8x256xf32> -> vector<8x256xf32>
    %c0_14 = arith.constant 0 : index
    %c0_15 = arith.constant 0 : index
    %12 = vector.load %arg4[%c0_14, %c0_15] : memref<8x1xf32, #tpu.memory_space<vmem>>, vector<8x1xf32>
    %13 = vector.broadcast %12 : vector<8x1xf32> to vector<8x256xf32>
    %14 = arith.addf %11, %13 : vector<8x256xf32>
    %cst_16 = arith.constant dense<0.000000e+00> : vector<8xf32>
    %15 = vector.multi_reduction <add>, %14, %cst_16 [1] : vector<8x256xf32> to vector<8xf32>
    %16 = vector.shape_cast %15 : vector<8xf32> to vector<8x1xf32>
    %cst_17 = arith.constant 2.560000e+02 : f32
    %17 = vector.broadcast %cst_17 : f32 to vector<8x1xf32>
    %18 = arith.divf %16, %17 : vector<8x1xf32>
    %19 = vector.broadcast %18 : vector<8x1xf32> to vector<8x256xf32>
    %20 = arith.subf %14, %19 : vector<8x256xf32>
    %21 = arith.mulf %20, %20 : vector<8x256xf32>
    %cst_18 = arith.constant dense<0.000000e+00> : vector<8xf32>
    %22 = vector.multi_reduction <add>, %21, %cst_18 [1] : vector<8x256xf32> to vector<8xf32>
    %23 = vector.shape_cast %22 : vector<8xf32> to vector<8x1xf32>
    %cst_19 = arith.constant 2.560000e+02 : f32
    %24 = vector.broadcast %cst_19 : f32 to vector<8x1xf32>
    %25 = arith.divf %23, %24 : vector<8x1xf32>
    %cst_20 = arith.constant 9.99999974E-6 : f32
    %26 = vector.broadcast %cst_20 : f32 to vector<8x1xf32>
    %27 = arith.addf %25, %26 : vector<8x1xf32>
    %28 = math.rsqrt %27 : vector<8x1xf32>
    %29 = arith.mulf %25, %28 : vector<8x1xf32>
    %30 = arith.mulf %29, %28 : vector<8x1xf32>
    %cst_21 = arith.constant 9.99999974E-6 : f32
    %31 = vector.broadcast %cst_21 : f32 to vector<8x1xf32>
    %32 = arith.addf %30, %31 : vector<8x1xf32>
    %33 = math.rsqrt %32 : vector<8x1xf32>
    %34 = arith.mulf %28, %33 : vector<8x1xf32>
    %35 = vector.broadcast %34 : vector<8x1xf32> to vector<8x256xf32>
    %36 = arith.mulf %20, %35 : vector<8x256xf32>
    %cst_22 = arith.constant 0.000000e+00 : f32
    %37 = vector.broadcast %cst_22 : f32 to vector<8x256xf32>
    %38 = arith.maximumf %36, %37 : vector<8x256xf32>
    %c0_23 = arith.constant 0 : index
    %c128 = arith.constant 128 : index
    %39 = vector.load %arg13[%c0_23, %c128] : memref<8x512xf32, #tpu.memory_space<vmem>>, vector<8x256xf32>
    tpu.vector_store %arg13[%c0_23, %c128], %38 {strides = array<i32>} : memref<8x512xf32, #tpu.memory_space<vmem>>, vector<8x256xf32>,
    %c0_24 = arith.constant 0 : index
    %c111 = arith.constant 111 : index
    %40 = vector.load %arg13[%c0_24, %c111] : memref<8x512xf32, #tpu.memory_space<vmem>>, vector<8x256xf32>
    %c0_25 = arith.constant 0 : index
    %c0_26 = arith.constant 0 : index
    %41 = vector.load %arg2[%c0_25, %c0_26] : memref<6x256xf32, #tpu.memory_space<vmem>>, vector<1x256xf32>
    %42 = vector.broadcast %41 : vector<1x256xf32> to vector<8x256xf32>
    %43 = arith.mulf %40, %42 : vector<8x256xf32>
    %c0_27 = arith.constant 0 : index
    %c0_28 = arith.constant 0 : index
    %44 = vector.load %arg14[%c0_27, %c0_28] : memref<72x256xf32, #tpu.memory_space<vmem>>, vector<8x256xf32>
    tpu.vector_store %arg14[%c0_27, %c0_28], %43 {strides = array<i32>} : memref<72x256xf32, #tpu.memory_space<vmem>>, vector<8x256xf32>,
    %c0_29 = arith.constant 0 : index
    %c112 = arith.constant 112 : index
    %45 = vector.load %arg13[%c0_29, %c112] : memref<8x512xf32, #tpu.memory_space<vmem>>, vector<8x256xf32>
    %c8 = arith.constant 8 : index
    %c0_30 = arith.constant 0 : index
    %46 = vector.load %arg14[%c8, %c0_30] : memref<72x256xf32, #tpu.memory_space<vmem>>, vector<8x256xf32>
    tpu.vector_store %arg14[%c8, %c0_30], %45 {strides = array<i32>} : memref<72x256xf32, #tpu.memory_space<vmem>>, vector<8x256xf32>,
    %c0_31 = arith.constant 0 : index
    %c113 = arith.constant 113 : index
    %47 = vector.load %arg13[%c0_31, %c113] : memref<8x512xf32, #tpu.memory_space<vmem>>, vector<8x256xf32>
    %c1 = arith.constant 1 : index
    %c0_32 = arith.constant 0 : index
    %48 = vector.load %arg2[%c1, %c0_32] : memref<6x256xf32, #tpu.memory_space<vmem>>, vector<1x256xf32>
    %49 = vector.broadcast %48 : vector<1x256xf32> to vector<8x256xf32>
    %50 = arith.mulf %47, %49 : vector<8x256xf32>
    %c16 = arith.constant 16 : index
    %c0_33 = arith.constant 0 : index
    %51 = vector.load %arg14[%c16, %c0_33] : memref<72x256xf32, #tpu.memory_space<vmem>>, vector<8x256xf32>
    tpu.vector_store %arg14[%c16, %c0_33], %50 {strides = array<i32>} : memref<72x256xf32, #tpu.memory_space<vmem>>, vector<8x256xf32>,
    %c0_34 = arith.constant 0 : index
    %c127 = arith.constant 127 : index
    %52 = vector.load %arg13[%c0_34, %c127] : memref<8x512xf32, #tpu.memory_space<vmem>>, vector<8x256xf32>
    %c2 = arith.constant 2 : index
    %c0_35 = arith.constant 0 : index
    %53 = vector.load %arg2[%c2, %c0_35] : memref<6x256xf32, #tpu.memory_space<vmem>>, vector<1x256xf32>
    %54 = vector.broadcast %53 : vector<1x256xf32> to vector<8x256xf32>
    %55 = arith.mulf %52, %54 : vector<8x256xf32>
    %c24 = arith.constant 24 : index
    %c0_36 = arith.constant 0 : index
    %56 = vector.load %arg14[%c24, %c0_36] : memref<72x256xf32, #tpu.memory_space<vmem>>, vector<8x256xf32>
    tpu.vector_store %arg14[%c24, %c0_36], %55 {strides = array<i32>} : memref<72x256xf32, #tpu.memory_space<vmem>>, vector<8x256xf32>,
    %c0_37 = arith.constant 0 : index
    %c128_38 = arith.constant 128 : index
    %57 = vector.load %arg13[%c0_37, %c128_38] : memref<8x512xf32, #tpu.memory_space<vmem>>, vector<8x256xf32>
    %c32 = arith.constant 32 : index
    %c0_39 = arith.constant 0 : index
    %58 = vector.load %arg14[%c32, %c0_39] : memref<72x256xf32, #tpu.memory_space<vmem>>, vector<8x256xf32>
    tpu.vector_store %arg14[%c32, %c0_39], %57 {strides = array<i32>} : memref<72x256xf32, #tpu.memory_space<vmem>>, vector<8x256xf32>,
    %c0_40 = arith.constant 0 : index
    %c129 = arith.constant 129 : index
    %59 = vector.load %arg13[%c0_40, %c129] : memref<8x512xf32, #tpu.memory_space<vmem>>, vector<8x256xf32>
    %c3 = arith.constant 3 : index
    %c0_41 = arith.constant 0 : index
    %60 = vector.load %arg2[%c3, %c0_41] : memref<6x256xf32, #tpu.memory_space<vmem>>, vector<1x256xf32>
    %61 = vector.broadcast %60 : vector<1x256xf32> to vector<8x256xf32>
    %62 = arith.mulf %59, %61 : vector<8x256xf32>
    %c40 = arith.constant 40 : index
    %c0_42 = arith.constant 0 : index
    %63 = vector.load %arg14[%c40, %c0_42] : memref<72x256xf32, #tpu.memory_space<vmem>>, vector<8x256xf32>
    tpu.vector_store %arg14[%c40, %c0_42], %62 {strides = array<i32>} : memref<72x256xf32, #tpu.memory_space<vmem>>, vector<8x256xf32>,
    %c0_43 = arith.constant 0 : index
    %c143 = arith.constant 143 : index
    %64 = vector.load %arg13[%c0_43, %c143] : memref<8x512xf32, #tpu.memory_space<vmem>>, vector<8x256xf32>
    %c4 = arith.constant 4 : index
    %c0_44 = arith.constant 0 : index
    %65 = vector.load %arg2[%c4, %c0_44] : memref<6x256xf32, #tpu.memory_space<vmem>>, vector<1x256xf32>
    %66 = vector.broadcast %65 : vector<1x256xf32> to vector<8x256xf32>
    %67 = arith.mulf %64, %66 : vector<8x256xf32>
    %c48 = arith.constant 48 : index
    %c0_45 = arith.constant 0 : index
    %68 = vector.load %arg14[%c48, %c0_45] : memref<72x256xf32, #tpu.memory_space<vmem>>, vector<8x256xf32>
    tpu.vector_store %arg14[%c48, %c0_45], %67 {strides = array<i32>} : memref<72x256xf32, #tpu.memory_space<vmem>>, vector<8x256xf32>,
    %c0_46 = arith.constant 0 : index
    %c144 = arith.constant 144 : index
    %69 = vector.load %arg13[%c0_46, %c144] : memref<8x512xf32, #tpu.memory_space<vmem>>, vector<8x256xf32>
    %c56 = arith.constant 56 : index
    %c0_47 = arith.constant 0 : index
    %70 = vector.load %arg14[%c56, %c0_47] : memref<72x256xf32, #tpu.memory_space<vmem>>, vector<8x256xf32>
    tpu.vector_store %arg14[%c56, %c0_47], %69 {strides = array<i32>} : memref<72x256xf32, #tpu.memory_space<vmem>>, vector<8x256xf32>,
    %c0_48 = arith.constant 0 : index
    %c145 = arith.constant 145 : index
    %71 = vector.load %arg13[%c0_48, %c145] : memref<8x512xf32, #tpu.memory_space<vmem>>, vector<8x256xf32>
    %c5 = arith.constant 5 : index
    %c0_49 = arith.constant 0 : index
    %72 = vector.load %arg2[%c5, %c0_49] : memref<6x256xf32, #tpu.memory_space<vmem>>, vector<1x256xf32>
    %73 = vector.broadcast %72 : vector<1x256xf32> to vector<8x256xf32>
    %74 = arith.mulf %71, %73 : vector<8x256xf32>
    %c64 = arith.constant 64 : index
    %c0_50 = arith.constant 0 : index
    %75 = vector.load %arg14[%c64, %c0_50] : memref<72x256xf32, #tpu.memory_space<vmem>>, vector<8x256xf32>
    tpu.vector_store %arg14[%c64, %c0_50], %74 {strides = array<i32>} : memref<72x256xf32, #tpu.memory_space<vmem>>, vector<8x256xf32>,
    %c0_51 = arith.constant 0 : index
    %c0_52 = arith.constant 0 : index
    %76 = vector.load %arg5[%c0_51, %c0_52] : memref<4x72xf32, #tpu.memory_space<vmem>>, vector<4x72xf32>
    %c0_53 = arith.constant 0 : index
    %c0_54 = arith.constant 0 : index
    %77 = vector.load %arg14[%c0_53, %c0_54] : memref<72x256xf32, #tpu.memory_space<vmem>>, vector<72x256xf32>
    %cst_55 = arith.constant dense<0.000000e+00> : vector<4x256xf32>
    %78 = tpu.matmul %76, %77, %cst_55 {dimension_numbers = #tpu.dot_dimension_numbers<[1], [0], [0], [1], [0, 0, 1, 1], [], []>} : vector<4x72xf32>, vector<72x256xf32>, vector<4x256xf32> -> vector<4x256xf32>
    %c0_56 = arith.constant 0 : index
    %c0_57 = arith.constant 0 : index
    %79 = vector.load %arg6[%c0_56, %c0_57] : memref<4x1xf32, #tpu.memory_space<vmem>>, vector<4x1xf32>
    %80 = vector.broadcast %79 : vector<4x1xf32> to vector<4x256xf32>
    %81 = arith.addf %78, %80 : vector<4x256xf32>
    %c8_58 = arith.constant 8 : index
    %c0_59 = arith.constant 0 : index
    %82 = vector.load %arg12[%c8_58, %c0_59] : memref<16x256xf32, #tpu.memory_space<vmem>>, vector<4x256xf32>
    tpu.vector_store %arg12[%c8_58, %c0_59], %81 {strides = array<i32>} : memref<16x256xf32, #tpu.memory_space<vmem>>, vector<4x256xf32>,
    %c0_60 = arith.constant 0 : index
    %c0_61 = arith.constant 0 : index
    %83 = vector.load %arg12[%c0_60, %c0_61] : memref<16x256xf32, #tpu.memory_space<vmem>>, vector<12x256xf32>
    %cst_62 = arith.constant 0.000000e+00 : f32
    %84 = vector.broadcast %cst_62 : f32 to vector<12x256xf32>
    %85 = arith.maximumf %83, %84 : vector<12x256xf32>
    %c0_63 = arith.constant 0 : index
    %c0_64 = arith.constant 0 : index
    %86 = vector.load %arg7[%c0_63, %c0_64] : memref<8x12xf32, #tpu.memory_space<vmem>>, vector<8x12xf32>
    %cst_65 = arith.constant dense<0.000000e+00> : vector<8x256xf32>
    %87 = tpu.matmul %86, %85, %cst_65 {dimension_numbers = #tpu.dot_dimension_numbers<[1], [0], [0], [1], [0, 0, 1, 1], [], []>} : vector<8x12xf32>, vector<12x256xf32>, vector<8x256xf32> -> vector<8x256xf32>
    %c0_66 = arith.constant 0 : index
    %c0_67 = arith.constant 0 : index
    %88 = vector.load %arg8[%c0_66, %c0_67] : memref<8x1xf32, #tpu.memory_space<vmem>>, vector<8x1xf32>
    %89 = vector.broadcast %88 : vector<8x1xf32> to vector<8x256xf32>
    %90 = arith.addf %87, %89 : vector<8x256xf32>
    %cst_68 = arith.constant dense<0.000000e+00> : vector<8xf32>
    %91 = vector.multi_reduction <add>, %90, %cst_68 [1] : vector<8x256xf32> to vector<8xf32>
    %92 = vector.shape_cast %91 : vector<8xf32> to vector<8x1xf32>
    %cst_69 = arith.constant 2.560000e+02 : f32
    %93 = vector.broadcast %cst_69 : f32 to vector<8x1xf32>
    %94 = arith.divf %92, %93 : vector<8x1xf32>
    %95 = vector.broadcast %94 : vector<8x1xf32> to vector<8x256xf32>
    %96 = arith.subf %90, %95 : vector<8x256xf32>
    %97 = arith.mulf %96, %96 : vector<8x256xf32>
    %cst_70 = arith.constant dense<0.000000e+00> : vector<8xf32>
    %98 = vector.multi_reduction <add>, %97, %cst_70 [1] : vector<8x256xf32> to vector<8xf32>
    %99 = vector.shape_cast %98 : vector<8xf32> to vector<8x1xf32>
    %cst_71 = arith.constant 2.560000e+02 : f32
    %100 = vector.broadcast %cst_71 : f32 to vector<8x1xf32>
    %101 = arith.divf %99, %100 : vector<8x1xf32>
    %cst_72 = arith.constant 9.99999974E-6 : f32
    %102 = vector.broadcast %cst_72 : f32 to vector<8x1xf32>
    %103 = arith.addf %101, %102 : vector<8x1xf32>
    %104 = math.rsqrt %103 : vector<8x1xf32>
    %105 = arith.mulf %101, %104 : vector<8x1xf32>
    %106 = arith.mulf %105, %104 : vector<8x1xf32>
    %cst_73 = arith.constant 9.99999974E-6 : f32
    %107 = vector.broadcast %cst_73 : f32 to vector<8x1xf32>
    %108 = arith.addf %106, %107 : vector<8x1xf32>
    %109 = math.rsqrt %108 : vector<8x1xf32>
    %110 = arith.mulf %104, %109 : vector<8x1xf32>
    %111 = vector.broadcast %110 : vector<8x1xf32> to vector<8x256xf32>
    %112 = arith.mulf %96, %111 : vector<8x256xf32>
    %cst_74 = arith.constant 0.000000e+00 : f32
    %113 = vector.broadcast %cst_74 : f32 to vector<8x256xf32>
    %114 = arith.maximumf %112, %113 : vector<8x256xf32>
    %c0_75 = arith.constant 0 : index
    %c128_76 = arith.constant 128 : index
    %115 = vector.load %arg13[%c0_75, %c128_76] : memref<8x512xf32, #tpu.memory_space<vmem>>, vector<8x256xf32>
    tpu.vector_store %arg13[%c0_75, %c128_76], %114 {strides = array<i32>} : memref<8x512xf32, #tpu.memory_space<vmem>>, vector<8x256xf32>,
    %c0_77 = arith.constant 0 : index
    %c111_78 = arith.constant 111 : index
    %116 = vector.load %arg13[%c0_77, %c111_78] : memref<8x512xf32, #tpu.memory_space<vmem>>, vector<8x256xf32>
    %c0_79 = arith.constant 0 : index
    %c0_80 = arith.constant 0 : index
    %117 = vector.load %arg2[%c0_79, %c0_80] : memref<6x256xf32, #tpu.memory_space<vmem>>, vector<1x256xf32>
    %118 = vector.broadcast %117 : vector<1x256xf32> to vector<8x256xf32>
    %119 = arith.mulf %116, %118 : vector<8x256xf32>
    %c0_81 = arith.constant 0 : index
    %c0_82 = arith.constant 0 : index
    %120 = vector.load %arg14[%c0_81, %c0_82] : memref<72x256xf32, #tpu.memory_space<vmem>>, vector<8x256xf32>
    tpu.vector_store %arg14[%c0_81, %c0_82], %119 {strides = array<i32>} : memref<72x256xf32, #tpu.memory_space<vmem>>, vector<8x256xf32>,
    %c0_83 = arith.constant 0 : index
    %c112_84 = arith.constant 112 : index
    %121 = vector.load %arg13[%c0_83, %c112_84] : memref<8x512xf32, #tpu.memory_space<vmem>>, vector<8x256xf32>
    %c8_85 = arith.constant 8 : index
    %c0_86 = arith.constant 0 : index
    %122 = vector.load %arg14[%c8_85, %c0_86] : memref<72x256xf32, #tpu.memory_space<vmem>>, vector<8x256xf32>
    tpu.vector_store %arg14[%c8_85, %c0_86], %121 {strides = array<i32>} : memref<72x256xf32, #tpu.memory_space<vmem>>, vector<8x256xf32>,
    %c0_87 = arith.constant 0 : index
    %c113_88 = arith.constant 113 : index
    %123 = vector.load %arg13[%c0_87, %c113_88] : memref<8x512xf32, #tpu.memory_space<vmem>>, vector<8x256xf32>
    %c1_89 = arith.constant 1 : index
    %c0_90 = arith.constant 0 : index
    %124 = vector.load %arg2[%c1_89, %c0_90] : memref<6x256xf32, #tpu.memory_space<vmem>>, vector<1x256xf32>
    %125 = vector.broadcast %124 : vector<1x256xf32> to vector<8x256xf32>
    %126 = arith.mulf %123, %125 : vector<8x256xf32>
    %c16_91 = arith.constant 16 : index
    %c0_92 = arith.constant 0 : index
    %127 = vector.load %arg14[%c16_91, %c0_92] : memref<72x256xf32, #tpu.memory_space<vmem>>, vector<8x256xf32>
    tpu.vector_store %arg14[%c16_91, %c0_92], %126 {strides = array<i32>} : memref<72x256xf32, #tpu.memory_space<vmem>>, vector<8x256xf32>,
    %c0_93 = arith.constant 0 : index
    %c127_94 = arith.constant 127 : index
    %128 = vector.load %arg13[%c0_93, %c127_94] : memref<8x512xf32, #tpu.memory_space<vmem>>, vector<8x256xf32>
    %c2_95 = arith.constant 2 : index
    %c0_96 = arith.constant 0 : index
    %129 = vector.load %arg2[%c2_95, %c0_96] : memref<6x256xf32, #tpu.memory_space<vmem>>, vector<1x256xf32>
    %130 = vector.broadcast %129 : vector<1x256xf32> to vector<8x256xf32>
    %131 = arith.mulf %128, %130 : vector<8x256xf32>
    %c24_97 = arith.constant 24 : index
    %c0_98 = arith.constant 0 : index
    %132 = vector.load %arg14[%c24_97, %c0_98] : memref<72x256xf32, #tpu.memory_space<vmem>>, vector<8x256xf32>
    tpu.vector_store %arg14[%c24_97, %c0_98], %131 {strides = array<i32>} : memref<72x256xf32, #tpu.memory_space<vmem>>, vector<8x256xf32>,
    %c0_99 = arith.constant 0 : index
    %c128_100 = arith.constant 128 : index
    %133 = vector.load %arg13[%c0_99, %c128_100] : memref<8x512xf32, #tpu.memory_space<vmem>>, vector<8x256xf32>
    %c32_101 = arith.constant 32 : index
    %c0_102 = arith.constant 0 : index
    %134 = vector.load %arg14[%c32_101, %c0_102] : memref<72x256xf32, #tpu.memory_space<vmem>>, vector<8x256xf32>
    tpu.vector_store %arg14[%c32_101, %c0_102], %133 {strides = array<i32>} : memref<72x256xf32, #tpu.memory_space<vmem>>, vector<8x256xf32>,
    %c0_103 = arith.constant 0 : index
    %c129_104 = arith.constant 129 : index
    %135 = vector.load %arg13[%c0_103, %c129_104] : memref<8x512xf32, #tpu.memory_space<vmem>>, vector<8x256xf32>
    %c3_105 = arith.constant 3 : index
    %c0_106 = arith.constant 0 : index
    %136 = vector.load %arg2[%c3_105, %c0_106] : memref<6x256xf32, #tpu.memory_space<vmem>>, vector<1x256xf32>
    %137 = vector.broadcast %136 : vector<1x256xf32> to vector<8x256xf32>
    %138 = arith.mulf %135, %137 : vector<8x256xf32>
    %c40_107 = arith.constant 40 : index
    %c0_108 = arith.constant 0 : index
    %139 = vector.load %arg14[%c40_107, %c0_108] : memref<72x256xf32, #tpu.memory_space<vmem>>, vector<8x256xf32>
    tpu.vector_store %arg14[%c40_107, %c0_108], %138 {strides = array<i32>} : memref<72x256xf32, #tpu.memory_space<vmem>>, vector<8x256xf32>,
    %c0_109 = arith.constant 0 : index
    %c143_110 = arith.constant 143 : index
    %140 = vector.load %arg13[%c0_109, %c143_110] : memref<8x512xf32, #tpu.memory_space<vmem>>, vector<8x256xf32>
    %c4_111 = arith.constant 4 : index
    %c0_112 = arith.constant 0 : index
    %141 = vector.load %arg2[%c4_111, %c0_112] : memref<6x256xf32, #tpu.memory_space<vmem>>, vector<1x256xf32>
    %142 = vector.broadcast %141 : vector<1x256xf32> to vector<8x256xf32>
    %143 = arith.mulf %140, %142 : vector<8x256xf32>
    %c48_113 = arith.constant 48 : index
    %c0_114 = arith.constant 0 : index
    %144 = vector.load %arg14[%c48_113, %c0_114] : memref<72x256xf32, #tpu.memory_space<vmem>>, vector<8x256xf32>
    tpu.vector_store %arg14[%c48_113, %c0_114], %143 {strides = array<i32>} : memref<72x256xf32, #tpu.memory_space<vmem>>, vector<8x256xf32>,
    %c0_115 = arith.constant 0 : index
    %c144_116 = arith.constant 144 : index
    %145 = vector.load %arg13[%c0_115, %c144_116] : memref<8x512xf32, #tpu.memory_space<vmem>>, vector<8x256xf32>
    %c56_117 = arith.constant 56 : index
    %c0_118 = arith.constant 0 : index
    %146 = vector.load %arg14[%c56_117, %c0_118] : memref<72x256xf32, #tpu.memory_space<vmem>>, vector<8x256xf32>
    tpu.vector_store %arg14[%c56_117, %c0_118], %145 {strides = array<i32>} : memref<72x256xf32, #tpu.memory_space<vmem>>, vector<8x256xf32>,
    %c0_119 = arith.constant 0 : index
    %c145_120 = arith.constant 145 : index
    %147 = vector.load %arg13[%c0_119, %c145_120] : memref<8x512xf32, #tpu.memory_space<vmem>>, vector<8x256xf32>
    %c5_121 = arith.constant 5 : index
    %c0_122 = arith.constant 0 : index
    %148 = vector.load %arg2[%c5_121, %c0_122] : memref<6x256xf32, #tpu.memory_space<vmem>>, vector<1x256xf32>
    %149 = vector.broadcast %148 : vector<1x256xf32> to vector<8x256xf32>
    %150 = arith.mulf %147, %149 : vector<8x256xf32>
    %c64_123 = arith.constant 64 : index
    %c0_124 = arith.constant 0 : index
    %151 = vector.load %arg14[%c64_123, %c0_124] : memref<72x256xf32, #tpu.memory_space<vmem>>, vector<8x256xf32>
    tpu.vector_store %arg14[%c64_123, %c0_124], %150 {strides = array<i32>} : memref<72x256xf32, #tpu.memory_space<vmem>>, vector<8x256xf32>,
    %c0_125 = arith.constant 0 : index
    %c0_126 = arith.constant 0 : index
    %152 = vector.load %arg9[%c0_125, %c0_126] : memref<4x72xf32, #tpu.memory_space<vmem>>, vector<4x72xf32>
    %c0_127 = arith.constant 0 : index
    %c0_128 = arith.constant 0 : index
    %153 = vector.load %arg14[%c0_127, %c0_128] : memref<72x256xf32, #tpu.memory_space<vmem>>, vector<72x256xf32>
    %cst_129 = arith.constant dense<0.000000e+00> : vector<4x256xf32>
    %154 = tpu.matmul %152, %153, %cst_129 {dimension_numbers = #tpu.dot_dimension_numbers<[1], [0], [0], [1], [0, 0, 1, 1], [], []>} : vector<4x72xf32>, vector<72x256xf32>, vector<4x256xf32> -> vector<4x256xf32>
    %c0_130 = arith.constant 0 : index
    %c0_131 = arith.constant 0 : index
    %155 = vector.load %arg10[%c0_130, %c0_131] : memref<4x1xf32, #tpu.memory_space<vmem>>, vector<4x1xf32>
    %156 = vector.broadcast %155 : vector<4x1xf32> to vector<4x256xf32>
    %157 = arith.addf %154, %156 : vector<4x256xf32>
    %c12 = arith.constant 12 : index
    %c0_132 = arith.constant 0 : index
    %158 = vector.load %arg12[%c12, %c0_132] : memref<16x256xf32, #tpu.memory_space<vmem>>, vector<4x256xf32>
    tpu.vector_store %arg12[%c12, %c0_132], %157 {strides = array<i32>} : memref<16x256xf32, #tpu.memory_space<vmem>>, vector<4x256xf32>,
    %c0_133 = arith.constant 0 : index
    %c0_134 = arith.constant 0 : index
    %159 = vector.load %arg12[%c0_133, %c0_134] : memref<16x256xf32, #tpu.memory_space<vmem>>, vector<16x256xf32>
    %c0_135 = arith.constant 0 : index
    %c0_136 = arith.constant 0 : index
    %c0_137 = arith.constant 0 : index
    %160 = vector.load %arg11[%c0_135, %c0_136, %c0_137] : memref<1x16x256xf32, #tpu.memory_space<vmem>>, vector<1x16x256xf32>
    %161 = vector.shape_cast %160 : vector<1x16x256xf32> to vector<16x256xf32>
    %162 = vector.shape_cast %159 : vector<16x256xf32> to vector<1x16x256xf32>
    tpu.vector_store %arg11[%c0_135, %c0_136, %c0_137], %162 {strides = array<i32>} : memref<1x16x256xf32, #tpu.memory_space<vmem>>, vector<1x16x256xf32>,
    return
  }
  func.func @transform_0(%arg0: i32) -> (i32, i32, i32) {
    %c0_i32 = arith.constant 0 : i32
    %c0_i32_0 = arith.constant 0 : i32
    %c0_i32_1 = arith.constant 0 : i32
    return %arg0, %c0_i32, %c0_i32_0 : i32, i32, i32
  }
  func.func @transform_1(%arg0: i32) -> (i32, i32) {
    %c0_i32 = arith.constant 0 : i32
    %c0_i32_0 = arith.constant 0 : i32
    %c0_i32_1 = arith.constant 0 : i32
    return %c0_i32, %c0_i32_0 : i32, i32
  }
  func.func @transform_2(%arg0: i32) -> (i32, i32) {
    %c0_i32 = arith.constant 0 : i32
    %c0_i32_0 = arith.constant 0 : i32
    %c0_i32_1 = arith.constant 0 : i32
    return %c0_i32, %c0_i32_0 : i32, i32
  }
  func.func @transform_3(%arg0: i32) -> (i32, i32) {
    %c0_i32 = arith.constant 0 : i32
    %c0_i32_0 = arith.constant 0 : i32
    %c0_i32_1 = arith.constant 0 : i32
    return %c0_i32, %c0_i32_0 : i32, i32
  }
  func.func @transform_4(%arg0: i32) -> (i32, i32) {
    %c0_i32 = arith.constant 0 : i32
    %c0_i32_0 = arith.constant 0 : i32
    %c0_i32_1 = arith.constant 0 : i32
    return %c0_i32, %c0_i32_0 : i32, i32
  }
  func.func @transform_5(%arg0: i32) -> (i32, i32) {
    %c0_i32 = arith.constant 0 : i32
    %c0_i32_0 = arith.constant 0 : i32
    %c0_i32_1 = arith.constant 0 : i32
    return %c0_i32, %c0_i32_0 : i32, i32
  }
  func.func @transform_6(%arg0: i32) -> (i32, i32) {
    %c0_i32 = arith.constant 0 : i32
    %c0_i32_0 = arith.constant 0 : i32
    %c0_i32_1 = arith.constant 0 : i32
    return %c0_i32, %c0_i32_0 : i32, i32
  }
  func.func @transform_7(%arg0: i32) -> (i32, i32) {
    %c0_i32 = arith.constant 0 : i32
    %c0_i32_0 = arith.constant 0 : i32
    %c0_i32_1 = arith.constant 0 : i32
    return %c0_i32, %c0_i32_0 : i32, i32
  }
  func.func @transform_8(%arg0: i32) -> (i32, i32) {
    %c0_i32 = arith.constant 0 : i32
    %c0_i32_0 = arith.constant 0 : i32
    %c0_i32_1 = arith.constant 0 : i32
    return %c0_i32, %c0_i32_0 : i32, i32
  }
  func.func @transform_9(%arg0: i32) -> (i32, i32) {
    %c0_i32 = arith.constant 0 : i32
    %c0_i32_0 = arith.constant 0 : i32
    %c0_i32_1 = arith.constant 0 : i32
    return %c0_i32, %c0_i32_0 : i32, i32
  }
  func.func @transform_10(%arg0: i32) -> (i32, i32, i32) {
    %c0_i32 = arith.constant 0 : i32
    %c0_i32_0 = arith.constant 0 : i32
    %c0_i32_1 = arith.constant 0 : i32
    return %arg0, %c0_i32, %c0_i32_0 : i32, i32, i32
  }
}

module attributes {stable_mosaic.version = 11 : i64} {
  func.func @_conv_chain_kernel(%arg0: i32, %arg1: memref<1x24x256xf32, #tpu.memory_space<vmem>>, %arg2: memref<6x256xf32, #tpu.memory_space<vmem>>, %arg3: memref<12x216xf32, #tpu.memory_space<vmem>>, %arg4: memref<12x1xf32, #tpu.memory_space<vmem>>, %arg5: memref<2x144xf32, #tpu.memory_space<vmem>>, %arg6: memref<2x1xf32, #tpu.memory_space<vmem>>, %arg7: memref<1x2x256xf32, #tpu.memory_space<vmem>>, %arg8: memref<24x512xf32, #tpu.memory_space<vmem>>, %arg9: memref<216x256xf32, #tpu.memory_space<vmem>>) attributes {dimension_semantics = [#tpu.dimension_semantics<parallel>], iteration_bounds = array<i64: 2>, scalar_prefetch = 0 : i64, scratch_operands = 2 : i64, tpu.core_type = #tpu.core_type<tc>, window_params = [{transform_indices = @transform_0, window_bounds = array<i64: 1, 24, 256>}, {pipeline_mode = #tpu.pipeline_mode<synchronous>, transform_indices = @transform_1, window_bounds = array<i64: 6, 256>}, {pipeline_mode = #tpu.pipeline_mode<synchronous>, transform_indices = @transform_2, window_bounds = array<i64: 12, 216>}, {pipeline_mode = #tpu.pipeline_mode<synchronous>, transform_indices = @transform_3, window_bounds = array<i64: 12, 1>}, {pipeline_mode = #tpu.pipeline_mode<synchronous>, transform_indices = @transform_4, window_bounds = array<i64: 2, 144>}, {pipeline_mode = #tpu.pipeline_mode<synchronous>, transform_indices = @transform_5, window_bounds = array<i64: 2, 1>}, {transform_indices = @transform_6, window_bounds = array<i64: 1, 2, 256>}]} {
    %cst = arith.constant 0.000000e+00 : f32
    %0 = vector.broadcast %cst : f32 to vector<24x128xf32>
    %c0 = arith.constant 0 : index
    %c0_0 = arith.constant 0 : index
    %1 = vector.load %arg8[%c0, %c0_0] : memref<24x512xf32, #tpu.memory_space<vmem>>, vector<24x128xf32>
    tpu.vector_store %arg8[%c0, %c0_0], %0 {strides = array<i32>} : memref<24x512xf32, #tpu.memory_space<vmem>>, vector<24x128xf32>,
    %cst_1 = arith.constant 0.000000e+00 : f32
    %2 = vector.broadcast %cst_1 : f32 to vector<24x128xf32>
    %c0_2 = arith.constant 0 : index
    %c384 = arith.constant 384 : index
    %3 = vector.load %arg8[%c0_2, %c384] : memref<24x512xf32, #tpu.memory_space<vmem>>, vector<24x128xf32>
    tpu.vector_store %arg8[%c0_2, %c384], %2 {strides = array<i32>} : memref<24x512xf32, #tpu.memory_space<vmem>>, vector<24x128xf32>,
    %c0_3 = arith.constant 0 : index
    %c0_4 = arith.constant 0 : index
    %c0_5 = arith.constant 0 : index
    %4 = vector.load %arg1[%c0_3, %c0_4, %c0_5] : memref<1x24x256xf32, #tpu.memory_space<vmem>>, vector<1x24x256xf32>
    %5 = vector.shape_cast %4 : vector<1x24x256xf32> to vector<24x256xf32>
    %c0_6 = arith.constant 0 : index
    %c128 = arith.constant 128 : index
    %6 = vector.load %arg8[%c0_6, %c128] : memref<24x512xf32, #tpu.memory_space<vmem>>, vector<24x256xf32>
    tpu.vector_store %arg8[%c0_6, %c128], %5 {strides = array<i32>} : memref<24x512xf32, #tpu.memory_space<vmem>>, vector<24x256xf32>,
    %c0_7 = arith.constant 0 : index
    %c111 = arith.constant 111 : index
    %7 = vector.load %arg8[%c0_7, %c111] : memref<24x512xf32, #tpu.memory_space<vmem>>, vector<24x256xf32>
    %c0_8 = arith.constant 0 : index
    %c0_9 = arith.constant 0 : index
    %8 = vector.load %arg2[%c0_8, %c0_9] : memref<6x256xf32, #tpu.memory_space<vmem>>, vector<1x256xf32>
    %9 = vector.broadcast %8 : vector<1x256xf32> to vector<24x256xf32>
    %10 = arith.mulf %7, %9 : vector<24x256xf32>
    %c0_10 = arith.constant 0 : index
    %c0_11 = arith.constant 0 : index
    %11 = vector.load %arg9[%c0_10, %c0_11] : memref<216x256xf32, #tpu.memory_space<vmem>>, vector<24x256xf32>
    tpu.vector_store %arg9[%c0_10, %c0_11], %10 {strides = array<i32>} : memref<216x256xf32, #tpu.memory_space<vmem>>, vector<24x256xf32>,
    %c0_12 = arith.constant 0 : index
    %c112 = arith.constant 112 : index
    %12 = vector.load %arg8[%c0_12, %c112] : memref<24x512xf32, #tpu.memory_space<vmem>>, vector<24x256xf32>
    %c24 = arith.constant 24 : index
    %c0_13 = arith.constant 0 : index
    %13 = vector.load %arg9[%c24, %c0_13] : memref<216x256xf32, #tpu.memory_space<vmem>>, vector<24x256xf32>
    tpu.vector_store %arg9[%c24, %c0_13], %12 {strides = array<i32>} : memref<216x256xf32, #tpu.memory_space<vmem>>, vector<24x256xf32>,
    %c0_14 = arith.constant 0 : index
    %c113 = arith.constant 113 : index
    %14 = vector.load %arg8[%c0_14, %c113] : memref<24x512xf32, #tpu.memory_space<vmem>>, vector<24x256xf32>
    %c1 = arith.constant 1 : index
    %c0_15 = arith.constant 0 : index
    %15 = vector.load %arg2[%c1, %c0_15] : memref<6x256xf32, #tpu.memory_space<vmem>>, vector<1x256xf32>
    %16 = vector.broadcast %15 : vector<1x256xf32> to vector<24x256xf32>
    %17 = arith.mulf %14, %16 : vector<24x256xf32>
    %c48 = arith.constant 48 : index
    %c0_16 = arith.constant 0 : index
    %18 = vector.load %arg9[%c48, %c0_16] : memref<216x256xf32, #tpu.memory_space<vmem>>, vector<24x256xf32>
    tpu.vector_store %arg9[%c48, %c0_16], %17 {strides = array<i32>} : memref<216x256xf32, #tpu.memory_space<vmem>>, vector<24x256xf32>,
    %c0_17 = arith.constant 0 : index
    %c127 = arith.constant 127 : index
    %19 = vector.load %arg8[%c0_17, %c127] : memref<24x512xf32, #tpu.memory_space<vmem>>, vector<24x256xf32>
    %c2 = arith.constant 2 : index
    %c0_18 = arith.constant 0 : index
    %20 = vector.load %arg2[%c2, %c0_18] : memref<6x256xf32, #tpu.memory_space<vmem>>, vector<1x256xf32>
    %21 = vector.broadcast %20 : vector<1x256xf32> to vector<24x256xf32>
    %22 = arith.mulf %19, %21 : vector<24x256xf32>
    %c72 = arith.constant 72 : index
    %c0_19 = arith.constant 0 : index
    %23 = vector.load %arg9[%c72, %c0_19] : memref<216x256xf32, #tpu.memory_space<vmem>>, vector<24x256xf32>
    tpu.vector_store %arg9[%c72, %c0_19], %22 {strides = array<i32>} : memref<216x256xf32, #tpu.memory_space<vmem>>, vector<24x256xf32>,
    %c0_20 = arith.constant 0 : index
    %c128_21 = arith.constant 128 : index
    %24 = vector.load %arg8[%c0_20, %c128_21] : memref<24x512xf32, #tpu.memory_space<vmem>>, vector<24x256xf32>
    %c96 = arith.constant 96 : index
    %c0_22 = arith.constant 0 : index
    %25 = vector.load %arg9[%c96, %c0_22] : memref<216x256xf32, #tpu.memory_space<vmem>>, vector<24x256xf32>
    tpu.vector_store %arg9[%c96, %c0_22], %24 {strides = array<i32>} : memref<216x256xf32, #tpu.memory_space<vmem>>, vector<24x256xf32>,
    %c0_23 = arith.constant 0 : index
    %c129 = arith.constant 129 : index
    %26 = vector.load %arg8[%c0_23, %c129] : memref<24x512xf32, #tpu.memory_space<vmem>>, vector<24x256xf32>
    %c3 = arith.constant 3 : index
    %c0_24 = arith.constant 0 : index
    %27 = vector.load %arg2[%c3, %c0_24] : memref<6x256xf32, #tpu.memory_space<vmem>>, vector<1x256xf32>
    %28 = vector.broadcast %27 : vector<1x256xf32> to vector<24x256xf32>
    %29 = arith.mulf %26, %28 : vector<24x256xf32>
    %c120 = arith.constant 120 : index
    %c0_25 = arith.constant 0 : index
    %30 = vector.load %arg9[%c120, %c0_25] : memref<216x256xf32, #tpu.memory_space<vmem>>, vector<24x256xf32>
    tpu.vector_store %arg9[%c120, %c0_25], %29 {strides = array<i32>} : memref<216x256xf32, #tpu.memory_space<vmem>>, vector<24x256xf32>,
    %c0_26 = arith.constant 0 : index
    %c143 = arith.constant 143 : index
    %31 = vector.load %arg8[%c0_26, %c143] : memref<24x512xf32, #tpu.memory_space<vmem>>, vector<24x256xf32>
    %c4 = arith.constant 4 : index
    %c0_27 = arith.constant 0 : index
    %32 = vector.load %arg2[%c4, %c0_27] : memref<6x256xf32, #tpu.memory_space<vmem>>, vector<1x256xf32>
    %33 = vector.broadcast %32 : vector<1x256xf32> to vector<24x256xf32>
    %34 = arith.mulf %31, %33 : vector<24x256xf32>
    %c144 = arith.constant 144 : index
    %c0_28 = arith.constant 0 : index
    %35 = vector.load %arg9[%c144, %c0_28] : memref<216x256xf32, #tpu.memory_space<vmem>>, vector<24x256xf32>
    tpu.vector_store %arg9[%c144, %c0_28], %34 {strides = array<i32>} : memref<216x256xf32, #tpu.memory_space<vmem>>, vector<24x256xf32>,
    %c0_29 = arith.constant 0 : index
    %c144_30 = arith.constant 144 : index
    %36 = vector.load %arg8[%c0_29, %c144_30] : memref<24x512xf32, #tpu.memory_space<vmem>>, vector<24x256xf32>
    %c168 = arith.constant 168 : index
    %c0_31 = arith.constant 0 : index
    %37 = vector.load %arg9[%c168, %c0_31] : memref<216x256xf32, #tpu.memory_space<vmem>>, vector<24x256xf32>
    tpu.vector_store %arg9[%c168, %c0_31], %36 {strides = array<i32>} : memref<216x256xf32, #tpu.memory_space<vmem>>, vector<24x256xf32>,
    %c0_32 = arith.constant 0 : index
    %c145 = arith.constant 145 : index
    %38 = vector.load %arg8[%c0_32, %c145] : memref<24x512xf32, #tpu.memory_space<vmem>>, vector<24x256xf32>
    %c5 = arith.constant 5 : index
    %c0_33 = arith.constant 0 : index
    %39 = vector.load %arg2[%c5, %c0_33] : memref<6x256xf32, #tpu.memory_space<vmem>>, vector<1x256xf32>
    %40 = vector.broadcast %39 : vector<1x256xf32> to vector<24x256xf32>
    %41 = arith.mulf %38, %40 : vector<24x256xf32>
    %c192 = arith.constant 192 : index
    %c0_34 = arith.constant 0 : index
    %42 = vector.load %arg9[%c192, %c0_34] : memref<216x256xf32, #tpu.memory_space<vmem>>, vector<24x256xf32>
    tpu.vector_store %arg9[%c192, %c0_34], %41 {strides = array<i32>} : memref<216x256xf32, #tpu.memory_space<vmem>>, vector<24x256xf32>,
    %c0_35 = arith.constant 0 : index
    %c0_36 = arith.constant 0 : index
    %43 = vector.load %arg3[%c0_35, %c0_36] : memref<12x216xf32, #tpu.memory_space<vmem>>, vector<12x216xf32>
    %c0_37 = arith.constant 0 : index
    %c0_38 = arith.constant 0 : index
    %44 = vector.load %arg9[%c0_37, %c0_38] : memref<216x256xf32, #tpu.memory_space<vmem>>, vector<216x256xf32>
    %cst_39 = arith.constant dense<0.000000e+00> : vector<12x256xf32>
    %45 = tpu.matmul %43, %44, %cst_39 {dimension_numbers = #tpu.dot_dimension_numbers<[1], [0], [0], [1], [0, 0, 1, 1], [], []>} : vector<12x216xf32>, vector<216x256xf32>, vector<12x256xf32> -> vector<12x256xf32>
    %c0_40 = arith.constant 0 : index
    %c0_41 = arith.constant 0 : index
    %46 = vector.load %arg4[%c0_40, %c0_41] : memref<12x1xf32, #tpu.memory_space<vmem>>, vector<12x1xf32>
    %47 = vector.broadcast %46 : vector<12x1xf32> to vector<12x256xf32>
    %48 = arith.addf %45, %47 : vector<12x256xf32>
    %c0_42 = arith.constant 0 : index
    %c128_43 = arith.constant 128 : index
    %49 = vector.load %arg8[%c0_42, %c128_43] : memref<24x512xf32, #tpu.memory_space<vmem>>, vector<12x256xf32>
    tpu.vector_store %arg8[%c0_42, %c128_43], %48 {strides = array<i32>} : memref<24x512xf32, #tpu.memory_space<vmem>>, vector<12x256xf32>,
    %cst_44 = arith.constant 0.000000e+00 : f32
    %50 = vector.broadcast %cst_44 : f32 to vector<4x256xf32>
    %c12 = arith.constant 12 : index
    %c128_45 = arith.constant 128 : index
    %51 = vector.load %arg8[%c12, %c128_45] : memref<24x512xf32, #tpu.memory_space<vmem>>, vector<4x256xf32>
    tpu.vector_store %arg8[%c12, %c128_45], %50 {strides = array<i32>} : memref<24x512xf32, #tpu.memory_space<vmem>>, vector<4x256xf32>,
    %c0_46 = arith.constant 0 : index
    %c111_47 = arith.constant 111 : index
    %52 = vector.load %arg8[%c0_46, %c111_47] : memref<24x512xf32, #tpu.memory_space<vmem>>, vector<16x256xf32>
    %c0_48 = arith.constant 0 : index
    %c0_49 = arith.constant 0 : index
    %53 = vector.load %arg2[%c0_48, %c0_49] : memref<6x256xf32, #tpu.memory_space<vmem>>, vector<1x256xf32>
    %54 = vector.broadcast %53 : vector<1x256xf32> to vector<16x256xf32>
    %55 = arith.mulf %52, %54 : vector<16x256xf32>
    %c0_50 = arith.constant 0 : index
    %c0_51 = arith.constant 0 : index
    %56 = vector.load %arg9[%c0_50, %c0_51] : memref<216x256xf32, #tpu.memory_space<vmem>>, vector<16x256xf32>
    tpu.vector_store %arg9[%c0_50, %c0_51], %55 {strides = array<i32>} : memref<216x256xf32, #tpu.memory_space<vmem>>, vector<16x256xf32>,
    %c0_52 = arith.constant 0 : index
    %c112_53 = arith.constant 112 : index
    %57 = vector.load %arg8[%c0_52, %c112_53] : memref<24x512xf32, #tpu.memory_space<vmem>>, vector<16x256xf32>
    %c16 = arith.constant 16 : index
    %c0_54 = arith.constant 0 : index
    %58 = vector.load %arg9[%c16, %c0_54] : memref<216x256xf32, #tpu.memory_space<vmem>>, vector<16x256xf32>
    tpu.vector_store %arg9[%c16, %c0_54], %57 {strides = array<i32>} : memref<216x256xf32, #tpu.memory_space<vmem>>, vector<16x256xf32>,
    %c0_55 = arith.constant 0 : index
    %c113_56 = arith.constant 113 : index
    %59 = vector.load %arg8[%c0_55, %c113_56] : memref<24x512xf32, #tpu.memory_space<vmem>>, vector<16x256xf32>
    %c1_57 = arith.constant 1 : index
    %c0_58 = arith.constant 0 : index
    %60 = vector.load %arg2[%c1_57, %c0_58] : memref<6x256xf32, #tpu.memory_space<vmem>>, vector<1x256xf32>
    %61 = vector.broadcast %60 : vector<1x256xf32> to vector<16x256xf32>
    %62 = arith.mulf %59, %61 : vector<16x256xf32>
    %c32 = arith.constant 32 : index
    %c0_59 = arith.constant 0 : index
    %63 = vector.load %arg9[%c32, %c0_59] : memref<216x256xf32, #tpu.memory_space<vmem>>, vector<16x256xf32>
    tpu.vector_store %arg9[%c32, %c0_59], %62 {strides = array<i32>} : memref<216x256xf32, #tpu.memory_space<vmem>>, vector<16x256xf32>,
    %c0_60 = arith.constant 0 : index
    %c127_61 = arith.constant 127 : index
    %64 = vector.load %arg8[%c0_60, %c127_61] : memref<24x512xf32, #tpu.memory_space<vmem>>, vector<16x256xf32>
    %c2_62 = arith.constant 2 : index
    %c0_63 = arith.constant 0 : index
    %65 = vector.load %arg2[%c2_62, %c0_63] : memref<6x256xf32, #tpu.memory_space<vmem>>, vector<1x256xf32>
    %66 = vector.broadcast %65 : vector<1x256xf32> to vector<16x256xf32>
    %67 = arith.mulf %64, %66 : vector<16x256xf32>
    %c48_64 = arith.constant 48 : index
    %c0_65 = arith.constant 0 : index
    %68 = vector.load %arg9[%c48_64, %c0_65] : memref<216x256xf32, #tpu.memory_space<vmem>>, vector<16x256xf32>
    tpu.vector_store %arg9[%c48_64, %c0_65], %67 {strides = array<i32>} : memref<216x256xf32, #tpu.memory_space<vmem>>, vector<16x256xf32>,
    %c0_66 = arith.constant 0 : index
    %c128_67 = arith.constant 128 : index
    %69 = vector.load %arg8[%c0_66, %c128_67] : memref<24x512xf32, #tpu.memory_space<vmem>>, vector<16x256xf32>
    %c64 = arith.constant 64 : index
    %c0_68 = arith.constant 0 : index
    %70 = vector.load %arg9[%c64, %c0_68] : memref<216x256xf32, #tpu.memory_space<vmem>>, vector<16x256xf32>
    tpu.vector_store %arg9[%c64, %c0_68], %69 {strides = array<i32>} : memref<216x256xf32, #tpu.memory_space<vmem>>, vector<16x256xf32>,
    %c0_69 = arith.constant 0 : index
    %c129_70 = arith.constant 129 : index
    %71 = vector.load %arg8[%c0_69, %c129_70] : memref<24x512xf32, #tpu.memory_space<vmem>>, vector<16x256xf32>
    %c3_71 = arith.constant 3 : index
    %c0_72 = arith.constant 0 : index
    %72 = vector.load %arg2[%c3_71, %c0_72] : memref<6x256xf32, #tpu.memory_space<vmem>>, vector<1x256xf32>
    %73 = vector.broadcast %72 : vector<1x256xf32> to vector<16x256xf32>
    %74 = arith.mulf %71, %73 : vector<16x256xf32>
    %c80 = arith.constant 80 : index
    %c0_73 = arith.constant 0 : index
    %75 = vector.load %arg9[%c80, %c0_73] : memref<216x256xf32, #tpu.memory_space<vmem>>, vector<16x256xf32>
    tpu.vector_store %arg9[%c80, %c0_73], %74 {strides = array<i32>} : memref<216x256xf32, #tpu.memory_space<vmem>>, vector<16x256xf32>,
    %c0_74 = arith.constant 0 : index
    %c143_75 = arith.constant 143 : index
    %76 = vector.load %arg8[%c0_74, %c143_75] : memref<24x512xf32, #tpu.memory_space<vmem>>, vector<16x256xf32>
    %c4_76 = arith.constant 4 : index
    %c0_77 = arith.constant 0 : index
    %77 = vector.load %arg2[%c4_76, %c0_77] : memref<6x256xf32, #tpu.memory_space<vmem>>, vector<1x256xf32>
    %78 = vector.broadcast %77 : vector<1x256xf32> to vector<16x256xf32>
    %79 = arith.mulf %76, %78 : vector<16x256xf32>
    %c96_78 = arith.constant 96 : index
    %c0_79 = arith.constant 0 : index
    %80 = vector.load %arg9[%c96_78, %c0_79] : memref<216x256xf32, #tpu.memory_space<vmem>>, vector<16x256xf32>
    tpu.vector_store %arg9[%c96_78, %c0_79], %79 {strides = array<i32>} : memref<216x256xf32, #tpu.memory_space<vmem>>, vector<16x256xf32>,
    %c0_80 = arith.constant 0 : index
    %c144_81 = arith.constant 144 : index
    %81 = vector.load %arg8[%c0_80, %c144_81] : memref<24x512xf32, #tpu.memory_space<vmem>>, vector<16x256xf32>
    %c112_82 = arith.constant 112 : index
    %c0_83 = arith.constant 0 : index
    %82 = vector.load %arg9[%c112_82, %c0_83] : memref<216x256xf32, #tpu.memory_space<vmem>>, vector<16x256xf32>
    tpu.vector_store %arg9[%c112_82, %c0_83], %81 {strides = array<i32>} : memref<216x256xf32, #tpu.memory_space<vmem>>, vector<16x256xf32>,
    %c0_84 = arith.constant 0 : index
    %c145_85 = arith.constant 145 : index
    %83 = vector.load %arg8[%c0_84, %c145_85] : memref<24x512xf32, #tpu.memory_space<vmem>>, vector<16x256xf32>
    %c5_86 = arith.constant 5 : index
    %c0_87 = arith.constant 0 : index
    %84 = vector.load %arg2[%c5_86, %c0_87] : memref<6x256xf32, #tpu.memory_space<vmem>>, vector<1x256xf32>
    %85 = vector.broadcast %84 : vector<1x256xf32> to vector<16x256xf32>
    %86 = arith.mulf %83, %85 : vector<16x256xf32>
    %c128_88 = arith.constant 128 : index
    %c0_89 = arith.constant 0 : index
    %87 = vector.load %arg9[%c128_88, %c0_89] : memref<216x256xf32, #tpu.memory_space<vmem>>, vector<16x256xf32>
    tpu.vector_store %arg9[%c128_88, %c0_89], %86 {strides = array<i32>} : memref<216x256xf32, #tpu.memory_space<vmem>>, vector<16x256xf32>,
    %c0_90 = arith.constant 0 : index
    %c0_91 = arith.constant 0 : index
    %88 = vector.load %arg5[%c0_90, %c0_91] : memref<2x144xf32, #tpu.memory_space<vmem>>, vector<2x144xf32>
    %c0_92 = arith.constant 0 : index
    %c0_93 = arith.constant 0 : index
    %89 = vector.load %arg9[%c0_92, %c0_93] : memref<216x256xf32, #tpu.memory_space<vmem>>, vector<144x256xf32>
    %cst_94 = arith.constant dense<0.000000e+00> : vector<2x256xf32>
    %90 = tpu.matmul %88, %89, %cst_94 {dimension_numbers = #tpu.dot_dimension_numbers<[1], [0], [0], [1], [0, 0, 1, 1], [], []>} : vector<2x144xf32>, vector<144x256xf32>, vector<2x256xf32> -> vector<2x256xf32>
    %c0_95 = arith.constant 0 : index
    %c0_96 = arith.constant 0 : index
    %91 = vector.load %arg6[%c0_95, %c0_96] : memref<2x1xf32, #tpu.memory_space<vmem>>, vector<2x1xf32>
    %92 = vector.broadcast %91 : vector<2x1xf32> to vector<2x256xf32>
    %93 = arith.addf %90, %92 : vector<2x256xf32>
    %c0_97 = arith.constant 0 : index
    %c0_98 = arith.constant 0 : index
    %c0_99 = arith.constant 0 : index
    %94 = vector.load %arg7[%c0_97, %c0_98, %c0_99] : memref<1x2x256xf32, #tpu.memory_space<vmem>>, vector<1x2x256xf32>
    %95 = vector.shape_cast %94 : vector<1x2x256xf32> to vector<2x256xf32>
    %96 = vector.shape_cast %93 : vector<2x256xf32> to vector<1x2x256xf32>
    tpu.vector_store %arg7[%c0_97, %c0_98, %c0_99], %96 {strides = array<i32>} : memref<1x2x256xf32, #tpu.memory_space<vmem>>, vector<1x2x256xf32>,
    return
  }
  func.func @transform_0(%arg0: i32) -> (i32, i32, i32) {
    %c0_i32 = arith.constant 0 : i32
    %c0_i32_0 = arith.constant 0 : i32
    %c0_i32_1 = arith.constant 0 : i32
    return %arg0, %c0_i32, %c0_i32_0 : i32, i32, i32
  }
  func.func @transform_1(%arg0: i32) -> (i32, i32) {
    %c0_i32 = arith.constant 0 : i32
    %c0_i32_0 = arith.constant 0 : i32
    %c0_i32_1 = arith.constant 0 : i32
    return %c0_i32, %c0_i32_0 : i32, i32
  }
  func.func @transform_2(%arg0: i32) -> (i32, i32) {
    %c0_i32 = arith.constant 0 : i32
    %c0_i32_0 = arith.constant 0 : i32
    %c0_i32_1 = arith.constant 0 : i32
    return %c0_i32, %c0_i32_0 : i32, i32
  }
  func.func @transform_3(%arg0: i32) -> (i32, i32) {
    %c0_i32 = arith.constant 0 : i32
    %c0_i32_0 = arith.constant 0 : i32
    %c0_i32_1 = arith.constant 0 : i32
    return %c0_i32, %c0_i32_0 : i32, i32
  }
  func.func @transform_4(%arg0: i32) -> (i32, i32) {
    %c0_i32 = arith.constant 0 : i32
    %c0_i32_0 = arith.constant 0 : i32
    %c0_i32_1 = arith.constant 0 : i32
    return %c0_i32, %c0_i32_0 : i32, i32
  }
  func.func @transform_5(%arg0: i32) -> (i32, i32) {
    %c0_i32 = arith.constant 0 : i32
    %c0_i32_0 = arith.constant 0 : i32
    %c0_i32_1 = arith.constant 0 : i32
    return %c0_i32, %c0_i32_0 : i32, i32
  }
  func.func @transform_6(%arg0: i32) -> (i32, i32, i32) {
    %c0_i32 = arith.constant 0 : i32
    %c0_i32_0 = arith.constant 0 : i32
    %c0_i32_1 = arith.constant 0 : i32
    return %arg0, %c0_i32, %c0_i32_0 : i32, i32, i32
  }
}

</mosaic_0001>

<bundles_post_ra>
// kernel: densenet_forward.4
= control target key start
LH: loop header
LB: loop body
LE: loop exit
PB: predicated region body
PF: predicated region fallthrough
CT: control target
= control target key end

     0   :  { %s788_s15 = smov 0   ;;  %s903_s0 = inlined_call_operand.vmem [shape: f32[2,4,256], index: 0, kind: input, shape index: {}]   ;;  %s904_s1 = inlined_call_operand.vmem [shape: f32[6,256], index: 1, kind: input, shape index: {}]   ;;  %s905_s2 = inlined_call_operand.vmem [shape: f32[8,72], index: 2, kind: input, shape index: {}]   ;;  %s906_s3 = inlined_call_operand.vmem [shape: f32[8,1], index: 3, kind: input, shape index: {}]   ;;  %s907_s4 = inlined_call_operand.vmem [shape: f32[2,8,256], index: 4, kind: output, shape index: {}]  }
   0x1 LB: > { %s654_s16 = sadd.s32 4294967295, %s751_s15   ;;  %p658_p0 = scmp.ge.s32.totalorder %s751_s15, 1  ;;  %s751_s15 = sphi %s788_s15, %s14_s15  }
   0x2   : > { %p162_p1 = scmp.lt.s32.totalorder %s751_s15, 3 }
   0x4   : > { %p163_p2 = pnand %p658_p0, %p162_p1 }
   0x5   : > { %v213_v0 = vlaneseq (!%p163_p2)  ;;  %v753_v1 = vmov (!%p163_p2), 0.0   ;;  %v663_v3 = vld [vmem:[%s904_s1 + $0x1] ss:$8 sm:$0x3] (!%p163_p2)  ;;  %p188_p3 = scmp.lt.s32.totalorder (!%p163_p2), %s654_s16, 1  ;;  %s754_s21 = smov (!%p163_p2), 113  }
   0x6   : > { %166 = sbr.rel (%p163_p2) target bundleno = 498 (0x1f2), region = 36  ;;  %206 = vst [vmem:[#allocation2 + $0x8] sm:$0xf0] (!%p163_p2), %v753_v1  ;;  %207 = vst [vmem:[#allocation2 + $0x10] sm:$0xf0] (!%p163_p2), %v753_v1  ;;  %588 = vmatprep.mubr.f32.mxu0 (!%p163_p2), %v753_v1  ;;  %s755_s22 = smov (!%p163_p2), 111  }
   0x7   : > { %v214_v2 = vshrl.u32 (!%p163_p2), %v213_v0, 7  ;;  %v211_v4 = vld [vmem:[%s904_s1] ss:$8 sm:$0x3] (!%p163_p2)  ;;  %s756_s5 = smov (!%p163_p2), 127   ;;  %s757_s8 = smov (!%p163_p2), 1  }
   0x8   : > { %v664_v11 = vld [vmem:[%s904_s1 + $0x2] ss:$8 sm:$0x3] (!%p163_p2)  ;;  %v665_v16 = vld [vmem:[%s904_s1 + $0x3] ss:$8 sm:$0x3] (!%p163_p2) }
   0x9   : > { %v215_v5 = vsub.s32 (!%p163_p2), 0, %v214_v2  ;;  %v219_v6 = vsub.s32 (!%p163_p2), 1, %v214_v2  ;;  %v666_v19 = vld [vmem:[%s904_s1 + $0x4] ss:$8 sm:$0x3] (!%p163_p2)  ;;  %s758_s11 = smov (!%p163_p2), 15  }
   0xa   : > { %v667_v22 = vld [vmem:[%s904_s1 + $0x5] ss:$8 sm:$0x3] (!%p163_p2)  ;;  %s759_s12 = smov (!%p163_p2), 17   ;;  %s760_s13 = smov (!%p163_p2), 16   ;;  %vm225_vm0 = vcmask (!%p163_p2), 908288  }
   0xb   : > { %v277_v7 = vrot.slane (!%p163_p2), %v663_v3, %v215_v5  ;;  %v216_v8 = vrot.slane (!%p163_p2), %v211_v4, %v215_v5  ;;  %v281_v9 = vrot.slane (!%p163_p2), %v663_v3, %v219_v6  ;;  %v220_v10 = vrot.slane (!%p163_p2), %v211_v4, %v219_v6  ;;  %s761_s14 = smov (!%p163_p2), 112  }
   0xc   : > { %v323_v14 = vrot.slane (!%p163_p2), %v664_v11, %v219_v6  ;;  %v319_v15 = vrot.slane (!%p163_p2), %v664_v11, %v215_v5  ;;  %v369_v17 = vrot.slane (!%p163_p2), %v665_v16, %v219_v6  ;;  %v365_v18 = vrot.slane (!%p163_p2), %v665_v16, %v215_v5 }
   0xd   : > { %s909_s16 = smov (!%p188_p3, %s654_s16), 1  ;;  %282 = vrot.lane.b32.xlu1 %v277_v7, %s754_s21  ;;  %221 = vrot.lane.b32.xlu0 %v216_v8, %s755_s22  ;;  %v409_v20 = vrot.slane %v666_v19, %v219_v6  ;;  %v405_v21 = vrot.slane %v666_v19, %v215_v5  ;;  %v468_v23 = vrot.slane %v667_v22, %v219_v6  ;;  %vm286_vm1 = vcmask 924672   ;;  %v514_v6 = vld [vmem:[%s906_s3] sm:$0xff] }
   0xe   : > { %s671_s23 = sshll.u32 %s909_s16, 3  ;;  %v464_v24 = vrot.slane %v667_v22, %v215_v5  ;;  %vm328_vm2 = vcmask 1039360   ;;  %vm345_vm3 = vcmask 7168   ;;  %vm303_vm4 = vcmask 121856  }
   0xf   : > { %s192_s28 = scalar_lea.vmem %s903_s0, %s671_s23  ;;  %vm242_vm5 = vcmask 138240   ;;  %v762_v4 = vmov 0   ;;  %vm261_vm6 = vcmask 130048   ;;  %vm448_vm7 = vcmask 916480  }
  0x10   : > { %v200_v12 = vld [vmem:[%s192_s28] sm:$0xff]  ;;  %742 = vset.pattern.permute.xlu1 %v762_v4  ;;  %743 = vset.pattern.permute.xlu0 %v762_v4  ;;  %vm520_vm8 = vcmask 588800  }
  0x11   : > { %v202_v13 = vcombine.high %v200_v12, %v200_v12  ;;  %204 = vst [vmem:[#allocation2 + $0x8] sm:$0xf] %v200_v12  ;;  %284 = vrot.lane.b32.xlu1 %v281_v9, %s754_s21  ;;  %223 = vrot.lane.b32.xlu0 %v220_v10, %s755_s22 }
  0x13   : > { %205 = vst [vmem:[#allocation2 + $0x10] sm:$0xf] %v202_v13 }
  0x15   : > { %326 = vrot.lane.b32.xlu1 %v323_v14, %s756_s5  ;;  %324 = vrot.lane.b32.xlu0 %v319_v15, %s756_s5 }
  0x18   : > { %v833_v25 = vld [vmem:[#allocation2 + $0x8] sm:$0xff] }
  0x19   : > { %372 = vrot.lane.b32.xlu1 %v369_v17, %s757_s8  ;;  %370 = vrot.lane.b32.xlu0 %v365_v18, %s757_s8 }
  0x1a   : > { %v835_v26 = vld [vmem:[#allocation2 + $0x10] sm:$0xff] }
  0x1b   : > { %v707_v27 = vpack.i.bf16 %v835_v26, %v833_v25  ;;  %v727_v59 = vpack.i.bf16 %v753_v1, %v835_v26 }
  0x1d   : > { %412 = vrot.lane.b32.xlu1 %v409_v20, %s758_s11  ;;  %410 = vrot.lane.b32.xlu0 %v405_v21, %s758_s11 }
  0x21   : > { %471 = vrot.lane.b32.xlu1 %v468_v23, %s759_s12  ;;  %469 = vrot.lane.b32.xlu0 %v464_v24, %s759_s12 }
  0x25   : > { %708 = vrot.lane.b32.xlu1 %v707_v27, %s760_s13 }
  0x29   : > { %255 = vrot.lane.b32.xlu1 %v753_v1, %s760_s13 }
  0x7f   : > { %v283_v28 = vpop.permute.xlu1 %282  ;;  %v222_v29 = vpop.permute.xlu0 %221 }
  0x80   : > { %v230_v30 = vmul.f32 0.0, %v222_v29  ;;  %v291_v31 = vmul.f32 0.0, %v283_v28 }
  0x82   : > { %236 = vrot.lane.b32.xlu0 %v230_v30, %s759_s12 }
  0x83   : > { %v285_v32 = vpop.permute.xlu1 %284  ;;  %v224_v33 = vpop.permute.xlu0 %223 }
  0x84   : > { %v226_v34 = vsel %vm225_vm0, %v222_v29, %v224_v33  ;;  %v232_v35 = vmul.f32 %v835_v26, %v224_v33  ;;  %v287_v36 = vsel %vm286_vm1, %v283_v28, %v285_v32  ;;  %v293_v38 = vmul.f32 %v285_v32, %v835_v26 }
  0x85   : > { %v231_v37 = vmul.f32 %v833_v25, %v226_v34  ;;  %v292_v42 = vmul.f32 %v287_v36, %v833_v25 }
  0x86   : > { %297 = vrot.lane.b32.xlu0 %v291_v31, %s758_s11 }
  0x87   : > { %v712_v39 = vpack.i.bf16 %v232_v35, %v231_v37  ;;  %v327_v40 = vpop.permute.xlu1 %326  ;;  %v325_v41 = vpop.permute.xlu0 %324  ;;  %v717_v50 = vpack.i.bf16 %v293_v38, %v292_v42 }
  0x88   : > { %v335_v43 = vmul.f32 %v327_v40, %v835_v26  ;;  %v329_v44 = vsel %vm328_vm2, %v325_v41, %v327_v40  ;;  %v333_v45 = vmul.f32 0.0, %v325_v41 }
  0x89   : > { %v334_v46 = vmul.f32 %v329_v44, %v833_v25 }
  0x8a   : > { %339 = vrot.lane.b32.xlu1 %v333_v45, %s757_s8  ;;  %713 = vrot.lane.b32.xlu0 %v712_v39, %s759_s12 }
  0x8b   : > { %v373_v47 = vpop.permute.xlu1 %372  ;;  %v371_v48 = vpop.permute.xlu0 %370  ;;  %v722_v49 = vpack.i.bf16 %v335_v43, %v334_v46 }
  0x8c   : > { %v374_v51 = vsel %vm345_vm3, %v371_v48, %v373_v47  ;;  %v380_v54 = vmul.f32 0.0, %v373_v47  ;;  %v378_v55 = vmul.f32 %v371_v48, %v833_v25 }
  0x8d   : > { %v379_v56 = vmul.f32 %v374_v51, %v835_v26 }
  0x8e   : > { %723 = vrot.lane.b32.xlu1 %v722_v49, %s757_s8  ;;  %718 = vrot.lane.b32.xlu0 %v717_v50, %s758_s11 }
  0x8f   : > { %v413_v52 = vpop.permute.xlu1 %412  ;;  %v411_v53 = vpop.permute.xlu0 %410  ;;  %v732_v62 = vpack.i.bf16 %v380_v54, %v379_v56 }
  0x90   : > { %v418_v57 = vmul.f32 %v411_v53, %v833_v25  ;;  %v414_v58 = vsel %vm303_vm4, %v411_v53, %v413_v52  ;;  %v420_v60 = vmul.f32 0.0, %v413_v52 }
  0x91   : > { %v419_v61 = vmul.f32 %v414_v58, %v835_v26 }
  0x92   : > { %384 = vrot.lane.b32.xlu1 %v378_v55, %s756_s5  ;;  %424 = vrot.lane.b32.xlu0 %v418_v57, %s754_s21 }
  0x93   : > { %v472_v63 = vpop.permute.xlu1 %471  ;;  %v470_v0 = vpop.permute.xlu0 %469  ;;  %v737_v3 = vpack.i.bf16 %v420_v60, %v419_v61 }
  0x94   : > { %v473_v2 = vsel %vm242_vm5, %v470_v0, %v472_v63  ;;  %v479_v5 = vmul.f32 0.0, %v472_v63  ;;  %v477_v7 = vmul.f32 %v470_v0, %v833_v25  ;;  %v495_v63 = vld [vmem:[%s905_s2] sm:$0xff] }
  0x95   : > { %v478_v1 = vmul.f32 %v473_v2, %v835_v26 }
  0x96   : > { %728 = vrot.lane.b32.xlu1 %v727_v59, %s761_s14  ;;  %733 = vrot.lane.b32.xlu0 %v732_v62, %s756_s5 }
  0x97   : > { %v709_v8 = vpop.permute.xlu1 %708 }
  0x98   : > { %v711_v12 = vunpack.i.h.bf16 %v709_v8  ;;  %v710_v13 = vunpack.i.l.bf16 %v709_v8 }
  0x9a   : > { %442 = vrot.lane.b32.xlu1 %v833_v25, %s761_s14  ;;  %738 = vrot.lane.b32.xlu0 %v737_v3, %s754_s21  ;;  %v263_v20 = vsel %vm261_vm6, %v710_v13, %v711_v12  ;;  %s672_s21 = sshll.u32 %s909_s16, 4 }
  0x9b   : > { %v256_v10 = vpop.permute.xlu1 %255  ;;  %s197_s24 = scalar_lea.vmem %s907_s4, %s672_s21 }
  0x9c   : > { %v262_v18 = vsel %vm261_vm6, %v256_v10, %v710_v13 }
  0x9e   : > { %487 = vrot.lane.b32.xlu1 %v479_v5, %s755_s22  ;;  %485 = vrot.lane.b32.xlu0 %v478_v1, %s755_s22 }
  0xa2   : > { %483 = vrot.lane.b32.xlu0 %v477_v7, %s755_s22  ;;  %517 = vperm.xlu1 %742, %v514_v6  }
  0xf4   : > { %v237_v9 = vpop.permute.xlu0 %236 }
  0xf8   : > { %v298_v11 = vpop.permute.xlu0 %297 }
  0xfc   : > { %v340_v14 = vpop.permute.xlu1 %339  ;;  %v714_v15 = vpop.permute.xlu0 %713 }
  0xfd   : > { %v716_v16 = vunpack.i.h.bf16 %v714_v15  ;;  %v715_v17 = vunpack.i.l.bf16 %v714_v15 }
  0xff   : > { %v244_v19 = vsel %vm242_vm5, %v715_v17, %v716_v16  ;;  %v243_v21 = vsel %vm242_vm5, %v237_v9, %v715_v17 }
 0x100   : > { %v724_v22 = vpop.permute.xlu1 %723  ;;  %v719_v23 = vpop.permute.xlu0 %718  ;;  %v673_v24 = vpack.c.bf16 %v263_v20, %v244_v19  ;;  %v675_v27 = vpack.c.bf16 %v262_v18, %v243_v21 }
 0x101   : > { %v726_v28 = vunpack.i.h.bf16 %v724_v22  ;;  %v725_v29 = vunpack.i.l.bf16 %v724_v22  ;;  %v721_v30 = vunpack.i.h.bf16 %v719_v23  ;;  %v720_v31 = vunpack.i.l.bf16 %v719_v23 }
 0x102   : > { %674 = vmatprep.subr.bf16.mxu0 %v673_v24 }
 0x103   : > { %676 = vmatpush1.bf16.msra.mxu0 %v675_v27  ;;  %v305_v32 = vsel %vm303_vm4, %v720_v31, %v721_v30  ;;  %v347_v33 = vsel %vm345_vm3, %v725_v29, %v726_v28  ;;  %v304_v34 = vsel %vm303_vm4, %v298_v11, %v720_v31  ;;  %v346_v35 = vsel %vm345_vm3, %v340_v14, %v725_v29 }
 0x104   : > { %v385_v36 = vpop.permute.xlu1 %384  ;;  %v425_v37 = vpop.permute.xlu0 %424  ;;  %v677_v38 = vpack.c.bf16 %v347_v33, %v305_v32  ;;  %v679_v39 = vpack.c.bf16 %v346_v35, %v304_v34 }
 0x106   : > { %678 = vmatprep.subr.bf16.mxu0 %v677_v38 }
 0x107   : > { %680 = vmatpush1.bf16.msra.mxu0 %v679_v39 }
 0x108   : > { %v729_v40 = vpop.permute.xlu1 %728  ;;  %v734_v41 = vpop.permute.xlu0 %733 }
 0x109   : > { %v731_v42 = vunpack.i.h.bf16 %v729_v40  ;;  %v730_v43 = vunpack.i.l.bf16 %v729_v40  ;;  %v736_v44 = vunpack.i.h.bf16 %v734_v41  ;;  %v735_v45 = vunpack.i.l.bf16 %v734_v41 }
 0x10b   : > { %v391_v46 = vsel %vm328_vm2, %v735_v45, %v736_v44  ;;  %v390_v47 = vsel %vm328_vm2, %v385_v36, %v735_v45  ;;  %v450_v55 = vsel %vm448_vm7, %v730_v43, %v731_v42 }
 0x10c   : > { %v443_v48 = vpop.permute.xlu1 %442  ;;  %v739_v49 = vpop.permute.xlu0 %738  ;;  %v681_v50 = vpack.c.bf16 %v391_v46, %v835_v26  ;;  %v683_v51 = vpack.c.bf16 %v390_v47, %v833_v25 }
 0x10d   : > { %v449_v52 = vsel %vm448_vm7, %v443_v48, %v730_v43  ;;  %v741_v53 = vunpack.i.h.bf16 %v739_v49  ;;  %v740_v54 = vunpack.i.l.bf16 %v739_v49 }
 0x10e   : > { %682 = vmatprep.subr.bf16.mxu0 %v681_v50 }
 0x10f   : > { %684 = vmatpush1.bf16.msra.mxu0 %v683_v51  ;;  %v431_v56 = vsel %vm286_vm1, %v740_v54, %v741_v53  ;;  %v430_v57 = vsel %vm286_vm1, %v425_v37, %v740_v54 }
 0x110   : > { %v488_v58 = vpop.permute.xlu1 %487  ;;  %v486_v59 = vpop.permute.xlu0 %485  ;;  %v685_v60 = vpack.c.bf16 %v450_v55, %v431_v56  ;;  %v687_v61 = vpack.c.bf16 %v449_v52, %v430_v57 }
 0x111   : > { %v490_v26 = vsel %vm225_vm0, %v486_v59, %v488_v58 }
 0x112   : > { %686 = vmatprep.subr.bf16.mxu0 %v685_v60 }
 0x113   : > { %688 = vmatpush1.bf16.msra.mxu0 %v687_v61 }
 0x114   : > { %v484_v25 = vpop.permute.xlu0 %483  ;;  %540 = vmatprep.subr.mxu0 %v490_v26 }
 0x115   : > { %v489_v62 = vsel %vm225_vm0, %v484_v25, %v486_v59 }
 0x117   : > { %541 = vmatpush1.msra.mxu0 %v489_v62 }
 0x118   : > { %668 = vmatmul.mubr.msk.f32.vlgmr.msra.gmra.mrb[0].mxu0 %vm520_vm8, %v495_v63 }
 0x121   : > { %v518_v0 = vpop.permute.xlu1 %517 }
 0x1eb   : > { %v590_v2 = vpop.f32.mrb[0].mxu0 }
 0x1ec   : > { %v591_v3 = vadd.f32 %v590_v2, %v518_v0  ;;  %v592_v4 = vpop.f32.mrb[1].mxu0 }
 0x1ed   : > { %v593_v5 = vadd.f32 %v592_v4, %v518_v0 }
 0x1ee   : > { %v595_v1 = vmax.f32 %v591_v3, 0.0 }
 0x1ef   : > { %v596_v6 = vmax.f32 %v593_v5, 0.0 }
 0x1f0   : > { %597 = vst [vmem:[%s197_s24] sm:$0xff] %v595_v1 }
 0x1f1   : > { %598 = vst [vmem:[%s197_s24 + $0x8] sm:$0xff] %v596_v6 }
 0x1f2 PF: > { %s14_s15 = sadd.s32 1, %s751_s15  }
 0x1f3   : > { %p11_p4 = scmp.ge.s32.totalorder %s14_s15, 4  }
 0x1f5   :  { %13 = sbr.rel (!%p11_p4) target bundleno = 1 (0x1), region = 71 }

// kernel: densenet_forward.6
= control target key start
LH: loop header
LB: loop body
LE: loop exit
PB: predicated region body
PF: predicated region fallthrough
CT: control target
= control target key end

     0   :  { %s1687_s13 = smov 0   ;;  %s1957_s0 = inlined_call_operand.vmem [shape: f32[2,16,256], index: 0, kind: input, shape index: {}]   ;;  %s1958_s1 = inlined_call_operand.vmem [shape: f32[6,256], index: 1, kind: input, shape index: {}]   ;;  %s1959_s2 = inlined_call_operand.vmem [shape: f32[8,16], index: 2, kind: input, shape index: {}]   ;;  %s1960_s3 = inlined_call_operand.vmem [shape: f32[8,1], index: 3, kind: input, shape index: {}]   ;;  %s1961_s4 = inlined_call_operand.vmem [shape: f32[4,72], index: 4, kind: input, shape index: {}]   ;;  %s1962_s5 = inlined_call_operand.vmem [shape: f32[4,1], index: 5, kind: input, shape index: {}]   ;;  %s1963_s6 = inlined_call_operand.vmem [shape: f32[8,20], index: 6, kind: input, shape index: {}]   ;;  %s1964_s7 = inlined_call_operand.vmem [shape: f32[8,1], index: 7, kind: input, shape index: {}]   ;;  %s1965_s8 = inlined_call_operand.vmem [shape: f32[4,72], index: 8, kind: input, shape index: {}]   ;;  %s1966_s9 = inlined_call_operand.vmem [shape: f32[4,1], index: 9, kind: input, shape index: {}]   ;;  %s1967_s10 = inlined_call_operand.vmem [shape: f32[2,24,256], index: 10, kind: output, shape index: {}]  }
   0x1 LB: > { %s1448_s14 = sadd.s32 4294967295, %s1620_s13   ;;  %p1452_p0 = scmp.ge.s32.totalorder %s1620_s13, 1  ;;  %s1620_s13 = sphi %s1687_s13, %s20_s13  }
   0x2   : > { %p312_p1 = scmp.lt.s32.totalorder %s1620_s13, 3 }
   0x4   : > { %p313_p2 = pnand %p1452_p0, %p312_p1 }
   0x5   : > { %p350_p3 = scmp.lt.s32.totalorder (!%p313_p2), %s1448_s14, 1  ;;  %v379_v0 = vld [vmem:[%s1960_s3] sm:$0xff] (!%p313_p2)  ;;  %v1622_v1 = vmov (!%p313_p2), 0.0   ;;  %v1623_v2 = vmov (!%p313_p2), 0   ;;  %vm385_vm0 = vcmask (!%p313_p2), 130048   ;;  %v491_v14 = vlaneseq (!%p313_p2)  ;;  %s1624_s29 = smov (!%p313_p2), 111  }
   0x6   : > { %316 = sbr.rel (%p313_p2) target bundleno = 1862 (0x746), region = 60  ;;  %453 = vmatprep.mubr.f32.mxu1 (!%p313_p2), %v1622_v1  ;;  %1534 = vset.pattern.permute.xlu0 (!%p313_p2), %v1623_v2  ;;  %v378_v13 = vld [vmem:[%s1959_s2] sm:$0xff] (!%p313_p2)  ;;  %s1625_s12 = smov (!%p313_p2), 127   ;;  %vm503_vm1 = vcmask (!%p313_p2), 908288   ;;  %vm563_vm2 = vcmask (!%p313_p2), 924672   ;;  %vm622_vm3 = vcmask (!%p313_p2), 7168  }
   0x7   : > { %382 = vperm.xlu0 (!%p313_p2), %1534, %v379_v0   ;;  %968 = vmatprep.mubr.f32.mxu0 (!%p313_p2), %v1622_v1  ;;  %v492_v15 = vshrl.u32 (!%p313_p2), %v491_v14, 7  ;;  %v489_v16 = vld [vmem:[%s1958_s1] ss:$8 sm:$0x3] (!%p313_p2)  ;;  %s1626_s16 = smov (!%p313_p2), 17   ;;  %s1627_s19 = smov (!%p313_p2), 113  }
   0x8   : > { %1570 = vset.pattern.permute.xlu1 (!%p313_p2), %v1623_v2  ;;  %v1458_v26 = vld [vmem:[%s1958_s1 + $0x2] ss:$8 sm:$0x3] (!%p313_p2)  ;;  %v1461_v28 = vld [vmem:[%s1958_s1 + $0x5] ss:$8 sm:$0x3] (!%p313_p2) }
   0x9   : > { %v1720_v17 = vsub.s32 (!%p313_p2), 0, %v492_v15  ;;  %v1724_v25 = vsub.s32 (!%p313_p2), 1, %v492_v15  ;;  %v1457_v38 = vld [vmem:[%s1958_s1 + $0x1] ss:$8 sm:$0x3] (!%p313_p2)  ;;  %s1628_s22 = smov (!%p313_p2), 1  }
   0xa   : > { %v1459_v42 = vld [vmem:[%s1958_s1 + $0x3] ss:$8 sm:$0x3] (!%p313_p2)  ;;  %v1460_v45 = vld [vmem:[%s1958_s1 + $0x4] ss:$8 sm:$0x3] (!%p313_p2) }
   0xb   : > { %v494_v18 = vrot.slane (!%p313_p2), %v489_v16, %v1720_v17  ;;  %v600_v27 = vrot.slane (!%p313_p2), %v1458_v26, %v1724_v25  ;;  %v745_v29 = vrot.slane (!%p313_p2), %v1461_v28, %v1724_v25  ;;  %v498_v37 = vrot.slane (!%p313_p2), %v489_v16, %v1724_v25  ;;  %s1629_s26 = smov (!%p313_p2), 15   ;;  %s1630_s27 = smov (!%p313_p2), 16  }
   0xc   : > { %v554_v39 = vrot.slane (!%p313_p2), %v1457_v38, %v1720_v17  ;;  %v558_v40 = vrot.slane (!%p313_p2), %v1457_v38, %v1724_v25  ;;  %v596_v41 = vrot.slane (!%p313_p2), %v1458_v26, %v1720_v17  ;;  %v642_v43 = vrot.slane (!%p313_p2), %v1459_v42, %v1720_v17  ;;  %s1631_s28 = smov (!%p313_p2), 112  }
   0xd   : > { %s1969_s14 = smov (!%p350_p3, %s1448_s14), 1  ;;  %499 = vrot.lane.b32.xlu1 %v494_v18, %s1624_s29  ;;  %v646_v44 = vrot.slane %v1459_v42, %v1724_v25  ;;  %v682_v46 = vrot.slane %v1460_v45, %v1720_v17  ;;  %v686_v47 = vrot.slane %v1460_v45, %v1724_v25  ;;  %v741_v48 = vrot.slane %v1461_v28, %v1720_v17 }
   0xe   : > { %s1474_s17 = sshll.u32 %s1969_s14, 5  ;;  %s1515_s18 = smul.u32 48, %s1969_s14  ;;  %vm605_vm4 = vcmask 1039360   ;;  %vm580_vm5 = vcmask 121856   ;;  %vm520_vm6 = vcmask 138240   ;;  %vm725_vm7 = vcmask 916480  }
   0xf   : > { %s354_s21 = scalar_lea.vmem %s1957_s0, %s1474_s17  ;;  %vm797_vm8 = vcmask 588800   ;;  %vm897_vm9 = vcmask 1043456   ;;  %vm893_vm10 = vcmask 162816  }
  0x10   : > { %s1706_s24 = scalar_lea.vmem %s1967_s10, %s1515_s18  ;;  %v363_v3 = vld [vmem:[%s354_s21 + $0x8] sm:$0xff]  ;;  %v365_v4 = vld [vmem:[%s354_s21 + $0x18] sm:$0xff]  ;;  %v362_v5 = vld [vmem:[%s354_s21] sm:$0xff] }
  0x11   : > { %v375_v6 = vmax.f32 %v363_v3, 0.0  ;;  %v377_v7 = vmax.f32 %v365_v4, 0.0  ;;  %1388 = vst [vmem:[%s1706_s24 + $0x8] sm:$0xff] %v363_v3  ;;  %1390 = vst [vmem:[%s1706_s24 + $0x18] sm:$0xff] %v365_v4  ;;  %v364_v8 = vld [vmem:[%s354_s21 + $0x10] sm:$0xff]  ;;  %v374_v9 = vmax.f32 %v362_v5, 0.0 }
  0x12   : > { %1387 = vst [vmem:[%s1706_s24] sm:$0xff] %v362_v5  ;;  %v376_v10 = vmax.f32 %v364_v8, 0.0  ;;  %1389 = vst [vmem:[%s1706_s24 + $0x10] sm:$0xff] %v364_v8 }
  0x13   : > { %v1475_v11 = vpack.c.bf16 %v377_v7, %v375_v6 }
  0x14   : > { %v1477_v12 = vpack.c.bf16 %v376_v10, %v374_v9 }
  0x15   : > { %1476 = vmatprep.subr.bf16.mxu1 %v1475_v11  ;;  %1496 = vmatprep.subr.bf16.mxu0 %v1475_v11 }
  0x16   : > { %1478 = vmatpush1.bf16.msra.mxu1 %v1477_v12  ;;  %1498 = vmatpush1.bf16.msra.mxu0 %v1477_v12 }
  0x19   : > { %1456 = vmatmul.mubr.msk.f32.vlgmr.msra.gmra.mrb[0].mxu1 %vm385_vm0, %v378_v13 }
  0x1a   : > { %865 = vmatprep.mubr.f32.mxu1 %v1622_v1 }
  0x7f   : > { %v500_v49 = vpop.permute.xlu1 %499 }
  0x80   : > { %v508_v50 = vmul.f32 0.0, %v500_v49 }
  0x86   : > { %v383_v19 = vpop.permute.xlu0 %382 }
  0xec   : > { %v455_v20 = vpop.f32.mrb[0].mxu1 }
  0xed   : > { %v456_v21 = vadd.f32 %v455_v20, %v383_v19  ;;  %v457_v22 = vpop.f32.mrb[1].mxu1 }
  0xee   : > { %v458_v23 = vadd.f32 %v457_v22, %v383_v19 }
  0xf0   : > { %v460_v24 = vadd.f32 %v458_v23, %v456_v21 }
  0xf2   : > { %461 = vadd.xlane.f32.xlu0 %v460_v24 }
 0x108   : > { %603 = vrot.lane.b32.xlu0 %v600_v27, %s1625_s12 }
 0x10c   : > { %748 = vrot.lane.b32.xlu0 %v745_v29, %s1626_s16 }
 0x110   : > { %533 = vrot.lane.b32.xlu0 %v1622_v1, %s1630_s27 }
 0x17f   : > { %v462_v30 = vpop.xlane.xlu0 %461 }
 0x180   : > { %v464_v31 = vmul.f32 0.00390625, %v462_v30 }
 0x182   : > { %v465_v32 = vsub.f32 %v456_v21, %v464_v31  ;;  %v466_v33 = vsub.f32 %v458_v23, %v464_v31 }
 0x183   : > { %v604_v13 = vpop.permute.xlu0 %603 }
 0x184   : > { %v467_v34 = vmul.f32 %v465_v32, %v465_v32  ;;  %v468_v35 = vmul.f32 %v466_v33, %v466_v33 }
 0x186   : > { %v469_v36 = vadd.f32 %v468_v35, %v467_v34 }
 0x187   : > { %v749_v38 = vpop.permute.xlu0 %748 }
 0x188   : > { %470 = vadd.xlane.f32.xlu1 %v469_v36  ;;  %v756_v42 = vmul.f32 0.0, %v749_v38 }
 0x18b   : > { %v534_v45 = vpop.permute.xlu0 %533 }
 0x199   : > { %501 = vrot.lane.b32.xlu1 %v498_v37, %s1624_s29 }
 0x19d   : > { %559 = vrot.lane.b32.xlu1 %v554_v39, %s1627_s19 }
 0x1a1   : > { %561 = vrot.lane.b32.xlu1 %v558_v40, %s1627_s19 }
 0x1a5   : > { %601 = vrot.lane.b32.xlu1 %v596_v41, %s1625_s12 }
 0x1a9   : > { %647 = vrot.lane.b32.xlu1 %v642_v43, %s1628_s22 }
 0x1ad   : > { %649 = vrot.lane.b32.xlu1 %v646_v44, %s1628_s22  ;;  %v791_v44 = vld [vmem:[%s1962_s5] sm:$0xf] }
 0x1b1   : > { %687 = vrot.lane.b32.xlu1 %v682_v46, %s1629_s26 }
 0x1b5   : > { %689 = vrot.lane.b32.xlu1 %v686_v47, %s1629_s26 }
 0x1b9   : > { %746 = vrot.lane.b32.xlu1 %v741_v48, %s1626_s16 }
 0x1bd   : > { %514 = vrot.lane.b32.xlu1 %v508_v50, %s1626_s16 }
 0x215   : > { %v471_v51 = vpop.xlane.xlu1 %470 }
 0x216   : > { %v472_v52 = vmul.f32 0.00390625, %v471_v51 }
 0x218   : > { %v473_v53 = vadd.f32 1e-05, %v472_v52 }
 0x219   : > { %v502_v54 = vpop.permute.xlu1 %501 }
 0x21a   : > { %1606 = vrsqrt.f32 %v473_v53  ;;  %v504_v9 = vsel %vm503_vm1, %v500_v49, %v502_v54 }
 0x21d   : > { %v560_v55 = vpop.permute.xlu1 %559 }
 0x21e   : > { %v568_v56 = vmul.f32 0.0, %v560_v55 }
 0x220   : > { %574 = vrot.lane.b32.xlu1 %v568_v56, %s1629_s26 }
 0x221   : > { %v562_v57 = vpop.permute.xlu1 %561 }
 0x222   : > { %v564_v14 = vsel %vm563_vm2, %v560_v55, %v562_v57 }
 0x224   : > { %v1607_v58 = vpop.eup %1606 }
 0x225   : > { %v475_v59 = vmul.f32 %v1607_v58, %v472_v52  ;;  %v602_v60 = vpop.permute.xlu1 %601 }
 0x226   : > { %v610_v61 = vmul.f32 0.0, %v602_v60  ;;  %v606_v20 = vsel %vm605_vm4, %v602_v60, %v604_v13 }
 0x227   : > { %v476_v62 = vmul.f32 %v1607_v58, %v475_v59 }
 0x228   : > { %616 = vrot.lane.b32.xlu0 %v610_v61, %s1628_s22 }
 0x229   : > { %v477_v63 = vadd.f32 1e-05, %v476_v62  ;;  %v648_v0 = vpop.permute.xlu1 %647 }
 0x22b   : > { %1608 = vrsqrt.f32 %v477_v63 }
 0x22d   : > { %v650_v4 = vpop.permute.xlu1 %649 }
 0x22e   : > { %v651_v19 = vsel %vm622_vm3, %v648_v0, %v650_v4  ;;  %v657_v27 = vmul.f32 0.0, %v650_v4 }
 0x231   : > { %v688_v12 = vpop.permute.xlu1 %687 }
 0x235   : > { %v1609_v2 = vpop.eup %1608  ;;  %v690_v28 = vpop.permute.xlu1 %689 }
 0x236   : > { %v479_v3 = vmul.f32 %v1609_v2, %v1607_v58  ;;  %v691_v29 = vsel %vm580_vm5, %v688_v12, %v690_v28 }
 0x238   : > { %v480_v5 = vmul.f32 %v479_v3, %v465_v32  ;;  %v481_v6 = vmul.f32 %v479_v3, %v466_v33  ;;  %v697_v33 = vmul.f32 0.0, %v690_v28 }
 0x239   : > { %v747_v37 = vpop.permute.xlu1 %746 }
 0x23a   : > { %v1768_v7 = vmax.f32 %v480_v5, 0.0  ;;  %v1770_v8 = vmax.f32 %v481_v6, 0.0  ;;  %v750_v40 = vsel %vm520_vm6, %v747_v37, %v749_v38 }
 0x23c   : > { %v509_v10 = vmul.f32 %v504_v9, %v1768_v7  ;;  %v510_v11 = vmul.f32 %v502_v54, %v1770_v8  ;;  %v569_v16 = vmul.f32 %v564_v14, %v1768_v7  ;;  %v570_v18 = vmul.f32 %v562_v57, %v1770_v8 }
 0x23d   : > { %v611_v21 = vmul.f32 %v606_v20, %v1768_v7  ;;  %v612_v22 = vmul.f32 %v604_v13, %v1770_v8  ;;  %v1535_v23 = vpack.i.bf16 %v1770_v8, %v1768_v7  ;;  %v656_v26 = vmul.f32 %v651_v19, %v1770_v8  ;;  %v515_v46 = vpop.permute.xlu1 %514 }
 0x23e   : > { %v1540_v15 = vpack.i.bf16 %v510_v11, %v509_v10  ;;  %v1545_v24 = vpack.i.bf16 %v570_v18, %v569_v16  ;;  %v696_v32 = vmul.f32 %v691_v29, %v1770_v8  ;;  %v1555_v34 = vpack.i.bf16 %v1622_v1, %v1770_v8 }
 0x23f   : > { %1536 = vrot.lane.b32.xlu0 %v1535_v23, %s1630_s27  ;;  %v1550_v30 = vpack.i.bf16 %v612_v22, %v611_v21  ;;  %v1560_v31 = vpack.i.bf16 %v657_v27, %v656_v26  ;;  %v655_v36 = vmul.f32 %v648_v0, %v1768_v7  ;;  %v695_v39 = vmul.f32 %v688_v12, %v1768_v7 }
 0x240   : > { %1541 = vrot.lane.b32.xlu1 %v1540_v15, %s1626_s16  ;;  %v1565_v35 = vpack.i.bf16 %v697_v33, %v696_v32  ;;  %v755_v41 = vmul.f32 %v750_v40, %v1770_v8  ;;  %v754_v43 = vmul.f32 %v747_v37, %v1768_v7  ;;  %v887_v40 = vld [vmem:[%s1964_s7] sm:$0xff] }
 0x243   : > { %1551 = vrot.lane.b32.xlu0 %v1550_v30, %s1628_s22 }
 0x244   : > { %1546 = vrot.lane.b32.xlu1 %v1545_v24, %s1629_s26 }
 0x247   : > { %1556 = vrot.lane.b32.xlu0 %v1555_v34, %s1631_s28 }
 0x248   : > { %1561 = vrot.lane.b32.xlu1 %v1560_v31, %s1625_s12 }
 0x24b   : > { %661 = vrot.lane.b32.xlu0 %v655_v36, %s1625_s12 }
 0x24c   : > { %1566 = vrot.lane.b32.xlu1 %v1565_v35, %s1627_s19 }
 0x24f   : > { %719 = vrot.lane.b32.xlu0 %v1768_v7, %s1631_s28 }
 0x250   : > { %701 = vrot.lane.b32.xlu1 %v695_v39, %s1627_s19 }
 0x253   : > { %764 = vrot.lane.b32.xlu0 %v756_v42, %s1624_s29 }
 0x254   : > { %762 = vrot.lane.b32.xlu1 %v755_v41, %s1624_s29 }
 0x257   : > { %794 = vperm.xlu0 %1534, %v791_v44  }
 0x258   : > { %760 = vrot.lane.b32.xlu1 %v754_v43, %s1624_s29 }
 0x25c   : > { %890 = vperm.xlu1 %1570, %v887_v40  }
 0x292   : > { %v575_v47 = vpop.permute.xlu1 %574 }
 0x29a   : > { %v617_v48 = vpop.permute.xlu0 %616 }
 0x2b1   : > { %v1537_v52 = vpop.permute.xlu0 %1536 }
 0x2b2   : > { %v1542_v49 = vpop.permute.xlu1 %1541  ;;  %v1539_v53 = vunpack.i.h.bf16 %v1537_v52  ;;  %v1538_v54 = vunpack.i.l.bf16 %v1537_v52 }
 0x2b3   : > { %v1544_v50 = vunpack.i.h.bf16 %v1542_v49  ;;  %v1543_v51 = vunpack.i.l.bf16 %v1542_v49 }
 0x2b4   : > { %v539_v58 = vsel %vm385_vm0, %v534_v45, %v1538_v54  ;;  %v540_v61 = vsel %vm385_vm0, %v1538_v54, %v1539_v53 }
 0x2b5   : > { %v521_v55 = vsel %vm520_vm6, %v515_v46, %v1543_v51  ;;  %v522_v56 = vsel %vm520_vm6, %v1543_v51, %v1544_v50  ;;  %v1552_v63 = vpop.permute.xlu0 %1551  ;;  %v886_v50 = vld [vmem:[%s1963_s6] sm:$0xff] }
 0x2b6   : > { %v1547_v57 = vpop.permute.xlu1 %1546  ;;  %v1481_v62 = vpack.c.bf16 %v539_v58, %v521_v55  ;;  %v1479_v0 = vpack.c.bf16 %v540_v61, %v522_v56  ;;  %v1554_v2 = vunpack.i.h.bf16 %v1552_v63  ;;  %v1553_v3 = vunpack.i.l.bf16 %v1552_v63  ;;  %v1467_v61 = vld [vmem:[%s1958_s1 + $0x2] ss:$8 sm:$0x3]  ;;  %v1468_v63 = vld [vmem:[%s1958_s1 + $0x3] ss:$8 sm:$0x3] }
 0x2b7   : > { %v1549_v59 = vunpack.i.h.bf16 %v1547_v57  ;;  %v1548_v60 = vunpack.i.l.bf16 %v1547_v57  ;;  %v1003_v57 = vld [vmem:[%s1958_s1] ss:$8 sm:$0x3] }
 0x2b8   : > { %1480 = vmatprep.subr.bf16.mxu1 %v1479_v0  ;;  %v623_v9 = vsel %vm622_vm3, %v617_v48, %v1553_v3  ;;  %v624_v12 = vsel %vm622_vm3, %v1553_v3, %v1554_v2  ;;  %v1008_v58 = vrot.slane %v1003_v57, %v1720_v17  ;;  %v1147_v0 = vrot.slane %v1468_v63, %v1720_v17  ;;  %v1469_v2 = vld [vmem:[%s1958_s1 + $0x4] ss:$8 sm:$0x3] }
 0x2b9   : > { %v581_v4 = vsel %vm580_vm5, %v575_v47, %v1548_v60  ;;  %v582_v5 = vsel %vm580_vm5, %v1548_v60, %v1549_v59  ;;  %1482 = vmatpush1.bf16.msra.mxu1 %v1481_v62  ;;  %v1557_v14 = vpop.permute.xlu0 %1556  ;;  %v1466_v59 = vld [vmem:[%s1958_s1 + $0x1] ss:$8 sm:$0x3]  ;;  %v1104_v62 = vrot.slane %v1467_v61, %v1720_v17  ;;  %v1186_v3 = vrot.slane %v1469_v2, %v1720_v17 }
 0x2ba   : > { %v1562_v6 = vpop.permute.xlu1 %1561  ;;  %v1485_v13 = vpack.c.bf16 %v623_v9, %v581_v4  ;;  %v1483_v15 = vpack.c.bf16 %v624_v12, %v582_v5  ;;  %v1559_v16 = vunpack.i.h.bf16 %v1557_v14  ;;  %v1558_v18 = vunpack.i.l.bf16 %v1557_v14  ;;  %v1470_v4 = vld [vmem:[%s1958_s1 + $0x5] ss:$8 sm:$0x3] }
 0x2bb   : > { %v1564_v10 = vunpack.i.h.bf16 %v1562_v6  ;;  %v1563_v11 = vunpack.i.l.bf16 %v1562_v6  ;;  %v1065_v60 = vrot.slane %v1466_v59, %v1720_v17  ;;  %v1243_v5 = vrot.slane %v1470_v4, %v1720_v17 }
 0x2bc   : > { %1484 = vmatprep.subr.bf16.mxu1 %v1483_v15  ;;  %v727_v28 = vsel %vm725_vm7, %v1558_v18, %v1559_v16  ;;  %v1012_v15 = vrot.slane %v1003_v57, %v1724_v25  ;;  %v1069_v16 = vrot.slane %v1466_v59, %v1724_v25  ;;  %v1108_v17 = vrot.slane %v1467_v61, %v1724_v25 }
 0x2bd   : > { %v668_v19 = vsel %vm605_vm4, %v1563_v11, %v1564_v10  ;;  %1486 = vmatpush1.bf16.msra.mxu1 %v1485_v13  ;;  %v662_v24 = vpop.permute.xlu0 %661 }
 0x2be   : > { %v1567_v20 = vpop.permute.xlu1 %1566  ;;  %v1487_v21 = vpack.c.bf16 %v668_v19, %v1770_v8  ;;  %v667_v26 = vsel %vm605_vm4, %v662_v24, %v1563_v11  ;;  %v1190_v19 = vrot.slane %v1469_v2, %v1724_v25 }
 0x2bf   : > { %v1569_v22 = vunpack.i.h.bf16 %v1567_v20  ;;  %v1568_v23 = vunpack.i.l.bf16 %v1567_v20  ;;  %v1489_v29 = vpack.c.bf16 %v667_v26, %v1768_v7  ;;  %v772_v7 = vld [vmem:[%s1961_s4] sm:$0xf]  ;;  %v1247_v20 = vrot.slane %v1470_v4, %v1724_v25 }
 0x2c0   : > { %1488 = vmatprep.subr.bf16.mxu1 %v1487_v21 }
 0x2c1   : > { %v708_v27 = vsel %vm563_vm2, %v1568_v23, %v1569_v22  ;;  %v720_v33 = vpop.permute.xlu0 %719  ;;  %1490 = vmatpush1.bf16.msra.mxu1 %v1489_v29 }
 0x2c2   : > { %v702_v30 = vpop.permute.xlu1 %701  ;;  %v1491_v31 = vpack.c.bf16 %v727_v28, %v708_v27  ;;  %v726_v8 = vsel %vm725_vm7, %v720_v33, %v1558_v18  ;;  %v1151_v18 = vrot.slane %v1468_v63, %v1724_v25 }
 0x2c3   : > { %v707_v32 = vsel %vm563_vm2, %v702_v30, %v1568_v23 }
 0x2c4   : > { %1492 = vmatprep.subr.bf16.mxu1 %v1491_v31  ;;  %v1493_v34 = vpack.c.bf16 %v726_v8, %v707_v32 }
 0x2c5   : > { %v765_v36 = vpop.permute.xlu0 %764 }
 0x2c6   : > { %v763_v35 = vpop.permute.xlu1 %762  ;;  %1494 = vmatpush1.bf16.msra.mxu1 %v1493_v34 }
 0x2c7   : > { %v767_v37 = vsel %vm503_vm1, %v763_v35, %v765_v36 }
 0x2c8   : > { %817 = vmatprep.subr.mxu1 %v767_v37 }
 0x2ca   : > { %v761_v38 = vpop.permute.xlu1 %760 }
 0x2cb   : > { %v766_v39 = vsel %vm503_vm1, %v761_v38, %v763_v35 }
 0x2cc   : > { %818 = vmatpush1.msra.mxu1 %v766_v39 }
 0x2cd   : > { %1462 = vmatmul.mubr.msk.f32.vlgmr.msra.gmra.mrb[2].mxu1 %vm797_vm8, %v772_v7 }
 0x2d6   : > { %v795_v41 = vpop.permute.xlu0 %794 }
 0x2db   : > { %v891_v51 = vpop.permute.xlu1 %890 }
 0x3a0   : > { %v867_v42 = vpop.f32.mrb[2].mxu1 }
 0x3a1   : > { %v868_v43 = vadd.f32 %v867_v42, %v795_v41  ;;  %v869_v44 = vpop.f32.mrb[3].mxu1 }
 0x3a2   : > { %v870_v45 = vadd.f32 %v869_v44, %v795_v41 }
 0x3a3   : > { %872 = vst [vmem:[#allocation2 + $0x20] sm:$0xf] %v868_v43 }
 0x3a4   : > { %873 = vst [vmem:[#allocation2 + $0x28] sm:$0xf] %v870_v45 }
 0x3aa   : > { %v878_v46 = vld [vmem:[#allocation2 + $0x20] sm:$0xf] }
 0x3ab   : > { %v879_v47 = vld [vmem:[#allocation2 + $0x28] sm:$0xf]  ;;  %v884_v49 = vmax.f32 %v878_v46, 0.0 }
 0x3ac   : > { %v885_v48 = vmax.f32 %v879_v47, 0.0 }
 0x3ae   : > { %1463 = vmatprep.subr.msk.mxu0 %vm897_vm9, %v885_v48 }
 0x3af   : > { %1464 = vmatpush1.msk.msra.mxu0 %vm897_vm9, %v884_v49 }
 0x3b0   : > { %1465 = vmatmul.mubr.msk.f32.vlgmr.msra.gmra.mrb[0].mxu0 %vm893_vm10, %v886_v50 }
 0x3b1   : > { %1366 = vmatprep.mubr.f32.mxu0 %v1622_v1 }
 0x483   : > { %v970_v52 = vpop.f32.mrb[0].mxu0 }
 0x484   : > { %v971_v53 = vadd.f32 %v970_v52, %v891_v51  ;;  %v972_v54 = vpop.f32.mrb[1].mxu0 }
 0x485   : > { %v973_v55 = vadd.f32 %v972_v54, %v891_v51 }
 0x487   : > { %v975_v56 = vadd.f32 %v973_v55, %v971_v53 }
 0x489   : > { %976 = vadd.xlane.f32.xlu0 %v975_v56 }
 0x49f   : > { %1013 = vrot.lane.b32.xlu0 %v1008_v58, %s1624_s29 }
 0x4a3   : > { %1070 = vrot.lane.b32.xlu0 %v1065_v60, %s1627_s19 }
 0x4a7   : > { %1109 = vrot.lane.b32.xlu0 %v1104_v62, %s1625_s12 }
 0x4ab   : > { %1152 = vrot.lane.b32.xlu0 %v1147_v0, %s1628_s22 }
 0x4af   : > { %1191 = vrot.lane.b32.xlu0 %v1186_v3, %s1629_s26 }
 0x4b3   : > { %1248 = vrot.lane.b32.xlu0 %v1243_v5, %s1626_s16 }
 0x516   : > { %v977_v6 = vpop.xlane.xlu0 %976 }
 0x517   : > { %v978_v9 = vmul.f32 0.00390625, %v977_v6 }
 0x519   : > { %v979_v10 = vsub.f32 %v971_v53, %v978_v9  ;;  %v980_v11 = vsub.f32 %v973_v55, %v978_v9 }
 0x51a   : > { %v1014_v21 = vpop.permute.xlu0 %1013 }
 0x51b   : > { %v981_v12 = vmul.f32 %v979_v10, %v979_v10  ;;  %v982_v13 = vmul.f32 %v980_v11, %v980_v11  ;;  %v1021_v23 = vmul.f32 0.0, %v1014_v21 }
 0x51d   : > { %v983_v14 = vadd.f32 %v982_v13, %v981_v12  ;;  %1027 = vrot.lane.b32.xlu0 %v1021_v23, %s1626_s16  ;;  %v1293_v12 = vld [vmem:[%s1966_s9] sm:$0xf] }
 0x51e   : > { %v1071_v22 = vpop.permute.xlu0 %1070 }
 0x51f   : > { %984 = vadd.xlane.f32.xlu1 %v983_v14  ;;  %v1078_v26 = vmul.f32 0.0, %v1071_v22 }
 0x521   : > { %1084 = vrot.lane.b32.xlu0 %v1078_v26, %s1629_s26 }
 0x522   : > { %v1110_v24 = vpop.permute.xlu0 %1109 }
 0x523   : > { %v1117_v27 = vmul.f32 0.0, %v1110_v24 }
 0x526   : > { %v1153_v47 = vpop.permute.xlu0 %1152 }
 0x52a   : > { %v1192_v58 = vpop.permute.xlu0 %1191 }
 0x52e   : > { %v1249_v6 = vpop.permute.xlu0 %1248 }
 0x530   : > { %1015 = vrot.lane.b32.xlu1 %v1012_v15, %s1624_s29 }
 0x534   : > { %1072 = vrot.lane.b32.xlu1 %v1069_v16, %s1627_s19 }
 0x538   : > { %1111 = vrot.lane.b32.xlu1 %v1108_v17, %s1625_s12 }
 0x53c   : > { %1154 = vrot.lane.b32.xlu1 %v1151_v18, %s1628_s22 }
 0x540   : > { %1193 = vrot.lane.b32.xlu1 %v1190_v19, %s1629_s26 }
 0x544   : > { %1250 = vrot.lane.b32.xlu1 %v1247_v20, %s1626_s16 }
 0x548   : > { %1045 = vrot.lane.b32.xlu1 %v1622_v1, %s1630_s27 }
 0x54c   : > { %1123 = vrot.lane.b32.xlu1 %v1117_v27, %s1628_s22 }
 0x58f   : > { %v1028_v15 = vpop.permute.xlu0 %1027 }
 0x593   : > { %v1085_v17 = vpop.permute.xlu0 %1084 }
 0x5ac   : > { %v985_v28 = vpop.xlane.xlu1 %984 }
 0x5ad   : > { %v986_v29 = vmul.f32 0.00390625, %v985_v28 }
 0x5af   : > { %v987_v25 = vadd.f32 1e-05, %v986_v29 }
 0x5b0   : > { %v1016_v8 = vpop.permute.xlu1 %1015 }
 0x5b1   : > { %1610 = vrsqrt.f32 %v987_v25  ;;  %v1017_v41 = vsel %vm503_vm1, %v1014_v21, %v1016_v8 }
 0x5b4   : > { %v1073_v34 = vpop.permute.xlu1 %1072 }
 0x5b5   : > { %v1074_v45 = vsel %vm563_vm2, %v1071_v22, %v1073_v34 }
 0x5b8   : > { %v1112_v37 = vpop.permute.xlu1 %1111 }
 0x5b9   : > { %v1113_v44 = vsel %vm605_vm4, %v1110_v24, %v1112_v37 }
 0x5bb   : > { %v1611_v30 = vpop.eup %1610 }
 0x5bc   : > { %v989_v31 = vmul.f32 %v1611_v30, %v986_v29  ;;  %v1155_v46 = vpop.permute.xlu1 %1154 }
 0x5bd   : > { %v1156_v54 = vsel %vm622_vm3, %v1153_v47, %v1155_v46  ;;  %v1162_v55 = vmul.f32 0.0, %v1155_v46 }
 0x5be   : > { %v990_v32 = vmul.f32 %v1611_v30, %v989_v31 }
 0x5c0   : > { %v991_v33 = vadd.f32 1e-05, %v990_v32  ;;  %v1194_v57 = vpop.permute.xlu1 %1193 }
 0x5c1   : > { %v1195_v61 = vsel %vm580_vm5, %v1192_v58, %v1194_v57  ;;  %v1201_v62 = vmul.f32 0.0, %v1194_v57 }
 0x5c2   : > { %1612 = vrsqrt.f32 %v991_v33 }
 0x5c4   : > { %v1251_v5 = vpop.permute.xlu1 %1250 }
 0x5c8   : > { %v1046_v14 = vpop.permute.xlu1 %1045 }
 0x5cc   : > { %v1613_v35 = vpop.eup %1612  ;;  %v1124_v16 = vpop.permute.xlu1 %1123 }
 0x5cd   : > { %v993_v36 = vmul.f32 %v1613_v35, %v1611_v30 }
 0x5cf   : > { %v994_v38 = vmul.f32 %v993_v36, %v979_v10  ;;  %v995_v7 = vmul.f32 %v993_v36, %v980_v11  ;;  %v1252_v10 = vsel %vm520_vm6, %v1249_v6, %v1251_v5  ;;  %v1258_v11 = vmul.f32 0.0, %v1251_v5 }
 0x5d1   : > { %v1887_v39 = vmax.f32 %v994_v38, 0.0  ;;  %v1889_v40 = vmax.f32 %v995_v7, 0.0 }
 0x5d3   : > { %v1023_v42 = vmul.f32 %v1016_v8, %v1889_v40  ;;  %v1022_v43 = vmul.f32 %v1017_v41, %v1887_v39  ;;  %v1080_v48 = vmul.f32 %v1073_v34, %v1889_v40  ;;  %v1079_v49 = vmul.f32 %v1074_v45, %v1887_v39 }
 0x5d4   : > { %v1119_v50 = vmul.f32 %v1112_v37, %v1889_v40  ;;  %v1118_v51 = vmul.f32 %v1113_v44, %v1887_v39  ;;  %v1571_v52 = vpack.i.bf16 %v1889_v40, %v1887_v39  ;;  %v1161_v56 = vmul.f32 %v1156_v54, %v1889_v40 }
 0x5d5   : > { %v1576_v53 = vpack.i.bf16 %v1023_v42, %v1022_v43  ;;  %v1581_v60 = vpack.i.bf16 %v1080_v48, %v1079_v49  ;;  %v1200_v63 = vmul.f32 %v1195_v61, %v1889_v40  ;;  %v1591_v0 = vpack.i.bf16 %v1622_v1, %v1889_v40 }
 0x5d6   : > { %1572 = vrot.lane.b32.xlu1 %v1571_v52, %s1630_s27  ;;  %v1586_v59 = vpack.i.bf16 %v1119_v50, %v1118_v51  ;;  %v1596_v2 = vpack.i.bf16 %v1162_v55, %v1161_v56  ;;  %v1160_v3 = vmul.f32 %v1153_v47, %v1887_v39  ;;  %v1199_v9 = vmul.f32 %v1192_v58, %v1887_v39 }
 0x5d7   : > { %1577 = vrot.lane.b32.xlu0 %v1576_v53, %s1626_s16  ;;  %v1601_v4 = vpack.i.bf16 %v1201_v62, %v1200_v63  ;;  %v1257_v1 = vmul.f32 %v1252_v10, %v1889_v40  ;;  %v1256_v13 = vmul.f32 %v1249_v6, %v1887_v39 }
 0x5da   : > { %1587 = vrot.lane.b32.xlu1 %v1586_v59, %s1628_s22 }
 0x5db   : > { %1582 = vrot.lane.b32.xlu0 %v1581_v60, %s1629_s26 }
 0x5de   : > { %1592 = vrot.lane.b32.xlu1 %v1591_v0, %s1631_s28 }
 0x5df   : > { %1597 = vrot.lane.b32.xlu0 %v1596_v2, %s1625_s12 }
 0x5e2   : > { %1166 = vrot.lane.b32.xlu1 %v1160_v3, %s1625_s12  ;;  %v1274_v3 = vld [vmem:[%s1965_s8] sm:$0xf] }
 0x5e3   : > { %1602 = vrot.lane.b32.xlu0 %v1601_v4, %s1627_s19 }
 0x5e6   : > { %1223 = vrot.lane.b32.xlu1 %v1887_v39, %s1631_s28 }
 0x5e7   : > { %1205 = vrot.lane.b32.xlu0 %v1199_v9, %s1627_s19 }
 0x5ea   : > { %1266 = vrot.lane.b32.xlu1 %v1258_v11, %s1624_s29 }
 0x5eb   : > { %1264 = vrot.lane.b32.xlu0 %v1257_v1, %s1624_s29 }
 0x5ee   : > { %1296 = vperm.xlu1 %1570, %v1293_v12  }
 0x5ef   : > { %1262 = vrot.lane.b32.xlu0 %v1256_v13, %s1624_s29 }
 0x648   : > { %v1573_v18 = vpop.permute.xlu1 %1572 }
 0x649   : > { %v1578_v19 = vpop.permute.xlu0 %1577  ;;  %v1575_v20 = vunpack.i.h.bf16 %v1573_v18  ;;  %v1574_v21 = vunpack.i.l.bf16 %v1573_v18 }
 0x64a   : > { %v1580_v22 = vunpack.i.h.bf16 %v1578_v19  ;;  %v1579_v23 = vunpack.i.l.bf16 %v1578_v19 }
 0x64b   : > { %v1051_v24 = vsel %vm385_vm0, %v1046_v14, %v1574_v21  ;;  %v1052_v28 = vsel %vm385_vm0, %v1574_v21, %v1575_v20 }
 0x64c   : > { %v1033_v26 = vsel %vm520_vm6, %v1028_v15, %v1579_v23  ;;  %v1034_v27 = vsel %vm520_vm6, %v1579_v23, %v1580_v22  ;;  %v1588_v25 = vpop.permute.xlu1 %1587 }
 0x64d   : > { %v1501_v29 = vpack.c.bf16 %v1051_v24, %v1033_v26  ;;  %v1583_v30 = vpop.permute.xlu0 %1582  ;;  %v1499_v31 = vpack.c.bf16 %v1052_v28, %v1034_v27  ;;  %v1590_v32 = vunpack.i.h.bf16 %v1588_v25  ;;  %v1589_v33 = vunpack.i.l.bf16 %v1588_v25 }
 0x64e   : > { %v1585_v8 = vunpack.i.h.bf16 %v1583_v30  ;;  %v1584_v34 = vunpack.i.l.bf16 %v1583_v30 }
 0x64f   : > { %1500 = vmatprep.subr.bf16.mxu0 %v1499_v31  ;;  %v1129_v35 = vsel %vm622_vm3, %v1124_v16, %v1589_v33  ;;  %v1130_v38 = vsel %vm622_vm3, %v1589_v33, %v1590_v32 }
 0x650   : > { %v1090_v36 = vsel %vm580_vm5, %v1085_v17, %v1584_v34  ;;  %1502 = vmatpush1.bf16.msra.mxu0 %v1501_v29  ;;  %v1091_v37 = vsel %vm580_vm5, %v1584_v34, %v1585_v8  ;;  %v1593_v41 = vpop.permute.xlu1 %1592 }
 0x651   : > { %v1505_v7 = vpack.c.bf16 %v1129_v35, %v1090_v36  ;;  %v1598_v42 = vpop.permute.xlu0 %1597  ;;  %v1503_v43 = vpack.c.bf16 %v1130_v38, %v1091_v37  ;;  %v1595_v46 = vunpack.i.h.bf16 %v1593_v41  ;;  %v1594_v47 = vunpack.i.l.bf16 %v1593_v41 }
 0x652   : > { %v1600_v44 = vunpack.i.h.bf16 %v1598_v42  ;;  %v1599_v45 = vunpack.i.l.bf16 %v1598_v42 }
 0x653   : > { %1504 = vmatprep.subr.bf16.mxu0 %v1503_v43  ;;  %v1230_v57 = vsel %vm725_vm7, %v1594_v47, %v1595_v46 }
 0x654   : > { %1506 = vmatpush1.bf16.msra.mxu0 %v1505_v7  ;;  %v1173_v48 = vsel %vm605_vm4, %v1599_v45, %v1600_v44  ;;  %v1167_v49 = vpop.permute.xlu1 %1166 }
 0x655   : > { %v1603_v50 = vpop.permute.xlu0 %1602  ;;  %v1507_v51 = vpack.c.bf16 %v1173_v48, %v1889_v40  ;;  %v1172_v52 = vsel %vm605_vm4, %v1167_v49, %v1599_v45 }
 0x656   : > { %v1605_v53 = vunpack.i.h.bf16 %v1603_v50  ;;  %v1604_v54 = vunpack.i.l.bf16 %v1603_v50  ;;  %v1509_v55 = vpack.c.bf16 %v1172_v52, %v1887_v39 }
 0x657   : > { %1508 = vmatprep.subr.bf16.mxu0 %v1507_v51 }
 0x658   : > { %v1212_v56 = vsel %vm563_vm2, %v1604_v54, %v1605_v53  ;;  %v1224_v58 = vpop.permute.xlu1 %1223  ;;  %1510 = vmatpush1.bf16.msra.mxu0 %v1509_v55 }
 0x659   : > { %v1206_v59 = vpop.permute.xlu0 %1205  ;;  %v1511_v60 = vpack.c.bf16 %v1230_v57, %v1212_v56  ;;  %v1229_v61 = vsel %vm725_vm7, %v1224_v58, %v1594_v47 }
 0x65a   : > { %v1211_v62 = vsel %vm563_vm2, %v1206_v59, %v1604_v54 }
 0x65b   : > { %v1513_v40 = vpack.c.bf16 %v1229_v61, %v1211_v62  ;;  %1512 = vmatprep.subr.bf16.mxu0 %v1511_v60 }
 0x65c   : > { %v1267_v63 = vpop.permute.xlu1 %1266 }
 0x65d   : > { %v1265_v0 = vpop.permute.xlu0 %1264  ;;  %1514 = vmatpush1.bf16.msra.mxu0 %v1513_v40 }
 0x65e   : > { %v1269_v39 = vsel %vm503_vm1, %v1265_v0, %v1267_v63 }
 0x65f   : > { %1318 = vmatprep.subr.mxu0 %v1269_v39 }
 0x661   : > { %v1263_v2 = vpop.permute.xlu0 %1262 }
 0x662   : > { %v1268_v4 = vsel %vm503_vm1, %v1263_v2, %v1265_v0 }
 0x663   : > { %1319 = vmatpush1.msra.mxu0 %v1268_v4 }
 0x664   : > { %1471 = vmatmul.mubr.msk.f32.vlgmr.msra.gmra.mrb[2].mxu0 %vm797_vm8, %v1274_v3 }
 0x66d   : > { %v1297_v5 = vpop.permute.xlu1 %1296 }
 0x737   : > { %v1368_v6 = vpop.f32.mrb[2].mxu0 }
 0x738   : > { %v1369_v9 = vadd.f32 %v1368_v6, %v1297_v5  ;;  %v1370_v10 = vpop.f32.mrb[3].mxu0 }
 0x739   : > { %v1371_v11 = vadd.f32 %v1370_v10, %v1297_v5 }
 0x73a   : > { %v1375_v1 = vrot.slane %v1369_v9, 4 }
 0x73b   : > { %v1376_v12 = vrot.slane %v1371_v11, 4 }
 0x73c   : > { %1379 = vst [vmem:[#allocation2 + $0x20] sm:$0xf0] %v1375_v1 }
 0x73d   : > { %1380 = vst [vmem:[#allocation2 + $0x28] sm:$0xf0] %v1376_v12 }
 0x743   : > { %v1385_v13 = vld [vmem:[#allocation2 + $0x20] sm:$0xff] }
 0x744   : > { %1391 = vst [vmem:[%s1706_s24 + $0x20] sm:$0xff] %v1385_v13  ;;  %v1386_v14 = vld [vmem:[#allocation2 + $0x28] sm:$0xff] }
 0x745   : > { %1392 = vst [vmem:[%s1706_s24 + $0x28] sm:$0xff] %v1386_v14 }
 0x746 PF: > { %s20_s13 = sadd.s32 1, %s1620_s13  }
 0x747   : > { %p17_p4 = scmp.ge.s32.totalorder %s20_s13, 4  }
 0x749   :  { %19 = sbr.rel (!%p17_p4) target bundleno = 1 (0x1), region = 95 }

// kernel: densenet_forward.5
= control target key start
LH: loop header
LB: loop body
LE: loop exit
PB: predicated region body
PF: predicated region fallthrough
CT: control target
= control target key end

     0   :  { %s1673_s13 = smov 0   ;;  %s1956_s0 = inlined_call_operand.vmem [shape: f32[2,8,256], index: 0, kind: input, shape index: {}]   ;;  %s1957_s1 = inlined_call_operand.vmem [shape: f32[6,256], index: 1, kind: input, shape index: {}]   ;;  %s1958_s2 = inlined_call_operand.vmem [shape: f32[8,8], index: 2, kind: input, shape index: {}]   ;;  %s1959_s3 = inlined_call_operand.vmem [shape: f32[8,1], index: 3, kind: input, shape index: {}]   ;;  %s1960_s4 = inlined_call_operand.vmem [shape: f32[4,72], index: 4, kind: input, shape index: {}]   ;;  %s1961_s5 = inlined_call_operand.vmem [shape: f32[4,1], index: 5, kind: input, shape index: {}]   ;;  %s1962_s6 = inlined_call_operand.vmem [shape: f32[8,12], index: 6, kind: input, shape index: {}]   ;;  %s1963_s7 = inlined_call_operand.vmem [shape: f32[8,1], index: 7, kind: input, shape index: {}]   ;;  %s1964_s8 = inlined_call_operand.vmem [shape: f32[4,72], index: 8, kind: input, shape index: {}]   ;;  %s1965_s9 = inlined_call_operand.vmem [shape: f32[4,1], index: 9, kind: input, shape index: {}]   ;;  %s1966_s10 = inlined_call_operand.vmem [shape: f32[2,16,256], index: 10, kind: output, shape index: {}]  }
   0x1 LB: > { %s1433_s14 = sadd.s32 4294967295, %s1605_s13   ;;  %p1437_p0 = scmp.ge.s32.totalorder %s1605_s13, 1  ;;  %s1605_s13 = sphi %s1673_s13, %s20_s13  }
   0x2   : > { %p312_p1 = scmp.lt.s32.totalorder %s1605_s13, 3 }
   0x4   : > { %p313_p2 = pnand %p1437_p0, %p312_p1 }
   0x5   : > { %p350_p3 = scmp.lt.s32.totalorder (!%p313_p2), %s1433_s14, 1  ;;  %v371_v0 = vld [vmem:[%s1959_s3] sm:$0xff] (!%p313_p2)  ;;  %v1607_v1 = vmov (!%p313_p2), 0.0   ;;  %v1608_v2 = vmov (!%p313_p2), 0   ;;  %vm377_vm0 = vcmask (!%p313_p2), 64512   ;;  %v483_v8 = vlaneseq (!%p313_p2)  ;;  %s1609_s29 = smov (!%p313_p2), 111  }
   0x6   : > { %316 = sbr.rel (%p313_p2) target bundleno = 1862 (0x746), region = 60  ;;  %445 = vmatprep.mubr.f32.mxu1 (!%p313_p2), %v1607_v1  ;;  %1519 = vset.pattern.permute.xlu0 (!%p313_p2), %v1608_v2  ;;  %v370_v7 = vld [vmem:[%s1958_s2] sm:$0xff] (!%p313_p2)  ;;  %s1610_s12 = smov (!%p313_p2), 127   ;;  %vm495_vm1 = vcmask (!%p313_p2), 908288   ;;  %vm556_vm2 = vcmask (!%p313_p2), 924672   ;;  %vm615_vm3 = vcmask (!%p313_p2), 7168  }
   0x7   : > { %374 = vperm.xlu0 (!%p313_p2), %1519, %v371_v0   ;;  %957 = vmatprep.mubr.f32.mxu0 (!%p313_p2), %v1607_v1  ;;  %v484_v9 = vshrl.u32 (!%p313_p2), %v483_v8, 7  ;;  %v481_v10 = vld [vmem:[%s1957_s1] ss:$8 sm:$0x3] (!%p313_p2)  ;;  %s1611_s16 = smov (!%p313_p2), 17   ;;  %s1612_s19 = smov (!%p313_p2), 113  }
   0x8   : > { %1555 = vset.pattern.permute.xlu1 (!%p313_p2), %v1608_v2  ;;  %v1444_v20 = vld [vmem:[%s1957_s1 + $0x2] ss:$8 sm:$0x3] (!%p313_p2)  ;;  %v1447_v22 = vld [vmem:[%s1957_s1 + $0x5] ss:$8 sm:$0x3] (!%p313_p2) }
   0x9   : > { %v1715_v11 = vsub.s32 (!%p313_p2), 0, %v484_v9  ;;  %v1719_v19 = vsub.s32 (!%p313_p2), 1, %v484_v9  ;;  %v1443_v32 = vld [vmem:[%s1957_s1 + $0x1] ss:$8 sm:$0x3] (!%p313_p2)  ;;  %s1613_s22 = smov (!%p313_p2), 1  }
   0xa   : > { %v1445_v36 = vld [vmem:[%s1957_s1 + $0x3] ss:$8 sm:$0x3] (!%p313_p2)  ;;  %v1446_v39 = vld [vmem:[%s1957_s1 + $0x4] ss:$8 sm:$0x3] (!%p313_p2) }
   0xb   : > { %v486_v12 = vrot.slane (!%p313_p2), %v481_v10, %v1715_v11  ;;  %v593_v21 = vrot.slane (!%p313_p2), %v1444_v20, %v1719_v19  ;;  %v738_v23 = vrot.slane (!%p313_p2), %v1447_v22, %v1719_v19  ;;  %v490_v31 = vrot.slane (!%p313_p2), %v481_v10, %v1719_v19  ;;  %s1614_s26 = smov (!%p313_p2), 15   ;;  %s1615_s27 = smov (!%p313_p2), 16  }
   0xc   : > { %v547_v33 = vrot.slane (!%p313_p2), %v1443_v32, %v1715_v11  ;;  %v551_v34 = vrot.slane (!%p313_p2), %v1443_v32, %v1719_v19  ;;  %v589_v35 = vrot.slane (!%p313_p2), %v1444_v20, %v1715_v11  ;;  %v635_v37 = vrot.slane (!%p313_p2), %v1445_v36, %v1715_v11  ;;  %s1616_s28 = smov (!%p313_p2), 112  }
   0xd   : > { %s1968_s14 = smov (!%p350_p3, %s1433_s14), 1  ;;  %491 = vrot.lane.b32.xlu1 %v486_v12, %s1609_s29  ;;  %v639_v38 = vrot.slane %v1445_v36, %v1719_v19  ;;  %v675_v40 = vrot.slane %v1446_v39, %v1715_v11  ;;  %v679_v41 = vrot.slane %v1446_v39, %v1719_v19  ;;  %v734_v42 = vrot.slane %v1447_v22, %v1715_v11 }
   0xe   : > { %s1460_s17 = sshll.u32 %s1968_s14, 4  ;;  %s1461_s18 = sshll.u32 %s1968_s14, 5  ;;  %vm598_vm4 = vcmask 1039360   ;;  %vm573_vm5 = vcmask 121856   ;;  %vm512_vm6 = vcmask 138240   ;;  %vm531_vm7 = vcmask 130048  }
   0xf   : > { %s354_s21 = scalar_lea.vmem %s1956_s0, %s1460_s17  ;;  %s1692_s24 = scalar_lea.vmem %s1966_s10, %s1461_s18  ;;  %vm718_vm8 = vcmask 916480   ;;  %vm790_vm9 = vcmask 588800   ;;  %vm886_vm10 = vcmask 1043456   ;;  %vm1617_vm11 = vmmov 1  }
  0x10   : > { %v1694_v3 = vld [vmem:[%s354_s21 + $0x8] sm:$0xff]  ;;  %v1696_v4 = vld [vmem:[%s354_s21] sm:$0xff]  ;;  %vm1479_vm12 = vmpackc.low %vm886_vm10, %vm1617_vm11  ;;  %vm882_vm13 = vcmask 97280  }
  0x11   : > { %v369_v5 = vmax.f32 %v1694_v3, 0.0  ;;  %1375 = vst [vmem:[%s1692_s24 + $0x8] sm:$0xff] %v1694_v3  ;;  %v368_v6 = vmax.f32 %v1696_v4, 0.0  ;;  %1374 = vst [vmem:[%s1692_s24] sm:$0xff] %v1696_v4  ;;  %v992_v4 = vld [vmem:[%s1957_s1] ss:$8 sm:$0x3] }
  0x13   : > { %381 = vmatprep.subr.mxu1 %v369_v5 }
  0x14   : > { %382 = vmatpush1.msra.mxu1 %v368_v6 }
  0x15   : > { %1442 = vmatmul.mubr.msk.f32.vlgmr.msra.gmra.mrb[0].mxu1 %vm377_vm0, %v370_v7 }
  0x16   : > { %858 = vmatprep.mubr.f32.mxu1 %v1607_v1 }
  0x7f   : > { %v492_v43 = vpop.permute.xlu1 %491 }
  0x80   : > { %v500_v44 = vmul.f32 0.0, %v492_v43 }
  0x86   : > { %v375_v13 = vpop.permute.xlu0 %374 }
  0xe8   : > { %v447_v14 = vpop.f32.mrb[0].mxu1 }
  0xe9   : > { %v448_v15 = vadd.f32 %v447_v14, %v375_v13  ;;  %v449_v16 = vpop.f32.mrb[1].mxu1 }
  0xea   : > { %v450_v17 = vadd.f32 %v449_v16, %v375_v13 }
  0xec   : > { %v452_v18 = vadd.f32 %v450_v17, %v448_v15 }
  0xee   : > { %453 = vadd.xlane.f32.xlu0 %v452_v18 }
 0x104   : > { %596 = vrot.lane.b32.xlu0 %v593_v21, %s1610_s12 }
 0x108   : > { %741 = vrot.lane.b32.xlu0 %v738_v23, %s1611_s16 }
 0x10c   : > { %525 = vrot.lane.b32.xlu0 %v1607_v1, %s1615_s27 }
 0x17b   : > { %v454_v24 = vpop.xlane.xlu0 %453 }
 0x17c   : > { %v456_v25 = vmul.f32 0.00390625, %v454_v24 }
 0x17e   : > { %v457_v26 = vsub.f32 %v448_v15, %v456_v25  ;;  %v458_v27 = vsub.f32 %v450_v17, %v456_v25 }
 0x17f   : > { %v597_v12 = vpop.permute.xlu0 %596 }
 0x180   : > { %v459_v28 = vmul.f32 %v457_v26, %v457_v26  ;;  %v460_v29 = vmul.f32 %v458_v27, %v458_v27 }
 0x182   : > { %v461_v30 = vadd.f32 %v460_v29, %v459_v28 }
 0x183   : > { %v742_v36 = vpop.permute.xlu0 %741 }
 0x184   : > { %462 = vadd.xlane.f32.xlu1 %v461_v30 }
 0x195   : > { %493 = vrot.lane.b32.xlu1 %v490_v31, %s1609_s29 }
 0x199   : > { %552 = vrot.lane.b32.xlu1 %v547_v33, %s1612_s19 }
 0x19d   : > { %554 = vrot.lane.b32.xlu1 %v551_v34, %s1612_s19 }
 0x1a1   : > { %594 = vrot.lane.b32.xlu1 %v589_v35, %s1610_s12 }
 0x1a5   : > { %640 = vrot.lane.b32.xlu1 %v635_v37, %s1613_s22 }
 0x1a9   : > { %642 = vrot.lane.b32.xlu1 %v639_v38, %s1613_s22 }
 0x1ad   : > { %680 = vrot.lane.b32.xlu1 %v675_v40, %s1614_s26  ;;  %v749_v40 = vmul.f32 0.0, %v742_v36 }
 0x1b1   : > { %682 = vrot.lane.b32.xlu1 %v679_v41, %s1614_s26 }
 0x1b5   : > { %739 = vrot.lane.b32.xlu1 %v734_v42, %s1611_s16  ;;  %v784_v42 = vld [vmem:[%s1961_s5] sm:$0xf] }
 0x1b9   : > { %506 = vrot.lane.b32.xlu1 %v500_v44, %s1611_s16 }
 0x211   : > { %v463_v45 = vpop.xlane.xlu1 %462 }
 0x212   : > { %v464_v46 = vmul.f32 0.00390625, %v463_v45 }
 0x214   : > { %v465_v47 = vadd.f32 1e-05, %v464_v46 }
 0x215   : > { %v494_v48 = vpop.permute.xlu1 %493 }
 0x216   : > { %1591 = vrsqrt.f32 %v465_v47  ;;  %v496_v7 = vsel %vm495_vm1, %v492_v43, %v494_v48  ;;  %v526_v43 = vpop.permute.xlu0 %525 }
 0x219   : > { %v553_v49 = vpop.permute.xlu1 %552 }
 0x21a   : > { %v561_v50 = vmul.f32 0.0, %v553_v49 }
 0x21c   : > { %567 = vrot.lane.b32.xlu1 %v561_v50, %s1614_s26 }
 0x21d   : > { %v555_v51 = vpop.permute.xlu1 %554 }
 0x21e   : > { %v557_v13 = vsel %vm556_vm2, %v553_v49, %v555_v51 }
 0x220   : > { %v1592_v52 = vpop.eup %1591 }
 0x221   : > { %v467_v53 = vmul.f32 %v1592_v52, %v464_v46  ;;  %v595_v54 = vpop.permute.xlu1 %594 }
 0x222   : > { %v603_v55 = vmul.f32 0.0, %v595_v54  ;;  %v599_v18 = vsel %vm598_vm4, %v595_v54, %v597_v12 }
 0x223   : > { %v468_v56 = vmul.f32 %v1592_v52, %v467_v53 }
 0x224   : > { %609 = vrot.lane.b32.xlu0 %v603_v55, %s1613_s22 }
 0x225   : > { %v469_v57 = vadd.f32 1e-05, %v468_v56  ;;  %v641_v58 = vpop.permute.xlu1 %640 }
 0x227   : > { %1593 = vrsqrt.f32 %v469_v57 }
 0x229   : > { %v643_v61 = vpop.permute.xlu1 %642 }
 0x22a   : > { %v644_v17 = vsel %vm615_vm3, %v641_v58, %v643_v61  ;;  %v650_v25 = vmul.f32 0.0, %v643_v61 }
 0x22d   : > { %v681_v10 = vpop.permute.xlu1 %680 }
 0x231   : > { %v1594_v59 = vpop.eup %1593 }
 0x232   : > { %v471_v60 = vmul.f32 %v1594_v59, %v1592_v52 }
 0x234   : > { %v472_v62 = vmul.f32 %v471_v60, %v457_v26  ;;  %v473_v63 = vmul.f32 %v471_v60, %v458_v27  ;;  %v683_v26 = vpop.permute.xlu1 %682 }
 0x235   : > { %v684_v27 = vsel %vm573_vm5, %v681_v10, %v683_v26  ;;  %v690_v31 = vmul.f32 0.0, %v683_v26 }
 0x236   : > { %v1763_v0 = vmax.f32 %v472_v62, 0.0  ;;  %v1765_v2 = vmax.f32 %v473_v63, 0.0 }
 0x238   : > { %v501_v8 = vmul.f32 %v496_v7, %v1763_v0  ;;  %v502_v9 = vmul.f32 %v494_v48, %v1765_v2  ;;  %v562_v15 = vmul.f32 %v557_v13, %v1763_v0  ;;  %v563_v16 = vmul.f32 %v555_v51, %v1765_v2  ;;  %v740_v35 = vpop.permute.xlu1 %739 }
 0x239   : > { %v604_v20 = vmul.f32 %v599_v18, %v1763_v0  ;;  %v605_v21 = vmul.f32 %v597_v12, %v1765_v2  ;;  %v1520_v22 = vpack.i.bf16 %v1765_v2, %v1763_v0  ;;  %v649_v24 = vmul.f32 %v644_v17, %v1765_v2 }
 0x23a   : > { %v1525_v14 = vpack.i.bf16 %v502_v9, %v501_v8  ;;  %v1530_v23 = vpack.i.bf16 %v563_v16, %v562_v15  ;;  %v689_v30 = vmul.f32 %v684_v27, %v1765_v2  ;;  %v1540_v32 = vpack.i.bf16 %v1607_v1, %v1765_v2 }
 0x23b   : > { %1521 = vrot.lane.b32.xlu0 %v1520_v22, %s1615_s27  ;;  %v1535_v28 = vpack.i.bf16 %v605_v21, %v604_v20  ;;  %v1545_v29 = vpack.i.bf16 %v650_v25, %v649_v24  ;;  %v648_v34 = vmul.f32 %v641_v58, %v1763_v0  ;;  %v688_v37 = vmul.f32 %v681_v10, %v1763_v0 }
 0x23c   : > { %1526 = vrot.lane.b32.xlu1 %v1525_v14, %s1611_s16  ;;  %v1550_v33 = vpack.i.bf16 %v690_v31, %v689_v30  ;;  %v743_v38 = vsel %vm512_vm6, %v740_v35, %v742_v36  ;;  %v747_v41 = vmul.f32 %v740_v35, %v1763_v0  ;;  %v507_v44 = vpop.permute.xlu1 %506 }
 0x23d   : > { %v748_v39 = vmul.f32 %v743_v38, %v1765_v2 }
 0x23f   : > { %1536 = vrot.lane.b32.xlu0 %v1535_v28, %s1613_s22 }
 0x240   : > { %1531 = vrot.lane.b32.xlu1 %v1530_v23, %s1614_s26 }
 0x243   : > { %1541 = vrot.lane.b32.xlu0 %v1540_v32, %s1616_s28 }
 0x244   : > { %1546 = vrot.lane.b32.xlu1 %v1545_v29, %s1610_s12 }
 0x247   : > { %654 = vrot.lane.b32.xlu0 %v648_v34, %s1610_s12 }
 0x248   : > { %1551 = vrot.lane.b32.xlu1 %v1550_v33, %s1612_s19 }
 0x24b   : > { %712 = vrot.lane.b32.xlu0 %v1763_v0, %s1616_s28 }
 0x24c   : > { %694 = vrot.lane.b32.xlu1 %v688_v37, %s1612_s19 }
 0x24f   : > { %757 = vrot.lane.b32.xlu0 %v749_v40, %s1609_s29 }
 0x250   : > { %755 = vrot.lane.b32.xlu1 %v748_v39, %s1609_s29 }
 0x253   : > { %787 = vperm.xlu0 %1519, %v784_v42   ;;  %v876_v42 = vld [vmem:[%s1963_s7] sm:$0xff] }
 0x254   : > { %753 = vrot.lane.b32.xlu1 %v747_v41, %s1609_s29 }
 0x258   : > { %879 = vperm.xlu1 %1555, %v876_v42  }
 0x28e   : > { %v568_v45 = vpop.permute.xlu1 %567 }
 0x296   : > { %v610_v46 = vpop.permute.xlu0 %609 }
 0x2ad   : > { %v1522_v50 = vpop.permute.xlu0 %1521 }
 0x2ae   : > { %v1527_v47 = vpop.permute.xlu1 %1526  ;;  %v1524_v51 = vunpack.i.h.bf16 %v1522_v50  ;;  %v1523_v52 = vunpack.i.l.bf16 %v1522_v50 }
 0x2af   : > { %v1529_v48 = vunpack.i.h.bf16 %v1527_v47  ;;  %v1528_v49 = vunpack.i.l.bf16 %v1527_v47 }
 0x2b0   : > { %v532_v56 = vsel %vm531_vm7, %v526_v43, %v1523_v52  ;;  %v533_v59 = vsel %vm531_vm7, %v1523_v52, %v1524_v51 }
 0x2b1   : > { %v513_v53 = vsel %vm512_vm6, %v507_v44, %v1528_v49  ;;  %v514_v54 = vsel %vm512_vm6, %v1528_v49, %v1529_v48  ;;  %v1537_v61 = vpop.permute.xlu0 %1536 }
 0x2b2   : > { %v1532_v55 = vpop.permute.xlu1 %1531  ;;  %v1464_v60 = vpack.c.bf16 %v532_v56, %v513_v53  ;;  %v1462_v62 = vpack.c.bf16 %v533_v59, %v514_v54  ;;  %v1539_v63 = vunpack.i.h.bf16 %v1537_v61  ;;  %v1538_v7 = vunpack.i.l.bf16 %v1537_v61  ;;  %v875_v54 = vld [vmem:[%s1962_s6] sm:$0xff] }
 0x2b3   : > { %v1534_v57 = vunpack.i.h.bf16 %v1532_v55  ;;  %v1533_v58 = vunpack.i.l.bf16 %v1532_v55  ;;  %v1453_v61 = vld [vmem:[%s1957_s1 + $0x2] ss:$8 sm:$0x3] }
 0x2b4   : > { %1463 = vmatprep.subr.bf16.mxu1 %v1462_v62  ;;  %v616_v12 = vsel %vm615_vm3, %v610_v46, %v1538_v7  ;;  %v617_v15 = vsel %vm615_vm3, %v1538_v7, %v1539_v63  ;;  %v1093_v62 = vrot.slane %v1453_v61, %v1715_v11  ;;  %v1454_v63 = vld [vmem:[%s1957_s1 + $0x3] ss:$8 sm:$0x3] }
 0x2b5   : > { %v574_v8 = vsel %vm573_vm5, %v568_v45, %v1533_v58  ;;  %v575_v9 = vsel %vm573_vm5, %v1533_v58, %v1534_v57  ;;  %1465 = vmatpush1.bf16.msra.mxu1 %v1464_v60  ;;  %v1542_v17 = vpop.permute.xlu0 %1541  ;;  %v1136_v7 = vrot.slane %v1454_v63, %v1715_v11 }
 0x2b6   : > { %v1547_v10 = vpop.permute.xlu1 %1546  ;;  %v1468_v16 = vpack.c.bf16 %v616_v12, %v574_v8  ;;  %v1466_v18 = vpack.c.bf16 %v617_v15, %v575_v9  ;;  %v1544_v20 = vunpack.i.h.bf16 %v1542_v17  ;;  %v1543_v21 = vunpack.i.l.bf16 %v1542_v17  ;;  %v1455_v8 = vld [vmem:[%s1957_s1 + $0x4] ss:$8 sm:$0x3] }
 0x2b7   : > { %v1549_v13 = vunpack.i.h.bf16 %v1547_v10  ;;  %v1548_v14 = vunpack.i.l.bf16 %v1547_v10  ;;  %v1175_v9 = vrot.slane %v1455_v8, %v1715_v11  ;;  %v1456_v10 = vld [vmem:[%s1957_s1 + $0x5] ss:$8 sm:$0x3] }
 0x2b8   : > { %1467 = vmatprep.subr.bf16.mxu1 %v1466_v18  ;;  %v720_v30 = vsel %vm718_vm8, %v1543_v21, %v1544_v20  ;;  %v1232_v12 = vrot.slane %v1456_v10, %v1715_v11 }
 0x2b9   : > { %v661_v22 = vsel %vm598_vm4, %v1548_v14, %v1549_v13  ;;  %1469 = vmatpush1.bf16.msra.mxu1 %v1468_v16  ;;  %v655_v27 = vpop.permute.xlu0 %654 }
 0x2ba   : > { %v1552_v23 = vpop.permute.xlu1 %1551  ;;  %v1470_v24 = vpack.c.bf16 %v661_v22, %v1765_v2  ;;  %v660_v28 = vsel %vm598_vm4, %v655_v27, %v1548_v14 }
 0x2bb   : > { %v1554_v25 = vunpack.i.h.bf16 %v1552_v23  ;;  %v1553_v26 = vunpack.i.l.bf16 %v1552_v23  ;;  %v1472_v31 = vpack.c.bf16 %v660_v28, %v1763_v0  ;;  %v765_v0 = vld [vmem:[%s1960_s4] sm:$0xf]  ;;  %v1140_v23 = vrot.slane %v1454_v63, %v1719_v19 }
 0x2bc   : > { %1471 = vmatprep.subr.bf16.mxu1 %v1470_v24  ;;  %v1179_v24 = vrot.slane %v1455_v8, %v1719_v19 }
 0x2bd   : > { %v701_v29 = vsel %vm556_vm2, %v1553_v26, %v1554_v25  ;;  %v713_v35 = vpop.permute.xlu0 %712  ;;  %1473 = vmatpush1.bf16.msra.mxu1 %v1472_v31  ;;  %v1236_v25 = vrot.slane %v1456_v10, %v1719_v19 }
 0x2be   : > { %v695_v32 = vpop.permute.xlu1 %694  ;;  %v1474_v33 = vpack.c.bf16 %v720_v30, %v701_v29  ;;  %v719_v2 = vsel %vm718_vm8, %v713_v35, %v1543_v21  ;;  %v1001_v21 = vrot.slane %v992_v4, %v1719_v19 }
 0x2bf   : > { %v700_v34 = vsel %vm556_vm2, %v695_v32, %v1553_v26 }
 0x2c0   : > { %1475 = vmatprep.subr.bf16.mxu1 %v1474_v33  ;;  %v1476_v36 = vpack.c.bf16 %v719_v2, %v700_v34 }
 0x2c1   : > { %v758_v38 = vpop.permute.xlu0 %757 }
 0x2c2   : > { %v756_v37 = vpop.permute.xlu1 %755  ;;  %1477 = vmatpush1.bf16.msra.mxu1 %v1476_v36 }
 0x2c3   : > { %v760_v39 = vsel %vm495_vm1, %v756_v37, %v758_v38 }
 0x2c4   : > { %810 = vmatprep.subr.mxu1 %v760_v39 }
 0x2c6   : > { %v754_v40 = vpop.permute.xlu1 %753 }
 0x2c7   : > { %v759_v41 = vsel %vm495_vm1, %v754_v40, %v756_v37 }
 0x2c8   : > { %811 = vmatpush1.msra.mxu1 %v759_v41 }
 0x2c9   : > { %1448 = vmatmul.mubr.msk.f32.vlgmr.msra.gmra.mrb[2].mxu1 %vm790_vm9, %v765_v0 }
 0x2d2   : > { %v788_v43 = vpop.permute.xlu0 %787 }
 0x2d7   : > { %v880_v55 = vpop.permute.xlu1 %879 }
 0x39c   : > { %v860_v44 = vpop.f32.mrb[2].mxu1 }
 0x39d   : > { %v861_v45 = vadd.f32 %v860_v44, %v788_v43  ;;  %v862_v46 = vpop.f32.mrb[3].mxu1 }
 0x39e   : > { %v863_v47 = vadd.f32 %v862_v46, %v788_v43 }
 0x39f   : > { %865 = vst [vmem:[#allocation2 + $0x10] sm:$0xf] %v861_v45 }
 0x3a0   : > { %866 = vst [vmem:[#allocation2 + $0x18] sm:$0xf] %v863_v47 }
 0x3a6   : > { %v869_v48 = vld [vmem:[#allocation2 + $0x10] sm:$0xf] }
 0x3a7   : > { %v870_v49 = vld [vmem:[#allocation2 + $0x18] sm:$0xf]  ;;  %v873_v50 = vmax.f32 %v869_v48, 0.0 }
 0x3a8   : > { %v874_v51 = vmax.f32 %v870_v49, 0.0 }
 0x3a9   : > { %v1481_v53 = vpack.c.bf16 %v873_v50, %v368_v6  ;;  %v1452_v6 = vld [vmem:[%s1957_s1 + $0x1] ss:$8 sm:$0x3] }
 0x3aa   : > { %v1478_v52 = vpack.c.bf16 %v874_v51, %v369_v5  ;;  %v997_v5 = vrot.slane %v992_v4, %v1715_v11  ;;  %v1054_v60 = vrot.slane %v1452_v6, %v1715_v11  ;;  %v1058_v22 = vrot.slane %v1452_v6, %v1719_v19 }
 0x3ab   : > { %v1097_v11 = vrot.slane %v1453_v61, %v1719_v19 }
 0x3ac   : > { %1480 = vmatprep.subr.msk.bf16.mxu0 %vm1479_vm12, %v1478_v52 }
 0x3ad   : > { %1483 = vmatpush1.bf16.msk.msra.mxu0 %vm1479_vm12, %v1481_v53 }
 0x3b0   : > { %1451 = vmatmul.mubr.msk.f32.vlgmr.msra.gmra.mrb[0].mxu0 %vm882_vm13, %v875_v54 }
 0x3b1   : > { %1355 = vmatprep.mubr.f32.mxu0 %v1607_v1 }
 0x483   : > { %v959_v56 = vpop.f32.mrb[0].mxu0 }
 0x484   : > { %v960_v57 = vadd.f32 %v959_v56, %v880_v55  ;;  %v961_v58 = vpop.f32.mrb[1].mxu0 }
 0x485   : > { %v962_v59 = vadd.f32 %v961_v58, %v880_v55 }
 0x487   : > { %v964_v3 = vadd.f32 %v962_v59, %v960_v57 }
 0x489   : > { %965 = vadd.xlane.f32.xlu0 %v964_v3 }
 0x49f   : > { %1002 = vrot.lane.b32.xlu0 %v997_v5, %s1609_s29 }
 0x4a3   : > { %1059 = vrot.lane.b32.xlu0 %v1054_v60, %s1612_s19 }
 0x4a7   : > { %1098 = vrot.lane.b32.xlu0 %v1093_v62, %s1610_s12 }
 0x4ab   : > { %1141 = vrot.lane.b32.xlu0 %v1136_v7, %s1613_s22 }
 0x4af   : > { %1180 = vrot.lane.b32.xlu0 %v1175_v9, %s1614_s26 }
 0x4b3   : > { %1237 = vrot.lane.b32.xlu0 %v1232_v12, %s1611_s16 }
 0x516   : > { %v966_v13 = vpop.xlane.xlu0 %965 }
 0x517   : > { %v967_v14 = vmul.f32 0.00390625, %v966_v13 }
 0x519   : > { %v968_v15 = vsub.f32 %v960_v57, %v967_v14  ;;  %v969_v16 = vsub.f32 %v962_v59, %v967_v14 }
 0x51a   : > { %v1003_v26 = vpop.permute.xlu0 %1002 }
 0x51b   : > { %v970_v17 = vmul.f32 %v968_v15, %v968_v15  ;;  %v971_v18 = vmul.f32 %v969_v16, %v969_v16  ;;  %v1010_v28 = vmul.f32 0.0, %v1003_v26 }
 0x51d   : > { %v972_v20 = vadd.f32 %v971_v18, %v970_v17  ;;  %1016 = vrot.lane.b32.xlu0 %v1010_v28, %s1611_s16  ;;  %v1282_v17 = vld [vmem:[%s1965_s9] sm:$0xf] }
 0x51e   : > { %v1060_v27 = vpop.permute.xlu0 %1059 }
 0x51f   : > { %973 = vadd.xlane.f32.xlu1 %v972_v20  ;;  %v1067_v30 = vmul.f32 0.0, %v1060_v27 }
 0x521   : > { %1073 = vrot.lane.b32.xlu0 %v1067_v30, %s1614_s26 }
 0x522   : > { %v1099_v29 = vpop.permute.xlu0 %1098 }
 0x523   : > { %v1106_v31 = vmul.f32 0.0, %v1099_v29 }
 0x526   : > { %v1142_v51 = vpop.permute.xlu0 %1141 }
 0x52a   : > { %v1181_v5 = vpop.permute.xlu0 %1180 }
 0x52e   : > { %v1238_v13 = vpop.permute.xlu0 %1237 }
 0x530   : > { %1004 = vrot.lane.b32.xlu1 %v1001_v21, %s1609_s29 }
 0x534   : > { %1061 = vrot.lane.b32.xlu1 %v1058_v22, %s1612_s19 }
 0x538   : > { %1100 = vrot.lane.b32.xlu1 %v1097_v11, %s1610_s12 }
 0x53c   : > { %1143 = vrot.lane.b32.xlu1 %v1140_v23, %s1613_s22 }
 0x540   : > { %1182 = vrot.lane.b32.xlu1 %v1179_v24, %s1614_s26 }
 0x544   : > { %1239 = vrot.lane.b32.xlu1 %v1236_v25, %s1611_s16 }
 0x548   : > { %1034 = vrot.lane.b32.xlu1 %v1607_v1, %s1615_s27 }
 0x54c   : > { %1112 = vrot.lane.b32.xlu1 %v1106_v31, %s1613_s22 }
 0x58f   : > { %v1017_v21 = vpop.permute.xlu0 %1016 }
 0x593   : > { %v1074_v11 = vpop.permute.xlu0 %1073 }
 0x5ac   : > { %v974_v32 = vpop.xlane.xlu1 %973 }
 0x5ad   : > { %v975_v33 = vmul.f32 0.00390625, %v974_v32 }
 0x5af   : > { %v976_v19 = vadd.f32 1e-05, %v975_v33 }
 0x5b0   : > { %v1005_v37 = vpop.permute.xlu1 %1004 }
 0x5b1   : > { %1595 = vrsqrt.f32 %v976_v19  ;;  %v1006_v45 = vsel %vm495_vm1, %v1003_v26, %v1005_v37 }
 0x5b4   : > { %v1062_v38 = vpop.permute.xlu1 %1061 }
 0x5b5   : > { %v1063_v49 = vsel %vm556_vm2, %v1060_v27, %v1062_v38 }
 0x5b8   : > { %v1101_v0 = vpop.permute.xlu1 %1100 }
 0x5b9   : > { %v1102_v48 = vsel %vm598_vm4, %v1099_v29, %v1101_v0 }
 0x5bb   : > { %v1596_v34 = vpop.eup %1595 }
 0x5bc   : > { %v978_v35 = vmul.f32 %v1596_v34, %v975_v33  ;;  %v1144_v50 = vpop.permute.xlu1 %1143 }
 0x5bd   : > { %v1145_v58 = vsel %vm615_vm3, %v1142_v51, %v1144_v50  ;;  %v1151_v59 = vmul.f32 0.0, %v1144_v50 }
 0x5be   : > { %v979_v2 = vmul.f32 %v1596_v34, %v978_v35 }
 0x5c0   : > { %v980_v36 = vadd.f32 1e-05, %v979_v2  ;;  %v1183_v4 = vpop.permute.xlu1 %1182 }
 0x5c1   : > { %v1184_v61 = vsel %vm573_vm5, %v1181_v5, %v1183_v4  ;;  %v1190_v62 = vmul.f32 0.0, %v1183_v4 }
 0x5c2   : > { %1597 = vrsqrt.f32 %v980_v36 }
 0x5c4   : > { %v1240_v12 = vpop.permute.xlu1 %1239 }
 0x5c8   : > { %v1035_v20 = vpop.permute.xlu1 %1034 }
 0x5cc   : > { %v1598_v39 = vpop.eup %1597  ;;  %v1113_v22 = vpop.permute.xlu1 %1112 }
 0x5cd   : > { %v982_v40 = vmul.f32 %v1598_v39, %v1596_v34 }
 0x5cf   : > { %v983_v41 = vmul.f32 %v982_v40, %v968_v15  ;;  %v984_v42 = vmul.f32 %v982_v40, %v969_v16  ;;  %v1241_v15 = vsel %vm512_vm6, %v1238_v13, %v1240_v12  ;;  %v1247_v16 = vmul.f32 0.0, %v1240_v12 }
 0x5d1   : > { %v1886_v43 = vmax.f32 %v983_v41, 0.0  ;;  %v1888_v44 = vmax.f32 %v984_v42, 0.0 }
 0x5d3   : > { %v1012_v46 = vmul.f32 %v1005_v37, %v1888_v44  ;;  %v1011_v47 = vmul.f32 %v1006_v45, %v1886_v43  ;;  %v1069_v52 = vmul.f32 %v1062_v38, %v1888_v44  ;;  %v1068_v53 = vmul.f32 %v1063_v49, %v1886_v43 }
 0x5d4   : > { %v1108_v54 = vmul.f32 %v1101_v0, %v1888_v44  ;;  %v1107_v55 = vmul.f32 %v1102_v48, %v1886_v43  ;;  %v1556_v56 = vpack.i.bf16 %v1888_v44, %v1886_v43  ;;  %v1150_v3 = vmul.f32 %v1145_v58, %v1888_v44 }
 0x5d5   : > { %v1561_v57 = vpack.i.bf16 %v1012_v46, %v1011_v47  ;;  %v1566_v60 = vpack.i.bf16 %v1069_v52, %v1068_v53  ;;  %v1189_v63 = vmul.f32 %v1184_v61, %v1888_v44  ;;  %v1576_v7 = vpack.i.bf16 %v1607_v1, %v1888_v44 }
 0x5d6   : > { %1557 = vrot.lane.b32.xlu1 %v1556_v56, %s1615_s27  ;;  %v1571_v6 = vpack.i.bf16 %v1108_v54, %v1107_v55  ;;  %v1581_v8 = vpack.i.bf16 %v1151_v59, %v1150_v3  ;;  %v1149_v9 = vmul.f32 %v1142_v51, %v1886_v43  ;;  %v1188_v14 = vmul.f32 %v1181_v5, %v1886_v43 }
 0x5d7   : > { %1562 = vrot.lane.b32.xlu0 %v1561_v57, %s1611_s16  ;;  %v1586_v10 = vpack.i.bf16 %v1190_v62, %v1189_v63  ;;  %v1246_v1 = vmul.f32 %v1241_v15, %v1888_v44  ;;  %v1245_v18 = vmul.f32 %v1238_v13, %v1886_v43 }
 0x5da   : > { %1572 = vrot.lane.b32.xlu1 %v1571_v6, %s1613_s22 }
 0x5db   : > { %1567 = vrot.lane.b32.xlu0 %v1566_v60, %s1614_s26 }
 0x5de   : > { %1577 = vrot.lane.b32.xlu1 %v1576_v7, %s1616_s28 }
 0x5df   : > { %1582 = vrot.lane.b32.xlu0 %v1581_v8, %s1610_s12 }
 0x5e2   : > { %1155 = vrot.lane.b32.xlu1 %v1149_v9, %s1610_s12  ;;  %v1263_v9 = vld [vmem:[%s1964_s8] sm:$0xf] }
 0x5e3   : > { %1587 = vrot.lane.b32.xlu0 %v1586_v10, %s1612_s19 }
 0x5e6   : > { %1212 = vrot.lane.b32.xlu1 %v1886_v43, %s1616_s28 }
 0x5e7   : > { %1194 = vrot.lane.b32.xlu0 %v1188_v14, %s1612_s19 }
 0x5ea   : > { %1255 = vrot.lane.b32.xlu1 %v1247_v16, %s1609_s29 }
 0x5eb   : > { %1253 = vrot.lane.b32.xlu0 %v1246_v1, %s1609_s29 }
 0x5ee   : > { %1285 = vperm.xlu1 %1555, %v1282_v17  }
 0x5ef   : > { %1251 = vrot.lane.b32.xlu0 %v1245_v18, %s1609_s29 }
 0x648   : > { %v1558_v23 = vpop.permute.xlu1 %1557 }
 0x649   : > { %v1563_v24 = vpop.permute.xlu0 %1562  ;;  %v1560_v25 = vunpack.i.h.bf16 %v1558_v23  ;;  %v1559_v26 = vunpack.i.l.bf16 %v1558_v23 }
 0x64a   : > { %v1565_v27 = vunpack.i.h.bf16 %v1563_v24  ;;  %v1564_v28 = vunpack.i.l.bf16 %v1563_v24 }
 0x64b   : > { %v1040_v29 = vsel %vm531_vm7, %v1035_v20, %v1559_v26  ;;  %v1041_v32 = vsel %vm531_vm7, %v1559_v26, %v1560_v25 }
 0x64c   : > { %v1022_v30 = vsel %vm512_vm6, %v1017_v21, %v1564_v28  ;;  %v1023_v31 = vsel %vm512_vm6, %v1564_v28, %v1565_v27  ;;  %v1573_v19 = vpop.permute.xlu1 %1572 }
 0x64d   : > { %v1486_v33 = vpack.c.bf16 %v1040_v29, %v1022_v30  ;;  %v1568_v34 = vpop.permute.xlu0 %1567  ;;  %v1484_v35 = vpack.c.bf16 %v1041_v32, %v1023_v31  ;;  %v1575_v2 = vunpack.i.h.bf16 %v1573_v19  ;;  %v1574_v36 = vunpack.i.l.bf16 %v1573_v19 }
 0x64e   : > { %v1570_v37 = vunpack.i.h.bf16 %v1568_v34  ;;  %v1569_v38 = vunpack.i.l.bf16 %v1568_v34 }
 0x64f   : > { %1485 = vmatprep.subr.bf16.mxu0 %v1484_v35  ;;  %v1118_v39 = vsel %vm615_vm3, %v1113_v22, %v1574_v36  ;;  %v1119_v41 = vsel %vm615_vm3, %v1574_v36, %v1575_v2 }
 0x650   : > { %v1079_v40 = vsel %vm573_vm5, %v1074_v11, %v1569_v38  ;;  %1487 = vmatpush1.bf16.msra.mxu0 %v1486_v33  ;;  %v1080_v0 = vsel %vm573_vm5, %v1569_v38, %v1570_v37  ;;  %v1578_v45 = vpop.permute.xlu1 %1577 }
 0x651   : > { %v1490_v42 = vpack.c.bf16 %v1118_v39, %v1079_v40  ;;  %v1583_v46 = vpop.permute.xlu0 %1582  ;;  %v1488_v47 = vpack.c.bf16 %v1119_v41, %v1080_v0  ;;  %v1580_v50 = vunpack.i.h.bf16 %v1578_v45  ;;  %v1579_v51 = vunpack.i.l.bf16 %v1578_v45 }
 0x652   : > { %v1585_v48 = vunpack.i.h.bf16 %v1583_v46  ;;  %v1584_v49 = vunpack.i.l.bf16 %v1583_v46 }
 0x653   : > { %1489 = vmatprep.subr.bf16.mxu0 %v1488_v47  ;;  %v1219_v4 = vsel %vm718_vm8, %v1579_v51, %v1580_v50 }
 0x654   : > { %1491 = vmatpush1.bf16.msra.mxu0 %v1490_v42  ;;  %v1162_v52 = vsel %vm598_vm4, %v1584_v49, %v1585_v48  ;;  %v1156_v53 = vpop.permute.xlu1 %1155 }
 0x655   : > { %v1588_v54 = vpop.permute.xlu0 %1587  ;;  %v1492_v55 = vpack.c.bf16 %v1162_v52, %v1888_v44  ;;  %v1161_v56 = vsel %vm598_vm4, %v1156_v53, %v1584_v49 }
 0x656   : > { %v1590_v57 = vunpack.i.h.bf16 %v1588_v54  ;;  %v1589_v58 = vunpack.i.l.bf16 %v1588_v54  ;;  %v1494_v59 = vpack.c.bf16 %v1161_v56, %v1886_v43 }
 0x657   : > { %1493 = vmatprep.subr.bf16.mxu0 %v1492_v55 }
 0x658   : > { %v1201_v3 = vsel %vm556_vm2, %v1589_v58, %v1590_v57  ;;  %v1213_v5 = vpop.permute.xlu1 %1212  ;;  %1495 = vmatpush1.bf16.msra.mxu0 %v1494_v59 }
 0x659   : > { %v1195_v6 = vpop.permute.xlu0 %1194  ;;  %v1496_v60 = vpack.c.bf16 %v1219_v4, %v1201_v3  ;;  %v1218_v61 = vsel %vm718_vm8, %v1213_v5, %v1579_v51 }
 0x65a   : > { %v1200_v62 = vsel %vm556_vm2, %v1195_v6, %v1589_v58 }
 0x65b   : > { %v1498_v44 = vpack.c.bf16 %v1218_v61, %v1200_v62  ;;  %1497 = vmatprep.subr.bf16.mxu0 %v1496_v60 }
 0x65c   : > { %v1256_v63 = vpop.permute.xlu1 %1255 }
 0x65d   : > { %v1254_v7 = vpop.permute.xlu0 %1253  ;;  %1499 = vmatpush1.bf16.msra.mxu0 %v1498_v44 }
 0x65e   : > { %v1258_v43 = vsel %vm495_vm1, %v1254_v7, %v1256_v63 }
 0x65f   : > { %1307 = vmatprep.subr.mxu0 %v1258_v43 }
 0x661   : > { %v1252_v8 = vpop.permute.xlu0 %1251 }
 0x662   : > { %v1257_v10 = vsel %vm495_vm1, %v1252_v8, %v1254_v7 }
 0x663   : > { %1308 = vmatpush1.msra.mxu0 %v1257_v10 }
 0x664   : > { %1457 = vmatmul.mubr.msk.f32.vlgmr.msra.gmra.mrb[2].mxu0 %vm790_vm9, %v1263_v9 }
 0x66d   : > { %v1286_v12 = vpop.permute.xlu1 %1285 }
 0x737   : > { %v1357_v13 = vpop.f32.mrb[2].mxu0 }
 0x738   : > { %v1358_v14 = vadd.f32 %v1357_v13, %v1286_v12  ;;  %v1359_v15 = vpop.f32.mrb[3].mxu0 }
 0x739   : > { %v1360_v16 = vadd.f32 %v1359_v15, %v1286_v12 }
 0x73a   : > { %v1364_v1 = vrot.slane %v1358_v14, 4 }
 0x73b   : > { %v1365_v17 = vrot.slane %v1360_v16, 4 }
 0x73c   : > { %1368 = vst [vmem:[#allocation2 + $0x10] sm:$0xf0] %v1364_v1 }
 0x73d   : > { %1369 = vst [vmem:[#allocation2 + $0x18] sm:$0xf0] %v1365_v17 }
 0x743   : > { %v1372_v18 = vld [vmem:[#allocation2 + $0x10] sm:$0xff] }
 0x744   : > { %1376 = vst [vmem:[%s1692_s24 + $0x10] sm:$0xff] %v1372_v18  ;;  %v1373_v20 = vld [vmem:[#allocation2 + $0x18] sm:$0xff] }
 0x745   : > { %1377 = vst [vmem:[%s1692_s24 + $0x18] sm:$0xff] %v1373_v20 }
 0x746 PF: > { %s20_s13 = sadd.s32 1, %s1605_s13  }
 0x747   : > { %p17_p4 = scmp.ge.s32.totalorder %s20_s13, 4  }
 0x749   :  { %19 = sbr.rel (!%p17_p4) target bundleno = 1 (0x1), region = 95 }

// kernel: densenet_forward.7
= control target key start
LH: loop header
LB: loop body
LE: loop exit
PB: predicated region body
PF: predicated region fallthrough
CT: control target
= control target key end

     0   :  { %s2146_s21 = smov 0   ;;  %s2614_s0 = inlined_call_operand.vmem [shape: f32[2,24,256], index: 0, kind: input, shape index: {}]   ;;  %s2615_s1 = inlined_call_operand.vmem [shape: f32[6,256], index: 1, kind: input, shape index: {}]   ;;  %s2616_s2 = inlined_call_operand.vmem [shape: f32[12,216], index: 2, kind: input, shape index: {}]   ;;  %s2617_s3 = inlined_call_operand.vmem [shape: f32[12,1], index: 3, kind: input, shape index: {}]   ;;  %s2618_s4 = inlined_call_operand.vmem [shape: f32[2,144], index: 4, kind: input, shape index: {}]   ;;  %s2619_s5 = inlined_call_operand.vmem [shape: f32[2,1], index: 5, kind: input, shape index: {}]   ;;  %s2620_s6 = inlined_call_operand.vmem [shape: f32[2,2,256], index: 6, kind: output, shape index: {}]  }
   0x1 LB: > { %s1682_s22 = sadd.s32 4294967295, %s2099_s21   ;;  %p1686_p0 = scmp.ge.s32.totalorder %s2099_s21, 1  ;;  %s2099_s21 = sphi %s2146_s21, %s16_s21  }
   0x2   : > { %p212_p1 = scmp.lt.s32.totalorder %s2099_s21, 3 }
   0x4   : > { %p213_p2 = pnand %p1686_p0, %p212_p1 }
   0x5   : > { %v281_v0 = vlaneseq (!%p213_p2)  ;;  %v2101_v1 = vmov (!%p213_p2), 0.0   ;;  %v1690_v3 = vld [vmem:[%s2615_s1 + $0x1] ss:$8 sm:$0x3] (!%p213_p2)  ;;  %p242_p3 = scmp.lt.s32.totalorder (!%p213_p2), %s1682_s22, 1  ;;  %s2102_s27 = smov (!%p213_p2), 113  }
   0x6   : > { %216 = sbr.rel (%p213_p2) target bundleno = 927 (0x39f), region = 44  ;;  %252 = vst [vmem:[#allocation2] sm:$0xff] (!%p213_p2), %v2101_v1  ;;  %v279_v4 = vld [vmem:[%s2615_s1] ss:$8 sm:$0x3] (!%p213_p2)  ;;  %s2103_s28 = smov (!%p213_p2), 111  }
   0x7   : > { %v282_v2 = vshrl.u32 (!%p213_p2), %v281_v0, 7  ;;  %v1691_v11 = vld [vmem:[%s2615_s1 + $0x2] ss:$8 sm:$0x3] (!%p213_p2)  ;;  %s2104_s13 = smov (!%p213_p2), 127   ;;  %s2105_s16 = smov (!%p213_p2), 1  }
   0x8   : > { %v1692_v17 = vld [vmem:[%s2615_s1 + $0x3] ss:$8 sm:$0x3] (!%p213_p2)  ;;  %v1693_v21 = vld [vmem:[%s2615_s1 + $0x4] ss:$8 sm:$0x3] (!%p213_p2) }
   0x9   : > { %v2161_v5 = vsub.s32 (!%p213_p2), 0, %v282_v2  ;;  %v2163_v6 = vsub.s32 (!%p213_p2), 1, %v282_v2  ;;  %v1694_v24 = vld [vmem:[%s2615_s1 + $0x5] ss:$8 sm:$0x3] (!%p213_p2)  ;;  %s2106_s19 = smov (!%p213_p2), 15  }
   0xa   : > { %s2107_s20 = smov (!%p213_p2), 17   ;;  %s2108_s23 = smov (!%p213_p2), 16   ;;  %vm293_vm0 = vcmask (!%p213_p2), 908288   ;;  %vm432_vm1 = vcmask (!%p213_p2), 924672   ;;  %vm516_vm2 = vcmask (!%p213_p2), 1039360   ;;  %vm557_vm3 = vcmask (!%p213_p2), 7168  }
   0xb   : > { %v423_v7 = vrot.slane (!%p213_p2), %v1690_v3, %v2161_v5  ;;  %v284_v8 = vrot.slane (!%p213_p2), %v279_v4, %v2161_v5  ;;  %v427_v9 = vrot.slane (!%p213_p2), %v1690_v3, %v2163_v6  ;;  %v288_v10 = vrot.slane (!%p213_p2), %v279_v4, %v2163_v6  ;;  %s2109_s24 = smov (!%p213_p2), 112  }
   0xc   : > { %v511_v13 = vrot.slane (!%p213_p2), %v1691_v11, %v2163_v6  ;;  %v507_v14 = vrot.slane (!%p213_p2), %v1691_v11, %v2161_v5  ;;  %v607_v19 = vrot.slane (!%p213_p2), %v1692_v17, %v2163_v6  ;;  %v603_v20 = vrot.slane (!%p213_p2), %v1692_v17, %v2161_v5 }
   0xd   : > { %s2622_s22 = smov (!%p242_p3, %s1682_s22), 1  ;;  %428 = vrot.lane.b32.xlu1 %v423_v7, %s2102_s27  ;;  %289 = vrot.lane.b32.xlu0 %v284_v8, %s2103_s28  ;;  %v689_v22 = vrot.slane %v1693_v21, %v2163_v6  ;;  %v685_v23 = vrot.slane %v1693_v21, %v2161_v5  ;;  %v826_v25 = vrot.slane %v1694_v24, %v2163_v6  ;;  %vm473_vm4 = vcmask 121856  }
   0xe   : > { %s1796_s29 = smul.u32 48, %s2622_s22  ;;  %v822_v26 = vrot.slane %v1694_v24, %v2161_v5  ;;  %vm334_vm5 = vcmask 138240   ;;  %vm959_vm6 = vcmask 719872   ;;  %vm389_vm7 = vcmask 130048  }
   0xf   : > { %vm788_vm8 = vcmask 916480  }
  0x10   : > { %s2180_s10 = scalar_lea.vmem %s2614_s0, %s1796_s29 }
  0x11   : > { %v2183_v12 = vld [vmem:[%s2180_s10 + $0x10] sm:$0xff]  ;;  %430 = vrot.lane.b32.xlu1 %v427_v9, %s2102_s27  ;;  %291 = vrot.lane.b32.xlu0 %v288_v10, %s2103_s28  ;;  %v2191_v15 = vld [vmem:[%s2180_s10 + $0x18] sm:$0xff] }
  0x12   : > { %266 = vst [vmem:[#allocation2 + $0x28] sm:$0xff] %v2183_v12  ;;  %v2194_v16 = vld [vmem:[%s2180_s10 + $0x20] sm:$0xff]  ;;  %267 = vst [vmem:[#allocation2 + $0x30] sm:$0xff] %v2191_v15  ;;  %v2201_v18 = vld [vmem:[%s2180_s10 + $0x28] sm:$0xff]  ;;  %v2238_v31 = vpack.i.bf16 %v2183_v12, %v2101_v1 }
  0x13   : > { %1047 = vst [vmem:[#allocation2 + $0x28] sm:$0xf0] %v2101_v1  ;;  %1048 = vst [vmem:[#allocation2 + $0x30] sm:$0xf0] %v2101_v1  ;;  %v2224_v27 = vld [vmem:[%s2180_s10] sm:$0xff]  ;;  %v2227_v28 = vld [vmem:[%s2180_s10 + $0x8] sm:$0xff]  ;;  %v1825_v30 = vpack.i.bf16 %v2194_v16, %v2191_v15  ;;  %v1830_v32 = vpack.i.bf16 %v2101_v1, %v2201_v18 }
  0x14   : > { %v1815_v29 = vpack.i.bf16 %v2227_v28, %v2224_v27 }
  0x15   : > { %514 = vrot.lane.b32.xlu1 %v511_v13, %s2104_s13  ;;  %512 = vrot.lane.b32.xlu0 %v507_v14, %s2104_s13 }
  0x19   : > { %610 = vrot.lane.b32.xlu1 %v607_v19, %s2105_s16  ;;  %608 = vrot.lane.b32.xlu0 %v603_v20, %s2105_s16 }
  0x1d   : > { %692 = vrot.lane.b32.xlu1 %v689_v22, %s2106_s19  ;;  %690 = vrot.lane.b32.xlu0 %v685_v23, %s2106_s19 }
  0x21   : > { %829 = vrot.lane.b32.xlu1 %v826_v25, %s2107_s20  ;;  %827 = vrot.lane.b32.xlu0 %v822_v26, %s2107_s20 }
  0x25   : > { %1816 = vrot.lane.b32.xlu0 %v1815_v29, %s2108_s23  ;;  %1826 = vrot.lane.b32.xlu1 %v1825_v30, %s2108_s23 }
  0x29   : > { %1821 = vrot.lane.b32.xlu0 %v2238_v31, %s2108_s23  ;;  %383 = vrot.lane.b32.xlu1 %v2101_v1, %s2108_s23 }
  0x2d   : > { %1831 = vrot.lane.b32.xlu0 %v1830_v32, %s2108_s23 }
  0x7f   : > { %v429_v33 = vpop.permute.xlu1 %428  ;;  %v290_v34 = vpop.permute.xlu0 %289 }
  0x80   : > { %v298_v35 = vmul.f32 0.0, %v290_v34  ;;  %v437_v36 = vmul.f32 0.0, %v429_v33 }
  0x82   : > { %328 = vrot.lane.b32.xlu1 %v298_v35, %s2107_s20  ;;  %v1835_v37 = vpack.i.bf16 %v298_v35, %v298_v35  ;;  %v1840_v41 = vpack.i.bf16 %v437_v36, %v437_v36 }
  0x83   : > { %v431_v38 = vpop.permute.xlu1 %430  ;;  %v292_v39 = vpop.permute.xlu0 %291 }
  0x84   : > { %1836 = vrot.lane.b32.xlu0 %v1835_v37, %s2107_s20  ;;  %v294_v40 = vsel %vm293_vm0, %v290_v34, %v292_v39  ;;  %v303_v45 = vmul.f32 %v292_v39, %v2191_v15  ;;  %v300_v48 = vmul.f32 %v292_v39, %v2227_v28  ;;  %v306_v53 = vmul.f32 %v292_v39, %v2201_v18 }
  0x85   : > { %v302_v47 = vmul.f32 %v294_v40, %v2183_v12  ;;  %v299_v50 = vmul.f32 %v294_v40, %v2224_v27  ;;  %v305_v55 = vmul.f32 %v294_v40, %v2194_v16  ;;  %v433_v59 = vsel %vm432_vm1, %v429_v33, %v431_v38 }
  0x86   : > { %467 = vrot.lane.b32.xlu1 %v437_v36, %s2106_s19  ;;  %v439_v62 = vmul.f32 %v431_v38, %v2227_v28  ;;  %v438_v0 = vmul.f32 %v433_v59, %v2224_v27  ;;  %v442_v3 = vmul.f32 %v431_v38, %v2191_v15  ;;  %v441_v4 = vmul.f32 %v433_v59, %v2183_v12 }
  0x87   : > { %v515_v42 = vpop.permute.xlu1 %514  ;;  %v513_v43 = vpop.permute.xlu0 %512  ;;  %v1855_v54 = vpack.i.bf16 %v303_v45, %v302_v47  ;;  %v1850_v58 = vpack.i.bf16 %v300_v48, %v299_v50  ;;  %v1860_v60 = vpack.i.bf16 %v306_v53, %v305_v55  ;;  %v445_v10 = vmul.f32 %v431_v38, %v2201_v18 }
  0x88   : > { %v529_v44 = vmul.f32 %v515_v42, %v2201_v18  ;;  %1841 = vrot.lane.b32.xlu0 %v1840_v41, %s2106_s19  ;;  %v521_v46 = vmul.f32 0.0, %v513_v43  ;;  %v517_v2 = vsel %vm516_vm2, %v513_v43, %v515_v42  ;;  %v523_v7 = vmul.f32 %v515_v42, %v2227_v28 }
  0x89   : > { %v1870_v8 = vpack.i.bf16 %v439_v62, %v438_v0  ;;  %v522_v9 = vmul.f32 %v517_v2, %v2224_v27  ;;  %v1875_v11 = vpack.i.bf16 %v442_v3, %v441_v4  ;;  %v444_v13 = vmul.f32 %v433_v59, %v2194_v16  ;;  %v890_v62 = vld [vmem:[%s2616_s2 + $0x8] sm:$0xff]  ;;  %v947_v3 = vld [vmem:[%s2617_s3] sm:$0xff] }
  0x8a   : > { %551 = vrot.lane.b32.xlu1 %v521_v46, %s2105_s16  ;;  %v1845_v49 = vpack.i.bf16 %v521_v46, %v529_v44  ;;  %v525_v17 = vmul.f32 %v517_v2, %v2183_v12  ;;  %v526_v20 = vmul.f32 %v515_v42, %v2191_v15  ;;  %v528_v22 = vmul.f32 %v517_v2, %v2194_v16  ;;  %v1055_v4 = vld [vmem:[%s2615_s1] ss:$8 sm:$0x3] }
  0x8b   : > { %v611_v51 = vpop.permute.xlu1 %610  ;;  %v609_v52 = vpop.permute.xlu0 %608  ;;  %v1885_v14 = vpack.i.bf16 %v523_v7, %v522_v9  ;;  %v1880_v21 = vpack.i.bf16 %v445_v10, %v444_v13  ;;  %v1905_v36 = vpack.i.bf16 %v2101_v1, %v2227_v28  ;;  %v1935_v44 = vpack.i.bf16 %v2201_v18, %v2101_v1  ;;  %1695 = vmatprep.mubr.msk.f32.mxu0 %vm959_vm6, %v890_v62  ;;  %v948_v7 = vld [vmem:[%s2617_s3 + $0x8] sm:$0xf] }
  0x8c   : > { %1846 = vrot.lane.b32.xlu0 %v1845_v49, %s2105_s16  ;;  %v618_v56 = vmul.f32 0.0, %v611_v51  ;;  %v619_v57 = vmul.f32 %v609_v52, %v2183_v12  ;;  %v622_v61 = vmul.f32 %v609_v52, %v2194_v16  ;;  %v1890_v23 = vpack.i.bf16 %v525_v17, %v521_v46  ;;  %v1699_v17 = vld [vmem:[%s2615_s1 + $0x3] ss:$8 sm:$0x3] }
  0x8d   : > { %v612_v26 = vsel %vm557_vm3, %v609_v52, %v611_v51  ;;  %v1895_v29 = vpack.i.bf16 %v528_v22, %v526_v20  ;;  %v616_v38 = vmul.f32 %v609_v52, %v2224_v27  ;;  %v1930_v51 = vpack.i.bf16 %v2191_v15, %v2224_v27 }
  0x8e   : > { %1856 = vrot.lane.b32.xlu1 %v1855_v54, %s2107_s20  ;;  %v1865_v63 = vpack.i.bf16 %v619_v57, %v618_v56  ;;  %v617_v33 = vmul.f32 %v612_v26, %v2227_v28  ;;  %v623_v37 = vmul.f32 %v612_v26, %v2201_v18  ;;  %v620_v39 = vmul.f32 %v612_v26, %v2191_v15 }
  0x8f   : > { %v691_v19 = vpop.permute.xlu0 %690  ;;  %v693_v34 = vpop.permute.xlu1 %692  ;;  %v2110_v0 = vmov 0   ;;  %v1060_v9 = vrot.slane %v1055_v4, %v2161_v5  ;;  %v1064_v13 = vrot.slane %v1055_v4, %v2163_v6  ;;  %v1284_v20 = vrot.slane %v1699_v17, %v2161_v5 }
  0x90   : > { %1851 = vrot.lane.b32.xlu0 %v1850_v58, %s2107_s20  ;;  %v698_v24 = vmul.f32 %v691_v19, %v2224_v27  ;;  %v701_v25 = vmul.f32 %v691_v19, %v2183_v12  ;;  %v704_v30 = vmul.f32 %v691_v19, %v2194_v16  ;;  %v1910_v35 = vpack.i.bf16 %v618_v56, %v617_v33 }
  0x91   : > { %v694_v40 = vsel %vm473_vm4, %v691_v19, %v693_v34  ;;  %v1920_v41 = vpack.i.bf16 %v623_v37, %v618_v56  ;;  %v700_v42 = vmul.f32 0.0, %v693_v34  ;;  %v1915_v43 = vpack.i.bf16 %v620_v39, %v616_v38  ;;  %1970 = vset.pattern.permute.xlu1 %v2110_v0  ;;  %1971 = vset.pattern.permute.xlu0 %v2110_v0 }
  0x92   : > { %1861 = vrot.lane.b32.xlu1 %v1860_v60, %s2107_s20  ;;  %v1900_v32 = vpack.i.bf16 %v701_v25, %v698_v24  ;;  %v699_v45 = vmul.f32 %v694_v40, %v2227_v28  ;;  %v702_v46 = vmul.f32 %v694_v40, %v2191_v15  ;;  %v705_v52 = vmul.f32 %v694_v40, %v2201_v18  ;;  %v1701_v24 = vld [vmem:[%s2615_s1 + $0x5] ss:$8 sm:$0x3] }
  0x93   : > { %v830_v48 = vpop.permute.xlu1 %829  ;;  %v828_v49 = vpop.permute.xlu0 %827  ;;  %v1288_v25 = vrot.slane %v1699_v17, %v2163_v6  ;;  %v1440_v26 = vrot.slane %v1701_v24, %v2161_v5 }
  0x94   : > { %646 = vrot.lane.b32.xlu0 %v622_v61, %s2104_s13  ;;  %v1925_v47 = vpack.i.bf16 %v700_v42, %v699_v45  ;;  %v1945_v50 = vpack.i.bf16 %v700_v42, %v702_v46  ;;  %v831_v53 = vsel %vm334_vm5, %v828_v49, %v830_v48  ;;  %v837_v54 = vmul.f32 0.0, %v830_v48 }
  0x95   : > { %v1950_v55 = vpack.i.bf16 %v700_v42, %v705_v52  ;;  %v836_v56 = vmul.f32 %v831_v53, %v2227_v28  ;;  %v839_v58 = vmul.f32 %v831_v53, %v2191_v15  ;;  %v835_v59 = vmul.f32 %v828_v49, %v2224_v27 }
  0x96   : > { %1866 = vrot.lane.b32.xlu1 %v1865_v63, %s2104_s13  ;;  %v838_v60 = vmul.f32 %v828_v49, %v2183_v12  ;;  %v842_v63 = vmul.f32 %v831_v53, %v2201_v18  ;;  %v841_v2 = vmul.f32 %v828_v49, %v2194_v16 }
  0x97   : > { %v1955_v57 = vpack.i.bf16 %v837_v54, %v836_v56  ;;  %v1965_v61 = vpack.i.bf16 %v837_v54, %v839_v58  ;;  %v1827_v33 = vpop.permute.xlu1 %1826 }
  0x98   : > { %1871 = vrot.lane.b32.xlu0 %v1870_v8, %s2106_s19  ;;  %v1697_v8 = vld [vmem:[%s2615_s1 + $0x1] ss:$8 sm:$0x3]  ;;  %v1829_v46 = vunpack.i.h.bf16 %v1827_v33  ;;  %v1828_v49 = vunpack.i.l.bf16 %v1827_v33 }
  0x99   : > { %v1156_v10 = vrot.slane %v1697_v8, %v2161_v5  ;;  %v1160_v19 = vrot.slane %v1697_v8, %v2163_v6 }
  0x9a   : > { %1876 = vrot.lane.b32.xlu1 %v1875_v11, %s2106_s19  ;;  %v1698_v11 = vld [vmem:[%s2615_s1 + $0x2] ss:$8 sm:$0x3] }
  0x9b   : > { %v1220_v22 = vrot.slane %v1698_v11, %v2163_v6 }
  0x9c   : > { %1886 = vrot.lane.b32.xlu0 %v1885_v14, %s2105_s16  ;;  %v1216_v14 = vrot.slane %v1698_v11, %v2161_v5 }
  0x9e   : > { %1881 = vrot.lane.b32.xlu1 %v1880_v21, %s2106_s19  ;;  %v1700_v21 = vld [vmem:[%s2615_s1 + $0x4] ss:$8 sm:$0x3] }
  0xa0   : > { %1891 = vrot.lane.b32.xlu0 %v1890_v23, %s2105_s16  ;;  %v1344_v23 = vrot.slane %v1700_v21, %v2161_v5 }
  0xa2   : > { %1896 = vrot.lane.b32.xlu1 %v1895_v29, %s2105_s16  ;;  %v1348_v29 = vrot.slane %v1700_v21, %v2163_v6 }
  0xa4   : > { %728 = vrot.lane.b32.xlu0 %v704_v30, %s2102_s27  ;;  %v1444_v30 = vrot.slane %v1701_v24, %v2163_v6 }
  0xa6   : > { %1901 = vrot.lane.b32.xlu1 %v1900_v32, %s2102_s27  ;;  %v1817_v32 = vpop.permute.xlu0 %1816 }
  0xa7   : > { %v1818_v45 = vunpack.i.l.bf16 %v1817_v32 }
  0xa8   : > { %1911 = vrot.lane.b32.xlu0 %v1910_v35, %s2104_s13  ;;  %v384_v35 = vpop.permute.xlu1 %383 }
  0xaa   : > { %1906 = vrot.lane.b32.xlu1 %v1905_v36, %s2109_s24  ;;  %v1822_v34 = vpop.permute.xlu0 %1821 }
  0xab   : > { %v1824_v53 = vunpack.i.h.bf16 %v1822_v34  ;;  %v1823_v62 = vunpack.i.l.bf16 %v1822_v34 }
  0xac   : > { %1921 = vrot.lane.b32.xlu0 %v1920_v41, %s2104_s13 }
  0xad   : > { %v390_v17 = vsel %vm389_vm7, %v1823_v62, %v1818_v45 }
  0xae   : > { %1916 = vrot.lane.b32.xlu1 %v1915_v43, %s2104_s13  ;;  %v1832_v36 = vpop.permute.xlu0 %1831 }
  0xb0   : > { %1936 = vrot.lane.b32.xlu0 %v1935_v44, %s2109_s24  ;;  %v1819_v44 = vunpack.i.h.bf16 %v1817_v32 }
  0xb2   : > { %1926 = vrot.lane.b32.xlu1 %v1925_v47, %s2102_s27  ;;  %v391_v4 = vsel %vm389_vm7, %v1818_v45, %v1819_v44 }
  0xb4   : > { %1946 = vrot.lane.b32.xlu0 %v1945_v50, %s2102_s27 }
  0xb6   : > { %1931 = vrot.lane.b32.xlu1 %v1930_v51, %s2109_s24 }
  0xb8   : > { %1951 = vrot.lane.b32.xlu0 %v1950_v55, %s2102_s27 }
  0xba   : > { %1941 = vrot.lane.b32.xlu1 %v2238_v31, %s2109_s24  ;;  %v1960_v31 = vpack.i.bf16 %v838_v60, %v835_v59 }
  0xbc   : > { %782 = vrot.lane.b32.xlu0 %v2194_v16, %s2109_s24 }
  0xbe   : > { %1956 = vrot.lane.b32.xlu1 %v1955_v57, %s2103_s28 }
  0xc0   : > { %1966 = vrot.lane.b32.xlu0 %v1965_v61, %s2103_s28 }
  0xc2   : > { %1961 = vrot.lane.b32.xlu1 %v1960_v31, %s2103_s28 }
  0xc4   : > { %867 = vrot.lane.b32.xlu0 %v842_v63, %s2103_s28 }
  0xc6   : > { %869 = vrot.lane.b32.xlu1 %v837_v54, %s2103_s28  ;;  %v1833_v54 = vunpack.i.l.bf16 %v1832_v36 }
  0xc8   : > { %865 = vrot.lane.b32.xlu0 %v841_v2, %s2103_s28  ;;  %v1834_v2 = vunpack.i.h.bf16 %v1832_v36  ;;  %v395_v11 = vsel %vm389_vm7, %v1829_v46, %v1833_v54 }
  0xca   : > { %951 = vperm.xlu1 %1970, %v947_v3  }
  0xcc   : > { %956 = vperm.xlu0 %1971, %v948_v7  }
  0xce   : > { %1065 = vrot.lane.b32.xlu1 %v1060_v9, %s2103_s28 }
  0xd0   : > { %1161 = vrot.lane.b32.xlu0 %v1156_v10, %s2102_s27  ;;  %v393_v10 = vsel %vm389_vm7, %v1824_v53, %v1828_v49 }
  0xd1   : > { %v1716_v24 = vpack.c.bf16 %v395_v11, %v393_v10 }
  0xd2   : > { %1067 = vrot.lane.b32.xlu1 %v1064_v13, %s2103_s28  ;;  %v394_v13 = vsel %vm389_vm7, %v384_v35, %v1829_v46 }
  0xd4   : > { %1221 = vrot.lane.b32.xlu0 %v1216_v14, %s2104_s13 }
  0xd6   : > { %1163 = vrot.lane.b32.xlu1 %v1160_v19, %s2102_s27  ;;  %v392_v19 = vsel %vm389_vm7, %v1834_v2, %v1824_v53 }
  0xd8   : > { %1289 = vrot.lane.b32.xlu0 %v1284_v20, %s2105_s16 }
  0xda   : > { %1223 = vrot.lane.b32.xlu1 %v1220_v22, %s2104_s13 }
  0xdc   : > { %1349 = vrot.lane.b32.xlu0 %v1344_v23, %s2106_s19 }
  0xde   : > { %1291 = vrot.lane.b32.xlu1 %v1288_v25, %s2105_s16 }
  0xe0   : > { %1445 = vrot.lane.b32.xlu0 %v1440_v26, %s2107_s20 }
  0xe2   : > { %1351 = vrot.lane.b32.xlu1 %v1348_v29, %s2106_s19  ;;  %v1718_v29 = vpack.c.bf16 %v394_v13, %v392_v19 }
  0xe6   : > { %1447 = vrot.lane.b32.xlu1 %v1444_v30, %s2107_s20 }
  0xea   : > { %1978 = vrot.lane.b32.xlu1 %v2101_v1, %s2108_s23 }
  0xf4   : > { %v329_v37 = vpop.permute.xlu1 %328 }
  0xf6   : > { %v1837_v38 = vpop.permute.xlu0 %1836 }
  0xf7   : > { %v1839_v47 = vunpack.i.h.bf16 %v1837_v38  ;;  %v1838_v50 = vunpack.i.l.bf16 %v1837_v38 }
  0xf8   : > { %v2386_v5 = vpop.permute.xlu1 %467 }
  0xfa   : > { %v2388_v39 = vpop.permute.xlu0 %1841 }
  0xfb   : > { %v1844_v30 = vunpack.i.h.bf16 %v2388_v39 }
  0xfc   : > { %v2390_v40 = vpop.permute.xlu1 %551 }
  0xfe   : > { %v2392_v41 = vpop.permute.xlu0 %1846 }
  0xff   : > { %v1849_v62 = vunpack.i.h.bf16 %v2392_v41 }
 0x100   : > { %v1857_v42 = vpop.permute.xlu1 %1856 }
 0x101   : > { %v1859_v6 = vunpack.i.h.bf16 %v1857_v42  ;;  %v1858_v43 = vunpack.i.l.bf16 %v1857_v42 }
 0x102   : > { %v1852_v48 = vpop.permute.xlu0 %1851 }
 0x103   : > { %v1854_v51 = vunpack.i.h.bf16 %v1852_v48  ;;  %v1853_v52 = vunpack.i.l.bf16 %v1852_v48  ;;  %v338_v56 = vsel %vm334_vm5, %v1858_v43, %v1859_v6  ;;  %v337_v57 = vsel %vm334_vm5, %v1839_v47, %v1858_v43 }
 0x104   : > { %v1862_v55 = vpop.permute.xlu1 %1861 }
 0x105   : > { %v1864_v58 = vunpack.i.h.bf16 %v1862_v55  ;;  %v1863_v59 = vunpack.i.l.bf16 %v1862_v55  ;;  %v336_v60 = vsel %vm334_vm5, %v1853_v52, %v1854_v51  ;;  %v335_v61 = vsel %vm334_vm5, %v1838_v50, %v1853_v52 }
 0x106   : > { %v2398_v31 = vpop.permute.xlu0 %646  ;;  %v1708_v63 = vpack.c.bf16 %v338_v56, %v336_v60  ;;  %v1710_v0 = vpack.c.bf16 %v337_v57, %v335_v61  ;;  %v1848_v51 = vunpack.i.l.bf16 %v2392_v41  ;;  %v1734_v41 = vpack.c.bf16 %v2183_v12, %v2224_v27 }
 0x107   : > { %v340_v3 = vsel %vm334_vm5, %v1863_v59, %v1864_v58  ;;  %v339_v9 = vsel %vm334_vm5, %v329_v37, %v1863_v59  ;;  %v1843_v37 = vunpack.i.l.bf16 %v2388_v39 }
 0x108   : > { %v2402_v7 = vpop.permute.xlu1 %1866  ;;  %1709 = vmatprep.subr.bf16.mxu0 %v1708_v63  ;;  %v1712_v8 = vpack.c.bf16 %v391_v4, %v340_v3  ;;  %v1714_v22 = vpack.c.bf16 %v390_v17, %v339_v9  ;;  %v1732_v4 = vpack.c.bf16 %v2191_v15, %v2227_v28 }
 0x109   : > { %1711 = vmatpush1.bf16.msra.mxu0 %v1710_v0 }
 0x10a   : > { %v1872_v14 = vpop.permute.xlu0 %1871  ;;  %1713 = vmatprep.subr.bf16.mxu0 %v1712_v8 }
 0x10b   : > { %v1874_v20 = vunpack.i.h.bf16 %v1872_v14  ;;  %v1873_v21 = vunpack.i.l.bf16 %v1872_v14 }
 0x10c   : > { %v1877_v23 = vpop.permute.xlu1 %1876 }
 0x10d   : > { %v1879_v25 = vunpack.i.h.bf16 %v1877_v23  ;;  %v1878_v26 = vunpack.i.l.bf16 %v1877_v23  ;;  %1715 = vmatpush1.bf16.msra.mxu0 %v1714_v22  ;;  %v475_v35 = vsel %vm473_vm4, %v1873_v21, %v1874_v20  ;;  %v474_v46 = vsel %vm473_vm4, %v1843_v37, %v1873_v21 }
 0x10e   : > { %v1887_v32 = vpop.permute.xlu0 %1886  ;;  %1717 = vmatprep.subr.bf16.mxu0 %v1716_v24  ;;  %v1868_v20 = vunpack.i.l.bf16 %v2402_v7  ;;  %v1869_v23 = vunpack.i.h.bf16 %v2402_v7 }
 0x10f   : > { %v1889_v33 = vunpack.i.h.bf16 %v1887_v32  ;;  %v1888_v34 = vunpack.i.l.bf16 %v1887_v32  ;;  %v477_v36 = vsel %vm473_vm4, %v1878_v26, %v1879_v25  ;;  %v476_v6 = vsel %vm473_vm4, %v1844_v30, %v1878_v26 }
 0x110   : > { %v1882_v38 = vpop.permute.xlu1 %1881  ;;  %v1720_v42 = vpack.c.bf16 %v477_v36, %v475_v35  ;;  %v1722_v48 = vpack.c.bf16 %v476_v6, %v474_v46 }
 0x111   : > { %v1884_v43 = vunpack.i.h.bf16 %v1882_v38  ;;  %v1883_v44 = vunpack.i.l.bf16 %v1882_v38  ;;  %1719 = vmatpush1.bf16.msra.mxu0 %v1718_v29  ;;  %v559_v50 = vsel %vm557_vm3, %v1888_v34, %v1889_v33 }
 0x112   : > { %v1892_v45 = vpop.permute.xlu0 %1891  ;;  %1721 = vmatprep.subr.bf16.mxu0 %v1720_v42 }
 0x113   : > { %v1893_v47 = vunpack.i.l.bf16 %v1892_v45  ;;  %v479_v49 = vsel %vm473_vm4, %v1883_v44, %v1884_v43  ;;  %v1894_v39 = vunpack.i.h.bf16 %v1892_v45  ;;  %v478_v56 = vsel %vm473_vm4, %v2386_v5, %v1883_v44 }
 0x114   : > { %v1897_v52 = vpop.permute.xlu1 %1896  ;;  %v1724_v53 = vpack.c.bf16 %v559_v50, %v479_v49 }
 0x115   : > { %v1899_v54 = vunpack.i.h.bf16 %v1897_v52  ;;  %v1898_v55 = vunpack.i.l.bf16 %v1897_v52  ;;  %1723 = vmatpush1.bf16.msra.mxu0 %v1722_v48  ;;  %v558_v57 = vsel %vm557_vm3, %v1893_v47, %v1888_v34  ;;  %v560_v5 = vsel %vm557_vm3, %v1849_v62, %v1894_v39 }
 0x116   : > { %v2422_v58 = vpop.permute.xlu0 %728  ;;  %1725 = vmatprep.subr.bf16.mxu0 %v1724_v53  ;;  %v1726_v59 = vpack.c.bf16 %v558_v57, %v478_v56 }
 0x117   : > { %v561_v60 = vsel %vm557_vm3, %v1894_v39, %v1898_v55  ;;  %v563_v61 = vsel %vm557_vm3, %v1899_v54, %v1848_v51  ;;  %v562_v2 = vsel %vm557_vm3, %v2390_v40, %v1899_v54 }
 0x118   : > { %v1902_v63 = vpop.permute.xlu1 %1901  ;;  %v1728_v0 = vpack.c.bf16 %v563_v61, %v561_v60  ;;  %v1730_v10 = vpack.c.bf16 %v562_v2, %v560_v5 }
 0x119   : > { %1727 = vmatpush1.bf16.msra.mxu0 %v1726_v59  ;;  %v1904_v34 = vunpack.i.h.bf16 %v1902_v63  ;;  %v1903_v37 = vunpack.i.l.bf16 %v1902_v63 }
 0x11a   : > { %v1912_v3 = vpop.permute.xlu0 %1911  ;;  %1729 = vmatprep.subr.bf16.mxu0 %v1728_v0 }
 0x11b   : > { %v1914_v8 = vunpack.i.h.bf16 %v1912_v3  ;;  %v1913_v9 = vunpack.i.l.bf16 %v1912_v3 }
 0x11c   : > { %v2432_v11 = vpop.permute.xlu1 %1906 }
 0x11d   : > { %1731 = vmatpush1.bf16.msra.mxu0 %v1730_v10  ;;  %v653_v13 = vsel %vm516_vm2, %v1913_v9, %v1914_v8  ;;  %v1909_v38 = vunpack.i.h.bf16 %v2432_v11  ;;  %v1908_v42 = vunpack.i.l.bf16 %v2432_v11 }
 0x11e   : > { %v1922_v40 = vpop.permute.xlu0 %1921  ;;  %1733 = vmatprep.subr.bf16.mxu0 %v1732_v4  ;;  %v1736_v19 = vpack.c.bf16 %v653_v13, %v2201_v18 }
 0x11f   : > { %v1924_v14 = vunpack.i.h.bf16 %v1922_v40  ;;  %v1923_v15 = vunpack.i.l.bf16 %v1922_v40  ;;  %v790_v55 = vsel %vm788_vm8, %v1908_v42, %v1909_v38 }
 0x120   : > { %v1917_v17 = vpop.permute.xlu1 %1916 }
 0x121   : > { %v1919_v28 = vunpack.i.h.bf16 %v1917_v17  ;;  %v1918_v21 = vunpack.i.l.bf16 %v1917_v17  ;;  %1735 = vmatpush1.bf16.msra.mxu0 %v1734_v41  ;;  %v657_v24 = vsel %vm516_vm2, %v1924_v14, %v1868_v20  ;;  %v656_v7 = vsel %vm516_vm2, %v2398_v31, %v1924_v14 }
 0x122   : > { %v1937_v22 = vpop.permute.xlu0 %1936  ;;  %1737 = vmatprep.subr.bf16.mxu0 %v1736_v19 }
 0x123   : > { %v652_v12 = vsel %vm516_vm2, %v1918_v21, %v1913_v9  ;;  %v655_v27 = vsel %vm516_vm2, %v1919_v28, %v1923_v15  ;;  %v654_v32 = vsel %vm516_vm2, %v1869_v23, %v1919_v28  ;;  %v1939_v39 = vunpack.i.h.bf16 %v1937_v22 }
 0x124   : > { %v1927_v25 = vpop.permute.xlu1 %1926  ;;  %v1738_v26 = vpack.c.bf16 %v652_v12, %v2194_v16  ;;  %v1740_v18 = vpack.c.bf16 %v657_v24, %v655_v27  ;;  %v1742_v6 = vpack.c.bf16 %v656_v7, %v654_v32  ;;  %v1938_v52 = vunpack.i.l.bf16 %v1937_v22 }
 0x125   : > { %v1929_v29 = vunpack.i.h.bf16 %v1927_v25  ;;  %v1928_v30 = vunpack.i.l.bf16 %v1927_v25 }
 0x126   : > { %v1947_v33 = vpop.permute.xlu0 %1946  ;;  %1739 = vmatpush1.bf16.msra.mxu0 %v1738_v26  ;;  %v889_v26 = vld [vmem:[%s2616_s2] sm:$0xff] }
 0x127   : > { %v1949_v35 = vunpack.i.h.bf16 %v1947_v33  ;;  %v1948_v36 = vunpack.i.l.bf16 %v1947_v33  ;;  %1741 = vmatprep.subr.bf16.mxu0 %v1740_v18  ;;  %v735_v43 = vsel %vm432_vm1, %v1928_v30, %v1929_v29  ;;  %v734_v48 = vsel %vm432_vm1, %v1903_v37, %v1928_v30  ;;  %v892_v29 = vld [vmem:[%s2616_s2 + $0x18] sm:$0xf]  ;;  %v891_v30 = vld [vmem:[%s2616_s2 + $0x10] sm:$0xf] }
 0x128   : > { %v1932_v16 = vpop.permute.xlu1 %1931 }
 0x129   : > { %v737_v44 = vsel %vm432_vm1, %v1948_v36, %v1949_v35  ;;  %v736_v45 = vsel %vm432_vm1, %v1904_v34, %v1948_v36  ;;  %v1934_v31 = vunpack.i.h.bf16 %v1932_v16  ;;  %v1933_v49 = vunpack.i.l.bf16 %v1932_v16 }
 0x12a   : > { %v1952_v46 = vpop.permute.xlu0 %1951  ;;  %1743 = vmatpush1.bf16.msra.mxu0 %v1742_v6  ;;  %v1744_v47 = vpack.c.bf16 %v737_v44, %v735_v43  ;;  %v1746_v54 = vpack.c.bf16 %v736_v45, %v734_v48 }
 0x12b   : > { %v1954_v50 = vunpack.i.h.bf16 %v1952_v46  ;;  %v1953_v51 = vunpack.i.l.bf16 %v1952_v46  ;;  %v789_v63 = vsel %vm788_vm8, %v1933_v49, %v1908_v42  ;;  %v792_v0 = vsel %vm788_vm8, %v1934_v31, %v1938_v52 }
 0x12c   : > { %v1942_v53 = vpop.permute.xlu1 %1941  ;;  %1745 = vmatprep.subr.bf16.mxu0 %v1744_v47 }
 0x12d   : > { %v1944_v56 = vunpack.i.h.bf16 %v1942_v53  ;;  %v1943_v57 = vunpack.i.l.bf16 %v1942_v53  ;;  %v739_v59 = vsel %vm432_vm1, %v1953_v51, %v1954_v50  ;;  %v738_v60 = vsel %vm432_vm1, %v2422_v58, %v1953_v51 }
 0x12e   : > { %v783_v61 = vpop.permute.xlu0 %782  ;;  %1747 = vmatpush1.bf16.msra.mxu0 %v1746_v54  ;;  %v1748_v62 = vpack.c.bf16 %v790_v55, %v739_v59  ;;  %v1750_v5 = vpack.c.bf16 %v789_v63, %v738_v60 }
 0x12f   : > { %v794_v2 = vsel %vm788_vm8, %v1939_v39, %v1943_v57  ;;  %v791_v8 = vsel %vm788_vm8, %v1944_v56, %v1934_v31  ;;  %v793_v9 = vsel %vm788_vm8, %v783_v61, %v1939_v39 }
 0x130   : > { %v1957_v3 = vpop.permute.xlu1 %1956  ;;  %1749 = vmatprep.subr.bf16.mxu0 %v1748_v62  ;;  %v1752_v4 = vpack.c.bf16 %v794_v2, %v792_v0  ;;  %v1754_v40 = vpack.c.bf16 %v793_v9, %v791_v8 }
 0x131   : > { %v1959_v10 = vunpack.i.h.bf16 %v1957_v3  ;;  %v1958_v11 = vunpack.i.l.bf16 %v1957_v3 }
 0x132   : > { %v1967_v58 = vpop.permute.xlu0 %1966  ;;  %1751 = vmatpush1.bf16.msra.mxu0 %v1750_v5 }
 0x133   : > { %v1969_v41 = vunpack.i.h.bf16 %v1967_v58  ;;  %v1968_v13 = vunpack.i.l.bf16 %v1967_v58  ;;  %1753 = vmatprep.subr.bf16.mxu0 %v1752_v4  ;;  %v872_v20 = vsel %vm293_vm0, %v1958_v11, %v1959_v10 }
 0x134   : > { %v1962_v14 = vpop.permute.xlu1 %1961 }
 0x135   : > { %v1964_v17 = vunpack.i.h.bf16 %v1962_v14  ;;  %v1963_v19 = vunpack.i.l.bf16 %v1962_v14  ;;  %v874_v15 = vsel %vm293_vm0, %v1968_v13, %v1969_v41 }
 0x136   : > { %v868_v28 = vpop.permute.xlu0 %867  ;;  %1755 = vmatpush1.bf16.msra.mxu0 %v1754_v40  ;;  %v1756_v21 = vpack.c.bf16 %v874_v15, %v872_v20 }
 0x137   : > { %v871_v22 = vsel %vm293_vm0, %v1963_v19, %v1958_v11  ;;  %v873_v23 = vsel %vm293_vm0, %v1964_v17, %v1968_v13 }
 0x138   : > { %v870_v12 = vpop.permute.xlu1 %869  ;;  %1757 = vmatprep.subr.bf16.mxu0 %v1756_v21  ;;  %v1758_v27 = vpack.c.bf16 %v873_v23, %v871_v22  ;;  %v2092_v21 = vld [vmem:[#allocation2] sm:$0xff] }
 0x139   : > { %v876_v24 = vsel %vm293_vm0, %v868_v28, %v870_v12 }
 0x13a   : > { %v866_v25 = vpop.permute.xlu0 %865  ;;  %1759 = vmatpush1.bf16.msra.mxu0 %v1758_v27 }
 0x13b   : > { %1018 = vmatprep.subr.mxu0 %v876_v24  ;;  %v875_v18 = vsel %vm293_vm0, %v866_v25, %v868_v28 }
 0x13e   : > { %1019 = vmatpush1.msra.mxu0 %v875_v18 }
 0x13f   : > { %1031 = vmatmul.mubr.f32.vlgmr.msra.gmra.mrb[0].mxu0 %v889_v26 }
 0x140   : > { %1696 = vmatprep.mubr.msk.f32.mxu0 %vm959_vm6, %v892_v29 }
 0x143   : > { %1037 = vmatmul.mubr.f32.gmra.mrb[2].mxu0 %v891_v30 }
 0x149   : > { %v952_v32 = vpop.permute.xlu1 %951 }
 0x14b   : > { %v957_v33 = vpop.permute.xlu0 %956 }
 0x14d   : > { %v1066_v34 = vpop.permute.xlu1 %1065 }
 0x14e   : > { %v1073_v35 = vmul.f32 0.0, %v1066_v34 }
 0x14f   : > { %v1162_v36 = vpop.permute.xlu0 %1161 }
 0x150   : > { %v1169_v7 = vmul.f32 0.0, %v1162_v36  ;;  %v1972_v37 = vpack.i.bf16 %v1073_v35, %v1073_v35 }
 0x151   : > { %v1068_v42 = vpop.permute.xlu1 %1067 }
 0x152   : > { %1973 = vrot.lane.b32.xlu0 %v1972_v37, %s2107_s20  ;;  %v1982_v38 = vpack.i.bf16 %v1169_v7, %v1169_v7  ;;  %v1069_v6 = vsel %vm293_vm0, %v1066_v34, %v1068_v42 }
 0x153   : > { %v1222_v48 = vpop.permute.xlu0 %1221 }
 0x154   : > { %v1229_v22 = vmul.f32 %v2092_v21, %v1222_v48 }
 0x155   : > { %v1164_v16 = vpop.permute.xlu1 %1163 }
 0x156   : > { %1983 = vrot.lane.b32.xlu0 %v1982_v38, %s2106_s19  ;;  %v1165_v46 = vsel %vm432_vm1, %v1162_v36, %v1164_v16  ;;  %v2022_v30 = vpack.i.bf16 %v1229_v22, %v1229_v22 }
 0x157   : > { %v1290_v0 = vpop.permute.xlu0 %1289 }
 0x159   : > { %v1224_v47 = vpop.permute.xlu1 %1223 }
 0x15a   : > { %v1225_v49 = vsel %vm516_vm2, %v1222_v48, %v1224_v47 }
 0x15b   : > { %v1350_v27 = vpop.permute.xlu0 %1349 }
 0x15d   : > { %v1292_v63 = vpop.permute.xlu1 %1291 }
 0x15e   : > { %v1293_v2 = vsel %vm557_vm3, %v1290_v0, %v1292_v63  ;;  %v1299_v8 = vmul.f32 0.0, %v1292_v63 }
 0x15f   : > { %v1446_v7 = vpop.permute.xlu0 %1445 }
 0x161   : > { %v1352_v12 = vpop.permute.xlu1 %1351 }
 0x162   : > { %v1353_v25 = vsel %vm473_vm4, %v1350_v27, %v1352_v12  ;;  %v1359_v18 = vmul.f32 %v2092_v21, %v1352_v12 }
 0x165   : > { %v1448_v36 = vpop.permute.xlu1 %1447 }
 0x212   : > { %v1032_v43 = vpop.f32.mrb[0].mxu0 }
 0x213   : > { %v2483_v44 = vadd.f32 %v1032_v43, %v952_v32  ;;  %v1034_v45 = vpop.f32.mrb[1].mxu0 }
 0x214   : > { %v2486_v31 = vadd.f32 %v1034_v45, %v952_v32 }
 0x215   : > { %v1074_v1 = vmul.f32 %v1069_v6, %v2483_v44  ;;  %v1170_v54 = vmul.f32 %v1165_v46, %v2483_v44  ;;  %v1230_v57 = vmul.f32 %v1225_v49, %v2483_v44  ;;  %v1297_v23 = vmul.f32 %v1290_v0, %v2483_v44 }
 0x216   : > { %v1038_v50 = vpop.f32.mrb[2].mxu0  ;;  %v1987_v51 = vpack.i.bf16 %v2486_v31, %v2483_v44  ;;  %v1075_v53 = vmul.f32 %v1068_v42, %v2486_v31  ;;  %v1171_v55 = vmul.f32 %v1164_v16, %v2486_v31  ;;  %v1231_v59 = vmul.f32 %v1224_v47, %v2486_v31 }
 0x217   : > { %v1039_v39 = vadd.f32 %v1038_v50, %v957_v33  ;;  %v1040_v52 = vpop.f32.mrb[3].mxu0  ;;  %v1298_v9 = vmul.f32 %v1293_v2, %v2486_v31  ;;  %v1358_v29 = vmul.f32 %v1353_v25, %v2486_v31  ;;  %v1526_v50 = vld [vmem:[%s2619_s5] sm:$0x3] }
 0x218   : > { %v1041_v56 = vadd.f32 %v1040_v52, %v957_v33  ;;  %1988 = vrot.lane.b32.xlu1 %v1987_v51, %s2108_s23  ;;  %v1992_v60 = vpack.i.bf16 %v1075_v53, %v1074_v1  ;;  %v1997_v61 = vpack.i.bf16 %v1171_v55, %v1170_v54  ;;  %v2012_v62 = vpack.i.bf16 %v1231_v59, %v1230_v57  ;;  %v2555_v51 = vld.sshfl [vmem:[%s2618_s4] sm:$0x33 pattern:$0x76325410] }
 0x219   : > { %1045 = vst [vmem:[#allocation2 + $0x28] sm:$0xf] %v1039_v39  ;;  %v2027_v41 = vpack.i.bf16 %v1299_v8, %v1298_v9  ;;  %v2057_v33 = vpack.i.bf16 %v2092_v21, %v2486_v31  ;;  %v2042_v34 = vpack.i.bf16 %v1359_v18, %v1358_v29  ;;  %v1540_v39 = vcombine.high %v2555_v51, %v2555_v51 }
 0x21a   : > { %1046 = vst [vmem:[#allocation2 + $0x30] sm:$0xf] %v1041_v56  ;;  %1993 = vrot.lane.b32.xlu0 %v1992_v60, %s2107_s20  ;;  %v1453_v54 = vmul.f32 %v1446_v7, %v2483_v44  ;;  %v1974_v56 = vpop.permute.xlu0 %1973  ;;  %v1979_v60 = vpop.permute.xlu1 %1978 }
 0x21b   : > { %1703 = vmatprep.mubr.msk.f32.mxu1 %vm389_vm7, %v1540_v39 }
 0x21e   : > { %1998 = vrot.lane.b32.xlu0 %v1997_v61, %s2106_s19  ;;  %v1984_v57 = vpop.permute.xlu0 %1983 }
 0x220   : > { %v2501_v3 = vld [vmem:[#allocation2 + $0x28] sm:$0xff] }
 0x221   : > { %v2503_v5 = vld [vmem:[#allocation2 + $0x30] sm:$0xff]  ;;  %v1077_v4 = vmul.f32 %v2501_v3, %v1069_v6  ;;  %v1233_v13 = vmul.f32 %v2501_v3, %v1225_v49  ;;  %v1778_v17 = vpack.c.bf16 %v2501_v3, %v2483_v44  ;;  %v1173_v19 = vmul.f32 %v2501_v3, %v1165_v46 }
 0x222   : > { %v1078_v10 = vmul.f32 %v2503_v5, %v1068_v42  ;;  %v2002_v11 = vpack.i.bf16 %v2503_v5, %v2501_v3  ;;  %v1234_v40 = vmul.f32 %v2503_v5, %v1224_v47  ;;  %v1776_v14 = vpack.c.bf16 %v2503_v5, %v2486_v31 }
 0x223   : > { %v1174_v20 = vmul.f32 %v2503_v5, %v1164_v16  ;;  %v1300_v28 = vmul.f32 %v2501_v3, %v1290_v0  ;;  %v1361_v32 = vmul.f32 %v1353_v25, %v2503_v5  ;;  %v1301_v35 = vmul.f32 %v2503_v5, %v1293_v2 }
 0x224   : > { %v2007_v58 = vpack.i.bf16 %v1078_v10, %v1077_v4  ;;  %2003 = vrot.lane.b32.xlu0 %v2002_v11, %s2108_s23  ;;  %v2032_v15 = vpack.i.bf16 %v1234_v40, %v1233_v13  ;;  %v1360_v38 = vmul.f32 %v1350_v27, %v2501_v3  ;;  %v1449_v16 = vsel %vm334_vm5, %v1446_v7, %v1448_v36 }
 0x225   : > { %v2017_v24 = vpack.i.bf16 %v1174_v20, %v1173_v19  ;;  %v2037_v26 = vpack.i.bf16 %v1300_v28, %v1297_v23  ;;  %v2067_v37 = vpack.i.bf16 %v1359_v18, %v1361_v32  ;;  %v2047_v42 = vpack.i.bf16 %v1299_v8, %v1301_v35 }
 0x226   : > { %2008 = vrot.lane.b32.xlu1 %v2007_v58, %s2107_s20  ;;  %v1357_v6 = vmul.f32 %v1350_v27, %v2483_v44  ;;  %v1457_v43 = vmul.f32 %v1449_v16, %v2503_v5  ;;  %v2072_v45 = vpack.i.bf16 %v2501_v3, %v2483_v44  ;;  %v1455_v46 = vmul.f32 %v2092_v21, %v1448_v36 }
 0x227   : > { %v1454_v49 = vmul.f32 %v1449_v16, %v2486_v31  ;;  %v2062_v1 = vpack.i.bf16 %v2092_v21, %v2503_v5  ;;  %v1456_v52 = vmul.f32 %v1446_v7, %v2501_v3  ;;  %v1975_v4 = vunpack.i.l.bf16 %v1974_v56 }
 0x228   : > { %2028 = vrot.lane.b32.xlu0 %v2027_v41, %s2104_s13  ;;  %v2052_v47 = vpack.i.bf16 %v1360_v38, %v1357_v6  ;;  %v2082_v48 = vpack.i.bf16 %v1455_v46, %v1457_v43  ;;  %v1976_v10 = vunpack.i.h.bf16 %v1974_v56  ;;  %v1981_v19 = vunpack.i.h.bf16 %v1979_v60 }
 0x229   : > { %v2077_v53 = vpack.i.bf16 %v1455_v46, %v1454_v49  ;;  %v2087_v55 = vpack.i.bf16 %v1456_v52, %v1453_v54  ;;  %v1980_v20 = vunpack.i.l.bf16 %v1979_v60 }
 0x22a   : > { %2013 = vrot.lane.b32.xlu1 %v2012_v62, %s2105_s16 }
 0x22c   : > { %2033 = vrot.lane.b32.xlu0 %v2032_v15, %s2105_s16 }
 0x22e   : > { %2018 = vrot.lane.b32.xlu1 %v2017_v24, %s2106_s19 }
 0x230   : > { %2038 = vrot.lane.b32.xlu0 %v2037_v26, %s2104_s13 }
 0x232   : > { %2023 = vrot.lane.b32.xlu1 %v2022_v30, %s2105_s16 }
 0x234   : > { %2058 = vrot.lane.b32.xlu0 %v2057_v33, %s2109_s24 }
 0x236   : > { %2043 = vrot.lane.b32.xlu1 %v2042_v34, %s2102_s27  ;;  %v1985_v34 = vunpack.i.l.bf16 %v1984_v57 }
 0x238   : > { %2068 = vrot.lane.b32.xlu0 %v2067_v37, %s2102_s27  ;;  %v1986_v37 = vunpack.i.h.bf16 %v1984_v57 }
 0x23a   : > { %2048 = vrot.lane.b32.xlu1 %v2047_v42, %s2104_s13 }
 0x23c   : > { %2073 = vrot.lane.b32.xlu0 %v2072_v45, %s2109_s24 }
 0x23e   : > { %2053 = vrot.lane.b32.xlu1 %v2052_v47, %s2102_s27  ;;  %s1707_s27 = sshll.u32 %s2622_s22, 2 }
 0x240   : > { %2083 = vrot.lane.b32.xlu0 %v2082_v48, %s2103_s28 }
 0x242   : > { %2063 = vrot.lane.b32.xlu1 %v2062_v1, %s2109_s24  ;;  %s251_s24 = scalar_lea.vmem %s2620_s6, %s1707_s27 }
 0x244   : > { %1529 = vperm.xlu0 %1971, %v1526_v50  }
 0x246   : > { %2078 = vrot.lane.b32.xlu1 %v2077_v53, %s2103_s28 }
 0x24a   : > { %2088 = vrot.lane.b32.xlu1 %v2087_v55, %s2103_s28 }
 0x28a   : > { %v1989_v62 = vpop.permute.xlu1 %1988 }
 0x28b   : > { %v1991_v58 = vunpack.i.h.bf16 %v1989_v62  ;;  %v1990_v41 = vunpack.i.l.bf16 %v1989_v62 }
 0x28c   : > { %v1994_v59 = vpop.permute.xlu0 %1993 }
 0x28d   : > { %v1996_v63 = vunpack.i.h.bf16 %v1994_v59  ;;  %v1995_v0 = vunpack.i.l.bf16 %v1994_v59  ;;  %v1134_v26 = vsel %vm389_vm7, %v1990_v41, %v1991_v58  ;;  %v1133_v35 = vsel %vm389_vm7, %v1980_v20, %v1990_v41 }
 0x28f   : > { %v1098_v15 = vsel %vm334_vm5, %v1995_v0, %v1996_v63  ;;  %v1097_v22 = vsel %vm334_vm5, %v1975_v4, %v1995_v0 }
 0x290   : > { %v1999_v61 = vpop.permute.xlu0 %1998 }
 0x291   : > { %v2001_v29 = vunpack.i.h.bf16 %v1999_v61  ;;  %v2000_v30 = vunpack.i.l.bf16 %v1999_v61 }
 0x293   : > { %v1194_v46 = vsel %vm473_vm4, %v2000_v30, %v2001_v29  ;;  %v1193_v49 = vsel %vm473_vm4, %v1985_v34, %v2000_v30 }
 0x296   : > { %v2004_v2 = vpop.permute.xlu0 %2003 }
 0x297   : > { %v2006_v8 = vunpack.i.h.bf16 %v2004_v2  ;;  %v2005_v9 = vunpack.i.l.bf16 %v2004_v2 }
 0x298   : > { %v2009_v11 = vpop.permute.xlu1 %2008 }
 0x299   : > { %v2011_v13 = vunpack.i.h.bf16 %v2009_v11  ;;  %v2010_v40 = vunpack.i.l.bf16 %v2009_v11  ;;  %v1136_v12 = vsel %vm389_vm7, %v2005_v9, %v2006_v8  ;;  %v1135_v18 = vsel %vm389_vm7, %v1981_v19, %v2005_v9 }
 0x29a   : > { %v2565_v28 = vpop.permute.xlu0 %2028  ;;  %v1764_v32 = vpack.c.bf16 %v1136_v12, %v1134_v26  ;;  %v1766_v42 = vpack.c.bf16 %v1135_v18, %v1133_v35 }
 0x29b   : > { %v1100_v21 = vsel %vm334_vm5, %v2010_v40, %v2011_v13  ;;  %v1099_v23 = vsel %vm334_vm5, %v1976_v10, %v2010_v40  ;;  %v2031_v0 = vunpack.i.h.bf16 %v2565_v28  ;;  %v2030_v2 = vunpack.i.l.bf16 %v2565_v28 }
 0x29c   : > { %v2014_v27 = vpop.permute.xlu1 %2013  ;;  %v1760_v24 = vpack.c.bf16 %v1100_v21, %v1098_v15  ;;  %v1762_v25 = vpack.c.bf16 %v1099_v23, %v1097_v22 }
 0x29d   : > { %v2016_v16 = vunpack.i.h.bf16 %v2014_v27  ;;  %v2015_v6 = vunpack.i.l.bf16 %v2014_v27  ;;  %v1322_v20 = vsel %vm516_vm2, %v2030_v2, %v2031_v0 }
 0x29e   : > { %1761 = vmatprep.subr.bf16.mxu1 %v1760_v24  ;;  %v2034_v33 = vpop.permute.xlu0 %2033 }
 0x29f   : > { %1763 = vmatpush1.bf16.msra.mxu1 %v1762_v25  ;;  %v2036_v36 = vunpack.i.h.bf16 %v2034_v33  ;;  %v2035_v7 = vunpack.i.l.bf16 %v2034_v33  ;;  %v1254_v56 = vsel %vm557_vm3, %v2015_v6, %v2016_v16 }
 0x2a0   : > { %v2019_v38 = vpop.permute.xlu1 %2018  ;;  %1765 = vmatprep.subr.bf16.mxu1 %v1764_v32 }
 0x2a1   : > { %v2021_v43 = vunpack.i.h.bf16 %v2019_v38  ;;  %v2020_v45 = vunpack.i.l.bf16 %v2019_v38  ;;  %v1256_v50 = vsel %vm557_vm3, %v2035_v7, %v2036_v36 }
 0x2a2   : > { %v2039_v47 = vpop.permute.xlu0 %2038  ;;  %v1772_v57 = vpack.c.bf16 %v1256_v50, %v1254_v56 }
 0x2a3   : > { %1767 = vmatpush1.bf16.msra.mxu1 %v1766_v42  ;;  %v1196_v48 = vsel %vm473_vm4, %v2020_v45, %v2021_v43  ;;  %v1195_v1 = vsel %vm473_vm4, %v1986_v37, %v2020_v45  ;;  %v2040_v8 = vunpack.i.l.bf16 %v2039_v47  ;;  %v2041_v11 = vunpack.i.h.bf16 %v2039_v47 }
 0x2a4   : > { %v2024_v39 = vpop.permute.xlu1 %2023  ;;  %v1768_v52 = vpack.c.bf16 %v1196_v48, %v1194_v46  ;;  %v1770_v53 = vpack.c.bf16 %v1195_v1, %v1193_v49 }
 0x2a5   : > { %v2026_v54 = vunpack.i.h.bf16 %v2024_v39  ;;  %v2025_v55 = vunpack.i.l.bf16 %v2024_v39  ;;  %v1321_v21 = vsel %vm516_vm2, %v2040_v8, %v2030_v2 }
 0x2a6   : > { %1769 = vmatprep.subr.bf16.mxu1 %v1768_v52  ;;  %v2059_v59 = vpop.permute.xlu0 %2058 }
 0x2a7   : > { %1771 = vmatpush1.bf16.msra.mxu1 %v1770_v53  ;;  %v1253_v60 = vsel %vm557_vm3, %v2025_v55, %v2015_v6  ;;  %v1255_v61 = vsel %vm557_vm3, %v2026_v54, %v2035_v7  ;;  %v2061_v25 = vunpack.i.h.bf16 %v2059_v59  ;;  %v2060_v26 = vunpack.i.l.bf16 %v2059_v59 }
 0x2a8   : > { %v2044_v62 = vpop.permute.xlu1 %2043  ;;  %1773 = vmatprep.subr.bf16.mxu1 %v1772_v57  ;;  %v1774_v63 = vpack.c.bf16 %v1255_v61, %v1253_v60 }
 0x2a9   : > { %v2046_v41 = vunpack.i.h.bf16 %v2044_v62  ;;  %v2045_v13 = vunpack.i.l.bf16 %v2044_v62  ;;  %v1418_v36 = vsel %vm788_vm8, %v2060_v26, %v2061_v25 }
 0x2aa   : > { %v2069_v4 = vpop.permute.xlu0 %2068 }
 0x2ab   : > { %1775 = vmatpush1.bf16.msra.mxu1 %v1774_v63  ;;  %v2071_v9 = vunpack.i.h.bf16 %v2069_v4  ;;  %v2070_v10 = vunpack.i.l.bf16 %v2069_v4  ;;  %v1382_v24 = vsel %vm432_vm1, %v2045_v13, %v2046_v41 }
 0x2ac   : > { %v2049_v58 = vpop.permute.xlu1 %2048  ;;  %1777 = vmatprep.subr.bf16.mxu1 %v1776_v14 }
 0x2ad   : > { %v2051_v40 = vunpack.i.h.bf16 %v2049_v58  ;;  %v2050_v19 = vunpack.i.l.bf16 %v2049_v58  ;;  %v1384_v31 = vsel %vm432_vm1, %v2070_v10, %v2071_v9 }
 0x2ae   : > { %v2074_v15 = vpop.permute.xlu0 %2073  ;;  %v1784_v3 = vpack.c.bf16 %v1384_v31, %v1382_v24 }
 0x2af   : > { %1779 = vmatpush1.bf16.msra.mxu1 %v1778_v17  ;;  %v1324_v28 = vsel %vm516_vm2, %v2050_v19, %v2051_v40  ;;  %v1323_v22 = vsel %vm516_vm2, %v2041_v11, %v2050_v19  ;;  %v2075_v44 = vunpack.i.l.bf16 %v2074_v15  ;;  %v2076_v35 = vunpack.i.h.bf16 %v2074_v15 }
 0x2b0   : > { %v2054_v5 = vpop.permute.xlu1 %2053  ;;  %v1780_v14 = vpack.c.bf16 %v1324_v28, %v1322_v20  ;;  %v1782_v23 = vpack.c.bf16 %v1323_v22, %v1321_v21 }
 0x2b1   : > { %v2056_v12 = vunpack.i.h.bf16 %v2054_v5  ;;  %v2055_v27 = vunpack.i.l.bf16 %v2054_v5  ;;  %v1417_v7 = vsel %vm788_vm8, %v2075_v44, %v2060_v26 }
 0x2b2   : > { %1781 = vmatprep.subr.bf16.mxu1 %v1780_v14  ;;  %v2084_v32 = vpop.permute.xlu0 %2083 }
 0x2b3   : > { %1783 = vmatpush1.bf16.msra.mxu1 %v1782_v23  ;;  %v1381_v17 = vsel %vm432_vm1, %v2055_v27, %v2045_v13  ;;  %v1383_v18 = vsel %vm432_vm1, %v2056_v12, %v2070_v10  ;;  %v2086_v37 = vunpack.i.h.bf16 %v2084_v32  ;;  %v2085_v38 = vunpack.i.l.bf16 %v2084_v32 }
 0x2b4   : > { %v2064_v29 = vpop.permute.xlu1 %2063  ;;  %1785 = vmatprep.subr.bf16.mxu1 %v1784_v3  ;;  %v1786_v30 = vpack.c.bf16 %v1383_v18, %v1381_v17 }
 0x2b5   : > { %v2066_v33 = vunpack.i.h.bf16 %v2064_v29  ;;  %v2065_v34 = vunpack.i.l.bf16 %v2064_v29  ;;  %v1480_v49 = vsel %vm293_vm0, %v2085_v38, %v2086_v37 }
 0x2b7   : > { %1787 = vmatpush1.bf16.msra.mxu1 %v1786_v30  ;;  %v1420_v42 = vsel %vm788_vm8, %v2065_v34, %v2066_v33  ;;  %v1419_v16 = vsel %vm788_vm8, %v2076_v35, %v2065_v34 }
 0x2b8   : > { %v2079_v6 = vpop.permute.xlu1 %2078  ;;  %v1788_v43 = vpack.c.bf16 %v1420_v42, %v1418_v36  ;;  %v1790_v45 = vpack.c.bf16 %v1419_v16, %v1417_v7 }
 0x2b9   : > { %v2081_v46 = vunpack.i.h.bf16 %v2079_v6  ;;  %v2080_v47 = vunpack.i.l.bf16 %v2079_v6 }
 0x2ba   : > { %1789 = vmatprep.subr.bf16.mxu1 %v1788_v43 }
 0x2bb   : > { %1791 = vmatpush1.bf16.msra.mxu1 %v1790_v45  ;;  %v1478_v48 = vsel %vm293_vm0, %v2080_v47, %v2081_v46 }
 0x2bc   : > { %v2089_v1 = vpop.permute.xlu1 %2088  ;;  %v1792_v50 = vpack.c.bf16 %v1480_v49, %v1478_v48 }
 0x2bd   : > { %v2091_v39 = vunpack.i.h.bf16 %v2089_v1  ;;  %v2090_v52 = vunpack.i.l.bf16 %v2089_v1 }
 0x2be   : > { %1793 = vmatprep.subr.bf16.mxu1 %v1792_v50 }
 0x2bf   : > { %v1477_v53 = vsel %vm293_vm0, %v2090_v52, %v2080_v47  ;;  %v1479_v54 = vsel %vm293_vm0, %v2091_v39, %v2085_v38 }
 0x2c0   : > { %v1794_v55 = vpack.c.bf16 %v1479_v54, %v1477_v53 }
 0x2c2   : > { %1795 = vmatpush1.bf16.msra.mxu1 %v1794_v55 }
 0x2c3   : > { %v1530_v56 = vpop.permute.xlu0 %1529 }
 0x2c5   : > { %1609 = vmatmul.mubr.f32.vlgmr.msra.gmra.mrb[0].mxu1 %v2555_v51 }
 0x398   : > { %v1610_v57 = vpop.f32.mrb[0].mxu1 }
 0x399   : > { %v1611_v59 = vadd.f32 %v1610_v57, %v1530_v56  ;;  %v1612_v60 = vpop.f32.mrb[1].mxu1 }
 0x39a   : > { %v1613_v61 = vadd.f32 %v1612_v60, %v1530_v56 }
 0x39c   : > { %v1617_v62 = vcombine.low %v1611_v59, %v1613_v61 }
 0x39e   : > { %1704 = vst.sshfl [vmem:[%s251_s24] sm:$0x33 pattern:$0x76325410] %v1617_v62 }
 0x39f PF: > { %s16_s21 = sadd.s32 1, %s2099_s21  }
 0x3a0   : > { %p13_p4 = scmp.ge.s32.totalorder %s16_s21, 4  }
 0x3a2   :  { %15 = sbr.rel (!%p13_p4) target bundleno = 1 (0x1), region = 79 }

</bundles_post_ra>
